<compile_context>
chip_gen: v6e
topology: v6e:2x2x1
jax: 0.10.0
libtpu: 0.0.40
codegen_flags: <defaults>
</compile_context>

<pallas_src>
import functools

import jax
import jax.numpy as jnp
from jax.experimental import pallas as pl
from jax.experimental.pallas import tpu as pltpu

IN_CH = 3
FEAT_CH = 32                 # per-tower channels
C2 = 2 * FEAT_CH             # concatenated cls|box tower width carried in-kernel
NUM_CLASSES = 8
NUM_TOWER_CONVS = 2
STEM_STRIDE = 2
OUT_LANES = 128              # lane-dense output slab width


# ----------------------------------------------------------------------------
# Fused FCOS forward kernel (stem matmul + towers + heads + decode)
# ----------------------------------------------------------------------------
def _fcos_fused_kernel(patches_ref, w_stem_ref, b_stem_ref,
                       w_t_ref, b_t_ref, w_h_ref, b_h_ref,
                       locs_ref, sgn_ref, place_ref, out_ref,
                       *, num_tower, num_classes, ho, wo):
    P = ho * wo
    c2 = b_stem_ref.shape[-1]

    # Tap order matches the wrapper-side weight packing: (dy, dx), dy outer.
    taps = [(dy, dx) for dy in (-1, 0, 1) for dx in (-1, 0, 1)]

    # Boundary masks from an in-kernel iota (no captured array constants, no
    # vector integer division: y-range tests reduce to row-range tests and
    # x = row % wo is a bitwise AND for power-of-two wo).
    row = jax.lax.broadcasted_iota(jnp.int32, (P, c2), 0)      # row = y*wo + x
    if (wo & (wo - 1)) == 0:
        xx = row & (wo - 1)
    else:
        xx = row % wo
    masks = []
    for dy, dx in taps:
        m = ((row >= max(0, -dy) * wo) & (row < min(ho, ho - dy) * wo)
             & (xx >= max(0, -dx)) & (xx < min(wo, wo - dx)))
        masks.append(m)

    def conv3x3(x, w_bf16, bias):
        """3x3 same-padding conv on a VMEM-resident (P, C) feature map.

        Spatial shifts via pltpu.roll on the row axis (XLU) + boundary mask
        (VPU); the 9 taps are fused into ONE K=9*C MXU matmul against a
        pre-packed (9*C, Cout) bf16 weight, bias added once.
        """
        pieces = []
        for k, (dy, dx) in enumerate(taps):
            if dy == 0 and dx == 0:
                pieces.append(x)                               # center tap
            else:
                shift = (-(dy * wo + dx)) % P                  # row -> row + dy*wo + dx
                rolled = pltpu.roll(x, shift, axis=0)
                pieces.append(jnp.where(masks[k], rolled, 0.0))
        big = jnp.concatenate(pieces, axis=1).astype(jnp.bfloat16)   # (P, 9*C)
        return jnp.dot(big, w_bf16, preferred_element_type=jnp.float32) + bias

    # Stem (stride-2 conv): patches were im2col'd in the wrapper -> one matmul.
    # Stem weights are duplicated so this directly emits the cls|box feature.
    feat = jnp.maximum(
        jnp.dot(patches_ref[0], w_stem_ref[...],
                preferred_element_type=jnp.float32) + b_stem_ref[...], 0.0)

    # Shared cls|box towers (block-diagonal fused weights).
    for l in range(num_tower):
        feat = jnp.maximum(conv3x3(feat, w_t_ref[l], b_t_ref[l]), 0.0)

    # Fused cls_logits | ctrness | bbox_pred head -> (P, NC + 5).
    head = conv3x3(feat, w_h_ref[...], b_h_ref[...])

    # FCOS decode epilogue (EUP exp + approx reciprocal, all f32).
    # NOTE: score = sigmoid(cls) * sigmoid(ctr) (some FCOS variants use sqrt).
    sig = pl.reciprocal(1.0 + jnp.exp(-head[:, :num_classes + 1]), approx=True)
    scores = sig[:, :num_classes] * sig[:, num_classes:num_classes + 1]

    reg = head[:, num_classes + 1:num_classes + 5]             # (P, 4) l,t,r,b
    # TODO(synk): real FCOS applies a learnable per-level Scale before exp.
    boxes = locs_ref[...] + jnp.exp(reg) * sgn_ref[...]

    # Lane-dense (P, 128) slab: scores -> lanes [0, NC), boxes -> [NC, NC+4),
    # so the only store is an unmasked full-width vst.
    slab = jnp.dot(jnp.concatenate([scores, boxes], axis=1), place_ref[...],
                   preferred_element_type=jnp.float32)
    out_ref[0] = slab


# ----------------------------------------------------------------------------
# Wrapper-side helpers (weight packing, im2col for the stride-2 stem, etc.)
# ----------------------------------------------------------------------------
def _round_up(x, m):
    return ((x + m - 1) // m) * m


def _im2col_3x3(x_nhwc, stride):
    """PyTorch-style 3x3 / pad=1 im2col.  Returns (N, Ho*Wo, 9*C), Ho, Wo."""
    N, H, W, C = x_nhwc.shape
    xp = jnp.pad(x_nhwc, ((0, 0), (1, 1), (1, 1), (0, 0)))
    Ho = (H + 2 - 3) // stride + 1
    Wo = (W + 2 - 3) // stride + 1
    cols = []
    for dy in range(3):
        for dx in range(3):
            cols.append(xp[:, dy:dy + stride * (Ho - 1) + 1:stride,
                           dx:dx + stride * (Wo - 1) + 1:stride, :])
    patches = jnp.stack(cols, axis=3)                           # (N, Ho, Wo, 9, C)
    return patches.reshape(N, Ho * Wo, 9 * C), Ho, Wo


def _tap_mats(w_oihw):
    """(Cout, Cin, 3, 3) conv weight -> 9 (Cin, Cout) matrices, (ky, kx) order."""
    w = jnp.transpose(w_oihw, (2, 3, 1, 0))                     # (3, 3, Cin, Cout)
    return [w[ky, kx] for ky in range(3) for kx in range(3)]


def _pack_tower_layer(w_cls, w_box):
    """Two (C,C,3,3) tower convs -> one block-diagonal (9*2C, 2C) matmul weight."""
    C = w_cls.shape[0]
    z = jnp.zeros((C, C), jnp.float32)
    blocks = []
    for mc, mb in zip(_tap_mats(w_cls), _tap_mats(w_box)):
        blocks.append(jnp.concatenate(
            [jnp.concatenate([mc, z], axis=1),
             jnp.concatenate([z, mb], axis=1)], axis=0))
    return jnp.concatenate(blocks, axis=0)                      # (9*2C, 2C)


def _pack_head(w_cls, w_ctr, w_box, num_classes):
    """cls_logits + ctrness (cls path) and bbox_pred (box path) -> (9*2C, NC+5)."""
    C = w_cls.shape[1]
    blocks = []
    for mc, mt, mb in zip(_tap_mats(w_cls), _tap_mats(w_ctr), _tap_mats(w_box)):
        top = jnp.concatenate([mc, mt, jnp.zeros((C, 4), jnp.float32)], axis=1)
        bot = jnp.concatenate(
            [jnp.zeros((C, num_classes + 1), jnp.float32), mb], axis=1)
        blocks.append(jnp.concatenate([top, bot], axis=0))
    return jnp.concatenate(blocks, axis=0)                      # (9*2C, NC+5)


def _full_spec(a):
    nd = a.ndim
    return pl.BlockSpec(a.shape, lambda n, _nd=nd: (0,) * _nd)


# ----------------------------------------------------------------------------
# Synthetic FCOS model (deterministic weights) + inference wrapper
# ----------------------------------------------------------------------------
def init_params(key):
    def conv_p(k, cout, cin):
        kw, kb = jax.random.split(k)
        w = jax.random.normal(kw, (cout, cin, 3, 3), jnp.float32) * 0.1
        b = jax.random.normal(kb, (cout,), jnp.float32) * 0.01
        return w, b

    keys = jax.random.split(key, 4 + 2 * NUM_TOWER_CONVS)
    params = {"stem": conv_p(keys[0], FEAT_CH, IN_CH)}
    for i in range(NUM_TOWER_CONVS):
        params[f"cls_tower_{i}"] = conv_p(keys[1 + i], FEAT_CH, FEAT_CH)
        params[f"bbox_tower_{i}"] = conv_p(keys[1 + NUM_TOWER_CONVS + i],
                                           FEAT_CH, FEAT_CH)
    base = 1 + 2 * NUM_TOWER_CONVS
    params["cls_logits"] = conv_p(keys[base + 0], NUM_CLASSES, FEAT_CH)
    params["ctrness"] = conv_p(keys[base + 1], 1, FEAT_CH)
    params["bbox_pred"] = conv_p(keys[base + 2], 4, FEAT_CH)
    return params


def fcos_inference_wrapper(image_nchw, params):
    """Mirror of FCOSInferenceWrapper.forward: returns the 'instances' dict."""
    x = jnp.transpose(image_nchw, (0, 2, 3, 1)).astype(jnp.float32)  # NCHW->NHWC
    N = x.shape[0]

    # Stem im2col (only the stride-2, 3-channel stem is prepared outside the
    # kernel; the patch tensor is tiny).  K padded 27 -> 32 only (not 128).
    patches, Ho, Wo = _im2col_3x3(x, STEM_STRIDE)
    P = Ho * Wo
    k_raw = patches.shape[-1]
    k_pad = _round_up(k_raw, 8)
    patches = jnp.pad(patches, ((0, 0), (0, 0), (0, k_pad - k_raw)))
    patches = patches.astype(jnp.bfloat16)

    # Stem weight as a matmul weight, duplicated so the stem directly emits the
    # concatenated cls|box feature (wider MXU N dim, no in-kernel duplication).
    w_stem, b_stem = params["stem"]
    w_stem_mat = jnp.transpose(w_stem, (2, 3, 1, 0)).reshape(k_raw, FEAT_CH)
    w_stem2 = jnp.concatenate([w_stem_mat, w_stem_mat], axis=1)
    w_stem2 = jnp.pad(w_stem2, ((0, k_pad - k_raw), (0, 0))).astype(jnp.bfloat16)
    b_stem2 = jnp.concatenate([b_stem, b_stem]).reshape(1, C2)

    # Tower layers: block-diagonal (cls | box) fused per-tap weights, bf16.
    w_tower = jnp.stack(
        [_pack_tower_layer(params[f"cls_tower_{i}"][0],
                           params[f"bbox_tower_{i}"][0])
         for i in range(NUM_TOWER_CONVS)], axis=0).astype(jnp.bfloat16)
    b_tower = jnp.stack(
        [jnp.concatenate([params[f"cls_tower_{i}"][1],
                          params[f"bbox_tower_{i}"][1]]).reshape(1, C2)
         for i in range(NUM_TOWER_CONVS)], axis=0)               # (L, 1, 2C) f32

    # Fused cls_logits + ctrness + bbox_pred head.
    w_head = _pack_head(params["cls_logits"][0], params["ctrness"][0],
                        params["bbox_pred"][0], NUM_CLASSES).astype(jnp.bfloat16)
    b_head = jnp.concatenate([params["cls_logits"][1], params["ctrness"][1],
                              params["bbox_pred"][1]]).reshape(1, NUM_CLASSES + 5)

    # FCOS point locations [cx, cy, cx, cy] and the signed stride multiplier
    # [-s, -s, s, s], passed as real inputs (never captured kernel constants).
    ys, xs = jnp.meshgrid(jnp.arange(Ho), jnp.arange(Wo), indexing="ij")
    cx = (xs.reshape(-1) * STEM_STRIDE + STEM_STRIDE // 2).astype(jnp.float32)
    cy = (ys.reshape(-1) * STEM_STRIDE + STEM_STRIDE // 2).astype(jnp.float32)
    locs4 = jnp.stack([cx, cy, cx, cy], axis=-1)                 # (P, 4)
    sgn4 = jnp.tile(jnp.array([-1.0, -1.0, 1.0, 1.0], jnp.float32) * STEM_STRIDE,
                    (P, 1))                                      # (P, 4)

    # Placement: [scores | boxes] -> lanes [0, NC+4) of a 128-lane slab.
    place = jnp.eye(NUM_CLASSES + 4, OUT_LANES, dtype=jnp.float32)

    args = (patches, w_stem2, b_stem2, w_tower, b_tower, w_head, b_head,
            locs4, sgn4, place)
    in_specs = ([pl.BlockSpec((1, P, k_pad), lambda n: (n, 0, 0))]
                + [_full_spec(a) for a in args[1:]])

    flops_per_img = (2 * P * k_pad * C2
                     + NUM_TOWER_CONVS * 2 * P * (9 * C2) * C2
                     + 2 * P * (9 * C2) * (NUM_CLASSES + 5)
                     + 2 * P * (NUM_CLASSES + 4) * OUT_LANES)
    bytes_accessed = (sum(int(a.size) * a.dtype.itemsize for a in args)
                      + N * P * OUT_LANES * 4)

    slab = pl.pallas_call(
        functools.partial(_fcos_fused_kernel,
                          num_tower=NUM_TOWER_CONVS,
                          num_classes=NUM_CLASSES,
                          ho=Ho, wo=Wo),
        out_shape=jax.ShapeDtypeStruct((N, P, OUT_LANES), jnp.float32),
        grid_spec=pltpu.PrefetchScalarGridSpec(
            num_scalar_prefetch=0,
            grid=(N,),
            in_specs=in_specs,
            out_specs=pl.BlockSpec((1, P, OUT_LANES), lambda n: (n, 0, 0)),
        ),
        compiler_params=pltpu.CompilerParams(
            dimension_semantics=("parallel",)),
        cost_estimate=pl.CostEstimate(
            flops=int(N * flops_per_img),
            transcendentals=int(N * P * (NUM_CLASSES + 1 + 4)),
            bytes_accessed=int(bytes_accessed)),
    )(*args)
    # TODO(synk): for batch-1 on v7x (2 TensorCores) add a second "parallel"
    # grid axis splitting P into row blocks (the roll boundary masks handle the
    # halo); at real FCOS sizes (FEAT_CH=256, ~800px) switch to a row-block
    # pipeline and set vmem_limit_bytes per chip generation (v7x: 64 MiB VMEM).

    cls_scores = slab[:, :, :NUM_CLASSES]                        # (N, P, NC)
    boxes = slab[:, :, NUM_CLASSES:NUM_CLASSES + 4]              # (N, P, 4)

    # TODO(synk): class-wise NMS / top-k Instances filtering has no clean Pallas
    # equivalent (data-dependent output size); dense per-location predictions
    # are returned instead.
    return {
        "pred_boxes": boxes,
        "scores": jnp.max(cls_scores, axis=-1),
        "pred_classes": jnp.argmax(cls_scores, axis=-1).astype(jnp.int32),
        "cls_scores": cls_scores,
    }


# ----------------------------------------------------------------------------
# Pure-XLA reference (for a numerical self-check; full f32 precision)
# ----------------------------------------------------------------------------
def _conv3x3_ref(x_nhwc, w, b, stride=1, relu=False):
    N = x_nhwc.shape[0]
    cin = x_nhwc.shape[-1]
    cout = w.shape[0]
    patches, Ho, Wo = _im2col_3x3(x_nhwc, stride)
    w_mat = jnp.transpose(w, (2, 3, 1, 0)).reshape(9 * cin, cout)
    out = jnp.dot(patches.reshape(-1, 9 * cin), w_mat,
                  precision=jax.lax.Precision.HIGHEST) + b
    if relu:
        out = jnp.maximum(out, 0.0)
    return out.reshape(N, Ho, Wo, cout)


def _reference_forward(image_nchw, params):
    x = jnp.transpose(image_nchw, (0, 2, 3, 1)).astype(jnp.float32)
    feat = _conv3x3_ref(x, *params["stem"], stride=STEM_STRIDE, relu=True)
    N, Ho, Wo, _ = feat.shape
    cls_t = feat
    box_t = feat
    for i in range(NUM_TOWER_CONVS):
        cls_t = _conv3x3_ref(cls_t, *params[f"cls_tower_{i}"], relu=True)
        box_t = _conv3x3_ref(box_t, *params[f"bbox_tower_{i}"], relu=True)
    cls_l = _conv3x3_ref(cls_t, *params["cls_logits"]).reshape(N, -1, NUM_CLASSES)
    ctr = _conv3x3_ref(cls_t, *params["ctrness"]).reshape(N, -1, 1)
    reg = _conv3x3_ref(box_t, *params["bbox_pred"]).reshape(N, -1, 4)

    scores = jax.nn.sigmoid(cls_l) * jax.nn.sigmoid(ctr)
    ys, xs = jnp.meshgrid(jnp.arange(Ho), jnp.arange(Wo), indexing="ij")
    cx = (xs.reshape(-1) * STEM_STRIDE + STEM_STRIDE // 2).astype(jnp.float32)
    cy = (ys.reshape(-1) * STEM_STRIDE + STEM_STRIDE // 2).astype(jnp.float32)
    locs4 = jnp.stack([cx, cy, cx, cy], axis=-1)[None]
    boxes = locs4 + jnp.exp(reg) * STEM_STRIDE * jnp.array([[[-1.0, -1.0, 1.0, 1.0]]])
    return {"cls_scores": scores, "pred_boxes": boxes}


if __name__ == "__main__":
    image = jax.random.normal(jax.random.PRNGKey(0), (2, IN_CH, 16, 16),
                              jnp.float32)                        # NCHW input
    params = init_params(jax.random.PRNGKey(1))

    run = jax.jit(lambda img: fcos_inference_wrapper(img, params))
    out = run(image)
    jax.block_until_ready(out)

    P = (16 // STEM_STRIDE) * (16 // STEM_STRIDE)
    assert out["pred_boxes"].shape == (2, P, 4)
    assert out["cls_scores"].shape == (2, P, NUM_CLASSES)
    assert out["scores"].shape == (2, P)
    assert out["pred_classes"].shape == (2, P)

    # Self-check vs. a full-precision XLA reference.  The kernel uses bf16 MXU
    # operands with f32 accumulation (plus an approx-reciprocal sigmoid), so
    # tolerances allow ~1% operand-rounding drift; structural bugs (wrong tap
    # order / weight packing / roll direction) produce errors >> these bounds.
    ref = _reference_forward(image, params)
    score_err = float(jnp.max(jnp.abs(out["cls_scores"] - ref["cls_scores"])))
    box_err = float(jnp.max(jnp.abs(out["pred_boxes"] - ref["pred_boxes"])
                            / (1.0 + jnp.abs(ref["pred_boxes"]))))
    assert score_err < 8e-2, f"score_err={score_err}"
    assert box_err < 1e-1, f"box_err={box_err}"

    print("KERNEL_OK")
</pallas_src>

<mosaic_0001>
module attributes {stable_mosaic.version = 11 : i64} {
  func.func @_fcos_fused_kernel(%arg0: i32, %arg1: memref<1x64x32xbf16, #tpu.memory_space<vmem>>, %arg2: memref<32x64xbf16, #tpu.memory_space<vmem>>, %arg3: memref<1x64xf32, #tpu.memory_space<vmem>>, %arg4: memref<2x576x64xbf16, #tpu.memory_space<vmem>>, %arg5: memref<2x1x64xf32, #tpu.memory_space<vmem>>, %arg6: memref<576x13xbf16, #tpu.memory_space<vmem>>, %arg7: memref<1x13xf32, #tpu.memory_space<vmem>>, %arg8: memref<64x4xf32, #tpu.memory_space<vmem>>, %arg9: memref<64x4xf32, #tpu.memory_space<vmem>>, %arg10: memref<12x128xf32, #tpu.memory_space<vmem>>, %arg11: memref<1x64x128xf32, #tpu.memory_space<vmem>>) attributes {dimension_semantics = [#tpu.dimension_semantics<parallel>], iteration_bounds = array<i64: 2>, scalar_prefetch = 0 : i64, scratch_operands = 0 : i64, tpu.core_type = #tpu.core_type<tc>, window_params = [{transform_indices = @transform_0, window_bounds = array<i64: 1, 64, 32>}, {pipeline_mode = #tpu.pipeline_mode<synchronous>, transform_indices = @transform_1, window_bounds = array<i64: 32, 64>}, {pipeline_mode = #tpu.pipeline_mode<synchronous>, transform_indices = @transform_2, window_bounds = array<i64: 1, 64>}, {pipeline_mode = #tpu.pipeline_mode<synchronous>, transform_indices = @transform_3, window_bounds = array<i64: 2, 576, 64>}, {pipeline_mode = #tpu.pipeline_mode<synchronous>, transform_indices = @transform_4, window_bounds = array<i64: 2, 1, 64>}, {pipeline_mode = #tpu.pipeline_mode<synchronous>, transform_indices = @transform_5, window_bounds = array<i64: 576, 13>}, {pipeline_mode = #tpu.pipeline_mode<synchronous>, transform_indices = @transform_6, window_bounds = array<i64: 1, 13>}, {pipeline_mode = #tpu.pipeline_mode<synchronous>, transform_indices = @transform_7, window_bounds = array<i64: 64, 4>}, {pipeline_mode = #tpu.pipeline_mode<synchronous>, transform_indices = @transform_8, window_bounds = array<i64: 64, 4>}, {pipeline_mode = #tpu.pipeline_mode<synchronous>, transform_indices = @transform_9, window_bounds = array<i64: 12, 128>}, {transform_indices = @transform_10, window_bounds = array<i64: 1, 64, 128>}]} {
    %0 = tpu.iota {dimensions = array<i32: 0>} : vector<64x64xi32>
    %c7_i32 = arith.constant 7 : i32
    %1 = vector.broadcast %c7_i32 : i32 to vector<64x64xi32>
    %2 = arith.andi %0, %1 : vector<64x64xi32>
    %c8_i32 = arith.constant 8 : i32
    %3 = vector.broadcast %c8_i32 : i32 to vector<64x64xi32>
    %4 = arith.cmpi sge, %0, %3 : vector<64x64xi32>
    %c64_i32 = arith.constant 64 : i32
    %5 = vector.broadcast %c64_i32 : i32 to vector<64x64xi32>
    %6 = arith.cmpi slt, %0, %5 : vector<64x64xi32>
    %7 = arith.andi %4, %6 : vector<64x64xi1>
    %c1_i32 = arith.constant 1 : i32
    %8 = vector.broadcast %c1_i32 : i32 to vector<64x64xi32>
    %9 = arith.cmpi sge, %2, %8 : vector<64x64xi32>
    %10 = arith.andi %7, %9 : vector<64x64xi1>
    %c8_i32_0 = arith.constant 8 : i32
    %11 = vector.broadcast %c8_i32_0 : i32 to vector<64x64xi32>
    %12 = arith.cmpi slt, %2, %11 : vector<64x64xi32>
    %13 = arith.andi %10, %12 : vector<64x64xi1>
    %c8_i32_1 = arith.constant 8 : i32
    %14 = vector.broadcast %c8_i32_1 : i32 to vector<64x64xi32>
    %15 = arith.cmpi sge, %0, %14 : vector<64x64xi32>
    %c64_i32_2 = arith.constant 64 : i32
    %16 = vector.broadcast %c64_i32_2 : i32 to vector<64x64xi32>
    %17 = arith.cmpi slt, %0, %16 : vector<64x64xi32>
    %18 = arith.andi %15, %17 : vector<64x64xi1>
    %c0_i32 = arith.constant 0 : i32
    %19 = vector.broadcast %c0_i32 : i32 to vector<64x64xi32>
    %20 = arith.cmpi sge, %2, %19 : vector<64x64xi32>
    %21 = arith.andi %18, %20 : vector<64x64xi1>
    %c8_i32_3 = arith.constant 8 : i32
    %22 = vector.broadcast %c8_i32_3 : i32 to vector<64x64xi32>
    %23 = arith.cmpi slt, %2, %22 : vector<64x64xi32>
    %24 = arith.andi %21, %23 : vector<64x64xi1>
    %c8_i32_4 = arith.constant 8 : i32
    %25 = vector.broadcast %c8_i32_4 : i32 to vector<64x64xi32>
    %26 = arith.cmpi sge, %0, %25 : vector<64x64xi32>
    %c64_i32_5 = arith.constant 64 : i32
    %27 = vector.broadcast %c64_i32_5 : i32 to vector<64x64xi32>
    %28 = arith.cmpi slt, %0, %27 : vector<64x64xi32>
    %29 = arith.andi %26, %28 : vector<64x64xi1>
    %c0_i32_6 = arith.constant 0 : i32
    %30 = vector.broadcast %c0_i32_6 : i32 to vector<64x64xi32>
    %31 = arith.cmpi sge, %2, %30 : vector<64x64xi32>
    %32 = arith.andi %29, %31 : vector<64x64xi1>
    %c7_i32_7 = arith.constant 7 : i32
    %33 = vector.broadcast %c7_i32_7 : i32 to vector<64x64xi32>
    %34 = arith.cmpi slt, %2, %33 : vector<64x64xi32>
    %35 = arith.andi %32, %34 : vector<64x64xi1>
    %c0_i32_8 = arith.constant 0 : i32
    %36 = vector.broadcast %c0_i32_8 : i32 to vector<64x64xi32>
    %37 = arith.cmpi sge, %0, %36 : vector<64x64xi32>
    %c64_i32_9 = arith.constant 64 : i32
    %38 = vector.broadcast %c64_i32_9 : i32 to vector<64x64xi32>
    %39 = arith.cmpi slt, %0, %38 : vector<64x64xi32>
    %40 = arith.andi %37, %39 : vector<64x64xi1>
    %c1_i32_10 = arith.constant 1 : i32
    %41 = vector.broadcast %c1_i32_10 : i32 to vector<64x64xi32>
    %42 = arith.cmpi sge, %2, %41 : vector<64x64xi32>
    %43 = arith.andi %40, %42 : vector<64x64xi1>
    %c8_i32_11 = arith.constant 8 : i32
    %44 = vector.broadcast %c8_i32_11 : i32 to vector<64x64xi32>
    %45 = arith.cmpi slt, %2, %44 : vector<64x64xi32>
    %46 = arith.andi %43, %45 : vector<64x64xi1>
    %c0_i32_12 = arith.constant 0 : i32
    %47 = vector.broadcast %c0_i32_12 : i32 to vector<64x64xi32>
    %48 = arith.cmpi sge, %0, %47 : vector<64x64xi32>
    %c64_i32_13 = arith.constant 64 : i32
    %49 = vector.broadcast %c64_i32_13 : i32 to vector<64x64xi32>
    %50 = arith.cmpi slt, %0, %49 : vector<64x64xi32>
    %51 = arith.andi %48, %50 : vector<64x64xi1>
    %c0_i32_14 = arith.constant 0 : i32
    %52 = vector.broadcast %c0_i32_14 : i32 to vector<64x64xi32>
    %53 = arith.cmpi sge, %2, %52 : vector<64x64xi32>
    %54 = arith.andi %51, %53 : vector<64x64xi1>
    %c7_i32_15 = arith.constant 7 : i32
    %55 = vector.broadcast %c7_i32_15 : i32 to vector<64x64xi32>
    %56 = arith.cmpi slt, %2, %55 : vector<64x64xi32>
    %57 = arith.andi %54, %56 : vector<64x64xi1>
    %c0_i32_16 = arith.constant 0 : i32
    %58 = vector.broadcast %c0_i32_16 : i32 to vector<64x64xi32>
    %59 = arith.cmpi sge, %0, %58 : vector<64x64xi32>
    %c56_i32 = arith.constant 56 : i32
    %60 = vector.broadcast %c56_i32 : i32 to vector<64x64xi32>
    %61 = arith.cmpi slt, %0, %60 : vector<64x64xi32>
    %62 = arith.andi %59, %61 : vector<64x64xi1>
    %c1_i32_17 = arith.constant 1 : i32
    %63 = vector.broadcast %c1_i32_17 : i32 to vector<64x64xi32>
    %64 = arith.cmpi sge, %2, %63 : vector<64x64xi32>
    %65 = arith.andi %62, %64 : vector<64x64xi1>
    %c8_i32_18 = arith.constant 8 : i32
    %66 = vector.broadcast %c8_i32_18 : i32 to vector<64x64xi32>
    %67 = arith.cmpi slt, %2, %66 : vector<64x64xi32>
    %68 = arith.andi %65, %67 : vector<64x64xi1>
    %c0_i32_19 = arith.constant 0 : i32
    %69 = vector.broadcast %c0_i32_19 : i32 to vector<64x64xi32>
    %70 = arith.cmpi sge, %0, %69 : vector<64x64xi32>
    %c56_i32_20 = arith.constant 56 : i32
    %71 = vector.broadcast %c56_i32_20 : i32 to vector<64x64xi32>
    %72 = arith.cmpi slt, %0, %71 : vector<64x64xi32>
    %73 = arith.andi %70, %72 : vector<64x64xi1>
    %c0_i32_21 = arith.constant 0 : i32
    %74 = vector.broadcast %c0_i32_21 : i32 to vector<64x64xi32>
    %75 = arith.cmpi sge, %2, %74 : vector<64x64xi32>
    %76 = arith.andi %73, %75 : vector<64x64xi1>
    %c8_i32_22 = arith.constant 8 : i32
    %77 = vector.broadcast %c8_i32_22 : i32 to vector<64x64xi32>
    %78 = arith.cmpi slt, %2, %77 : vector<64x64xi32>
    %79 = arith.andi %76, %78 : vector<64x64xi1>
    %c0_i32_23 = arith.constant 0 : i32
    %80 = vector.broadcast %c0_i32_23 : i32 to vector<64x64xi32>
    %81 = arith.cmpi sge, %0, %80 : vector<64x64xi32>
    %c56_i32_24 = arith.constant 56 : i32
    %82 = vector.broadcast %c56_i32_24 : i32 to vector<64x64xi32>
    %83 = arith.cmpi slt, %0, %82 : vector<64x64xi32>
    %84 = arith.andi %81, %83 : vector<64x64xi1>
    %c0_i32_25 = arith.constant 0 : i32
    %85 = vector.broadcast %c0_i32_25 : i32 to vector<64x64xi32>
    %86 = arith.cmpi sge, %2, %85 : vector<64x64xi32>
    %87 = arith.andi %84, %86 : vector<64x64xi1>
    %c7_i32_26 = arith.constant 7 : i32
    %88 = vector.broadcast %c7_i32_26 : i32 to vector<64x64xi32>
    %89 = arith.cmpi slt, %2, %88 : vector<64x64xi32>
    %90 = arith.andi %87, %89 : vector<64x64xi1>
    %c0 = arith.constant 0 : index
    %c0_27 = arith.constant 0 : index
    %c0_28 = arith.constant 0 : index
    %91 = vector.load %arg1[%c0, %c0_27, %c0_28] : memref<1x64x32xbf16, #tpu.memory_space<vmem>>, vector<1x64x32xbf16>
    %92 = vector.shape_cast %91 : vector<1x64x32xbf16> to vector<64x32xbf16>
    %c0_29 = arith.constant 0 : index
    %c0_30 = arith.constant 0 : index
    %93 = vector.load %arg2[%c0_29, %c0_30] : memref<32x64xbf16, #tpu.memory_space<vmem>>, vector<32x64xbf16>
    %cst = arith.constant dense<0.000000e+00> : vector<64x64xf32>
    %94 = tpu.matmul %92, %93, %cst {dimension_numbers = #tpu.dot_dimension_numbers<[1], [0], [0], [1], [0, 0, 1, 1], [], []>} : vector<64x32xbf16>, vector<32x64xbf16>, vector<64x64xf32> -> vector<64x64xf32>
    %c0_31 = arith.constant 0 : index
    %c0_32 = arith.constant 0 : index
    %95 = vector.load %arg3[%c0_31, %c0_32] : memref<1x64xf32, #tpu.memory_space<vmem>>, vector<1x64xf32>
    %96 = vector.broadcast %95 : vector<1x64xf32> to vector<64x64xf32>
    %97 = arith.addf %94, %96 : vector<64x64xf32>
    %cst_33 = arith.constant 0.000000e+00 : f32
    %98 = vector.broadcast %cst_33 : f32 to vector<64x64xf32>
    %99 = arith.maximumf %97, %98 : vector<64x64xf32>
    %c0_34 = arith.constant 0 : index
    %c0_35 = arith.constant 0 : index
    %c0_36 = arith.constant 0 : index
    %100 = vector.load %arg4[%c0_34, %c0_35, %c0_36] : memref<2x576x64xbf16, #tpu.memory_space<vmem>>, vector<1x576x64xbf16>
    %101 = vector.shape_cast %100 : vector<1x576x64xbf16> to vector<576x64xbf16>
    %c0_37 = arith.constant 0 : index
    %c0_38 = arith.constant 0 : index
    %c0_39 = arith.constant 0 : index
    %102 = vector.load %arg5[%c0_37, %c0_38, %c0_39] : memref<2x1x64xf32, #tpu.memory_space<vmem>>, vector<1x1x64xf32>
    %103 = vector.shape_cast %102 : vector<1x1x64xf32> to vector<1x64xf32>
    %c9_i32 = arith.constant 9 : i32
    %104 = tpu.dynamic_rotate %99 by %c9_i32 dim 0 : vector<64x64xf32>, i32 -> vector<64x64xf32>
    %cst_40 = arith.constant 0.000000e+00 : f32
    %105 = vector.broadcast %cst_40 : f32 to vector<64x64xf32>
    %106 = arith.select %13, %104, %105 : vector<64x64xi1>, vector<64x64xf32>
    %c8_i32_41 = arith.constant 8 : i32
    %107 = tpu.dynamic_rotate %99 by %c8_i32_41 dim 0 : vector<64x64xf32>, i32 -> vector<64x64xf32>
    %cst_42 = arith.constant 0.000000e+00 : f32
    %108 = vector.broadcast %cst_42 : f32 to vector<64x64xf32>
    %109 = arith.select %24, %107, %108 : vector<64x64xi1>, vector<64x64xf32>
    %c7_i32_43 = arith.constant 7 : i32
    %110 = tpu.dynamic_rotate %99 by %c7_i32_43 dim 0 : vector<64x64xf32>, i32 -> vector<64x64xf32>
    %cst_44 = arith.constant 0.000000e+00 : f32
    %111 = vector.broadcast %cst_44 : f32 to vector<64x64xf32>
    %112 = arith.select %35, %110, %111 : vector<64x64xi1>, vector<64x64xf32>
    %c1_i32_45 = arith.constant 1 : i32
    %113 = tpu.dynamic_rotate %99 by %c1_i32_45 dim 0 : vector<64x64xf32>, i32 -> vector<64x64xf32>
    %cst_46 = arith.constant 0.000000e+00 : f32
    %114 = vector.broadcast %cst_46 : f32 to vector<64x64xf32>
    %115 = arith.select %46, %113, %114 : vector<64x64xi1>, vector<64x64xf32>
    %c63_i32 = arith.constant 63 : i32
    %116 = tpu.dynamic_rotate %99 by %c63_i32 dim 0 : vector<64x64xf32>, i32 -> vector<64x64xf32>
    %cst_47 = arith.constant 0.000000e+00 : f32
    %117 = vector.broadcast %cst_47 : f32 to vector<64x64xf32>
    %118 = arith.select %57, %116, %117 : vector<64x64xi1>, vector<64x64xf32>
    %c57_i32 = arith.constant 57 : i32
    %119 = tpu.dynamic_rotate %99 by %c57_i32 dim 0 : vector<64x64xf32>, i32 -> vector<64x64xf32>
    %cst_48 = arith.constant 0.000000e+00 : f32
    %120 = vector.broadcast %cst_48 : f32 to vector<64x64xf32>
    %121 = arith.select %68, %119, %120 : vector<64x64xi1>, vector<64x64xf32>
    %c56_i32_49 = arith.constant 56 : i32
    %122 = tpu.dynamic_rotate %99 by %c56_i32_49 dim 0 : vector<64x64xf32>, i32 -> vector<64x64xf32>
    %cst_50 = arith.constant 0.000000e+00 : f32
    %123 = vector.broadcast %cst_50 : f32 to vector<64x64xf32>
    %124 = arith.select %79, %122, %123 : vector<64x64xi1>, vector<64x64xf32>
    %c55_i32 = arith.constant 55 : i32
    %125 = tpu.dynamic_rotate %99 by %c55_i32 dim 0 : vector<64x64xf32>, i32 -> vector<64x64xf32>
    %cst_51 = arith.constant 0.000000e+00 : f32
    %126 = vector.broadcast %cst_51 : f32 to vector<64x64xf32>
    %127 = arith.select %90, %125, %126 : vector<64x64xi1>, vector<64x64xf32>
    %128 = tpu.concatenate %106, %109, %112, %115, %99, %118, %121, %124, %127 in 1 : vector<64x64xf32>, vector<64x64xf32>, vector<64x64xf32>, vector<64x64xf32>, vector<64x64xf32>, vector<64x64xf32>, vector<64x64xf32>, vector<64x64xf32>, vector<64x64xf32> -> vector<64x576xf32>
    %129 = arith.truncf %128 : vector<64x576xf32> to vector<64x576xbf16>
    %cst_52 = arith.constant dense<0.000000e+00> : vector<64x64xf32>
    %130 = tpu.matmul %129, %101, %cst_52 {dimension_numbers = #tpu.dot_dimension_numbers<[1], [0], [0], [1], [0, 0, 1, 1], [], []>} : vector<64x576xbf16>, vector<576x64xbf16>, vector<64x64xf32> -> vector<64x64xf32>
    %131 = vector.broadcast %103 : vector<1x64xf32> to vector<64x64xf32>
    %132 = arith.addf %130, %131 : vector<64x64xf32>
    %cst_53 = arith.constant 0.000000e+00 : f32
    %133 = vector.broadcast %cst_53 : f32 to vector<64x64xf32>
    %134 = arith.maximumf %132, %133 : vector<64x64xf32>
    %c1 = arith.constant 1 : index
    %c0_54 = arith.constant 0 : index
    %c0_55 = arith.constant 0 : index
    %135 = vector.load %arg4[%c1, %c0_54, %c0_55] : memref<2x576x64xbf16, #tpu.memory_space<vmem>>, vector<1x576x64xbf16>
    %136 = vector.shape_cast %135 : vector<1x576x64xbf16> to vector<576x64xbf16>
    %c1_56 = arith.constant 1 : index
    %c0_57 = arith.constant 0 : index
    %c0_58 = arith.constant 0 : index
    %137 = vector.load %arg5[%c1_56, %c0_57, %c0_58] : memref<2x1x64xf32, #tpu.memory_space<vmem>>, vector<1x1x64xf32>
    %138 = vector.shape_cast %137 : vector<1x1x64xf32> to vector<1x64xf32>
    %c9_i32_59 = arith.constant 9 : i32
    %139 = tpu.dynamic_rotate %134 by %c9_i32_59 dim 0 : vector<64x64xf32>, i32 -> vector<64x64xf32>
    %cst_60 = arith.constant 0.000000e+00 : f32
    %140 = vector.broadcast %cst_60 : f32 to vector<64x64xf32>
    %141 = arith.select %13, %139, %140 : vector<64x64xi1>, vector<64x64xf32>
    %c8_i32_61 = arith.constant 8 : i32
    %142 = tpu.dynamic_rotate %134 by %c8_i32_61 dim 0 : vector<64x64xf32>, i32 -> vector<64x64xf32>
    %cst_62 = arith.constant 0.000000e+00 : f32
    %143 = vector.broadcast %cst_62 : f32 to vector<64x64xf32>
    %144 = arith.select %24, %142, %143 : vector<64x64xi1>, vector<64x64xf32>
    %c7_i32_63 = arith.constant 7 : i32
    %145 = tpu.dynamic_rotate %134 by %c7_i32_63 dim 0 : vector<64x64xf32>, i32 -> vector<64x64xf32>
    %cst_64 = arith.constant 0.000000e+00 : f32
    %146 = vector.broadcast %cst_64 : f32 to vector<64x64xf32>
    %147 = arith.select %35, %145, %146 : vector<64x64xi1>, vector<64x64xf32>
    %c1_i32_65 = arith.constant 1 : i32
    %148 = tpu.dynamic_rotate %134 by %c1_i32_65 dim 0 : vector<64x64xf32>, i32 -> vector<64x64xf32>
    %cst_66 = arith.constant 0.000000e+00 : f32
    %149 = vector.broadcast %cst_66 : f32 to vector<64x64xf32>
    %150 = arith.select %46, %148, %149 : vector<64x64xi1>, vector<64x64xf32>
    %c63_i32_67 = arith.constant 63 : i32
    %151 = tpu.dynamic_rotate %134 by %c63_i32_67 dim 0 : vector<64x64xf32>, i32 -> vector<64x64xf32>
    %cst_68 = arith.constant 0.000000e+00 : f32
    %152 = vector.broadcast %cst_68 : f32 to vector<64x64xf32>
    %153 = arith.select %57, %151, %152 : vector<64x64xi1>, vector<64x64xf32>
    %c57_i32_69 = arith.constant 57 : i32
    %154 = tpu.dynamic_rotate %134 by %c57_i32_69 dim 0 : vector<64x64xf32>, i32 -> vector<64x64xf32>
    %cst_70 = arith.constant 0.000000e+00 : f32
    %155 = vector.broadcast %cst_70 : f32 to vector<64x64xf32>
    %156 = arith.select %68, %154, %155 : vector<64x64xi1>, vector<64x64xf32>
    %c56_i32_71 = arith.constant 56 : i32
    %157 = tpu.dynamic_rotate %134 by %c56_i32_71 dim 0 : vector<64x64xf32>, i32 -> vector<64x64xf32>
    %cst_72 = arith.constant 0.000000e+00 : f32
    %158 = vector.broadcast %cst_72 : f32 to vector<64x64xf32>
    %159 = arith.select %79, %157, %158 : vector<64x64xi1>, vector<64x64xf32>
    %c55_i32_73 = arith.constant 55 : i32
    %160 = tpu.dynamic_rotate %134 by %c55_i32_73 dim 0 : vector<64x64xf32>, i32 -> vector<64x64xf32>
    %cst_74 = arith.constant 0.000000e+00 : f32
    %161 = vector.broadcast %cst_74 : f32 to vector<64x64xf32>
    %162 = arith.select %90, %160, %161 : vector<64x64xi1>, vector<64x64xf32>
    %163 = tpu.concatenate %141, %144, %147, %150, %134, %153, %156, %159, %162 in 1 : vector<64x64xf32>, vector<64x64xf32>, vector<64x64xf32>, vector<64x64xf32>, vector<64x64xf32>, vector<64x64xf32>, vector<64x64xf32>, vector<64x64xf32>, vector<64x64xf32> -> vector<64x576xf32>
    %164 = arith.truncf %163 : vector<64x576xf32> to vector<64x576xbf16>
    %cst_75 = arith.constant dense<0.000000e+00> : vector<64x64xf32>
    %165 = tpu.matmul %164, %136, %cst_75 {dimension_numbers = #tpu.dot_dimension_numbers<[1], [0], [0], [1], [0, 0, 1, 1], [], []>} : vector<64x576xbf16>, vector<576x64xbf16>, vector<64x64xf32> -> vector<64x64xf32>
    %166 = vector.broadcast %138 : vector<1x64xf32> to vector<64x64xf32>
    %167 = arith.addf %165, %166 : vector<64x64xf32>
    %cst_76 = arith.constant 0.000000e+00 : f32
    %168 = vector.broadcast %cst_76 : f32 to vector<64x64xf32>
    %169 = arith.maximumf %167, %168 : vector<64x64xf32>
    %c0_77 = arith.constant 0 : index
    %c0_78 = arith.constant 0 : index
    %170 = vector.load %arg6[%c0_77, %c0_78] : memref<576x13xbf16, #tpu.memory_space<vmem>>, vector<576x13xbf16>
    %c0_79 = arith.constant 0 : index
    %c0_80 = arith.constant 0 : index
    %171 = vector.load %arg7[%c0_79, %c0_80] : memref<1x13xf32, #tpu.memory_space<vmem>>, vector<1x13xf32>
    %c9_i32_81 = arith.constant 9 : i32
    %172 = tpu.dynamic_rotate %169 by %c9_i32_81 dim 0 : vector<64x64xf32>, i32 -> vector<64x64xf32>
    %cst_82 = arith.constant 0.000000e+00 : f32
    %173 = vector.broadcast %cst_82 : f32 to vector<64x64xf32>
    %174 = arith.select %13, %172, %173 : vector<64x64xi1>, vector<64x64xf32>
    %c8_i32_83 = arith.constant 8 : i32
    %175 = tpu.dynamic_rotate %169 by %c8_i32_83 dim 0 : vector<64x64xf32>, i32 -> vector<64x64xf32>
    %cst_84 = arith.constant 0.000000e+00 : f32
    %176 = vector.broadcast %cst_84 : f32 to vector<64x64xf32>
    %177 = arith.select %24, %175, %176 : vector<64x64xi1>, vector<64x64xf32>
    %c7_i32_85 = arith.constant 7 : i32
    %178 = tpu.dynamic_rotate %169 by %c7_i32_85 dim 0 : vector<64x64xf32>, i32 -> vector<64x64xf32>
    %cst_86 = arith.constant 0.000000e+00 : f32
    %179 = vector.broadcast %cst_86 : f32 to vector<64x64xf32>
    %180 = arith.select %35, %178, %179 : vector<64x64xi1>, vector<64x64xf32>
    %c1_i32_87 = arith.constant 1 : i32
    %181 = tpu.dynamic_rotate %169 by %c1_i32_87 dim 0 : vector<64x64xf32>, i32 -> vector<64x64xf32>
    %cst_88 = arith.constant 0.000000e+00 : f32
    %182 = vector.broadcast %cst_88 : f32 to vector<64x64xf32>
    %183 = arith.select %46, %181, %182 : vector<64x64xi1>, vector<64x64xf32>
    %c63_i32_89 = arith.constant 63 : i32
    %184 = tpu.dynamic_rotate %169 by %c63_i32_89 dim 0 : vector<64x64xf32>, i32 -> vector<64x64xf32>
    %cst_90 = arith.constant 0.000000e+00 : f32
    %185 = vector.broadcast %cst_90 : f32 to vector<64x64xf32>
    %186 = arith.select %57, %184, %185 : vector<64x64xi1>, vector<64x64xf32>
    %c57_i32_91 = arith.constant 57 : i32
    %187 = tpu.dynamic_rotate %169 by %c57_i32_91 dim 0 : vector<64x64xf32>, i32 -> vector<64x64xf32>
    %cst_92 = arith.constant 0.000000e+00 : f32
    %188 = vector.broadcast %cst_92 : f32 to vector<64x64xf32>
    %189 = arith.select %68, %187, %188 : vector<64x64xi1>, vector<64x64xf32>
    %c56_i32_93 = arith.constant 56 : i32
    %190 = tpu.dynamic_rotate %169 by %c56_i32_93 dim 0 : vector<64x64xf32>, i32 -> vector<64x64xf32>
    %cst_94 = arith.constant 0.000000e+00 : f32
    %191 = vector.broadcast %cst_94 : f32 to vector<64x64xf32>
    %192 = arith.select %79, %190, %191 : vector<64x64xi1>, vector<64x64xf32>
    %c55_i32_95 = arith.constant 55 : i32
    %193 = tpu.dynamic_rotate %169 by %c55_i32_95 dim 0 : vector<64x64xf32>, i32 -> vector<64x64xf32>
    %cst_96 = arith.constant 0.000000e+00 : f32
    %194 = vector.broadcast %cst_96 : f32 to vector<64x64xf32>
    %195 = arith.select %90, %193, %194 : vector<64x64xi1>, vector<64x64xf32>
    %196 = tpu.concatenate %174, %177, %180, %183, %169, %186, %189, %192, %195 in 1 : vector<64x64xf32>, vector<64x64xf32>, vector<64x64xf32>, vector<64x64xf32>, vector<64x64xf32>, vector<64x64xf32>, vector<64x64xf32>, vector<64x64xf32>, vector<64x64xf32> -> vector<64x576xf32>
    %197 = arith.truncf %196 : vector<64x576xf32> to vector<64x576xbf16>
    %cst_97 = arith.constant dense<0.000000e+00> : vector<64x13xf32>
    %198 = tpu.matmul %197, %170, %cst_97 {dimension_numbers = #tpu.dot_dimension_numbers<[1], [0], [0], [1], [0, 0, 1, 1], [], []>} : vector<64x576xbf16>, vector<576x13xbf16>, vector<64x13xf32> -> vector<64x13xf32>
    %199 = vector.broadcast %171 : vector<1x13xf32> to vector<64x13xf32>
    %200 = arith.addf %198, %199 : vector<64x13xf32>
    %201 = vector.extract_strided_slice %200 {offsets = [0, 0], sizes = [64, 9], strides = [1, 1]} : vector<64x13xf32> to vector<64x9xf32>
    %cst_98 = arith.constant 0.000000e+00 : f32
    %202 = vector.broadcast %cst_98 : f32 to vector<64x9xf32>
    %203 = arith.subf %202, %201 : vector<64x9xf32>
    %204 = math.exp %203 : vector<64x9xf32>
    %cst_99 = arith.constant 1.000000e+00 : f32
    %205 = vector.broadcast %cst_99 : f32 to vector<64x9xf32>
    %206 = arith.addf %205, %204 : vector<64x9xf32>
    %207 = tpu.reciprocal %206 {approx = true} : vector<64x9xf32> -> vector<64x9xf32>
    %208 = vector.extract_strided_slice %207 {offsets = [0, 0], sizes = [64, 8], strides = [1, 1]} : vector<64x9xf32> to vector<64x8xf32>
    %209 = vector.extract_strided_slice %207 {offsets = [0, 8], sizes = [64, 1], strides = [1, 1]} : vector<64x9xf32> to vector<64x1xf32>
    %210 = vector.broadcast %209 : vector<64x1xf32> to vector<64x8xf32>
    %211 = arith.mulf %208, %210 : vector<64x8xf32>
    %212 = vector.extract_strided_slice %200 {offsets = [0, 9], sizes = [64, 4], strides = [1, 1]} : vector<64x13xf32> to vector<64x4xf32>
    %c0_100 = arith.constant 0 : index
    %c0_101 = arith.constant 0 : index
    %213 = vector.load %arg8[%c0_100, %c0_101] : memref<64x4xf32, #tpu.memory_space<vmem>>, vector<64x4xf32>
    %214 = math.exp %212 : vector<64x4xf32>
    %c0_102 = arith.constant 0 : index
    %c0_103 = arith.constant 0 : index
    %215 = vector.load %arg9[%c0_102, %c0_103] : memref<64x4xf32, #tpu.memory_space<vmem>>, vector<64x4xf32>
    %216 = arith.mulf %214, %215 : vector<64x4xf32>
    %217 = arith.addf %213, %216 : vector<64x4xf32>
    %218 = tpu.concatenate %211, %217 in 1 : vector<64x8xf32>, vector<64x4xf32> -> vector<64x12xf32>
    %c0_104 = arith.constant 0 : index
    %c0_105 = arith.constant 0 : index
    %219 = vector.load %arg10[%c0_104, %c0_105] : memref<12x128xf32, #tpu.memory_space<vmem>>, vector<12x128xf32>
    %cst_106 = arith.constant dense<0.000000e+00> : vector<64x128xf32>
    %220 = tpu.matmul %218, %219, %cst_106 {dimension_numbers = #tpu.dot_dimension_numbers<[1], [0], [0], [1], [0, 0, 1, 1], [], []>} : vector<64x12xf32>, vector<12x128xf32>, vector<64x128xf32> -> vector<64x128xf32>
    %c0_107 = arith.constant 0 : index
    %c0_108 = arith.constant 0 : index
    %c0_109 = arith.constant 0 : index
    %221 = vector.load %arg11[%c0_107, %c0_108, %c0_109] : memref<1x64x128xf32, #tpu.memory_space<vmem>>, vector<1x64x128xf32>
    %222 = vector.shape_cast %221 : vector<1x64x128xf32> to vector<64x128xf32>
    %223 = vector.shape_cast %220 : vector<64x128xf32> to vector<1x64x128xf32>
    tpu.vector_store %arg11[%c0_107, %c0_108, %c0_109], %223 {strides = array<i32>} : memref<1x64x128xf32, #tpu.memory_space<vmem>>, vector<1x64x128xf32>,
    return
  }
  func.func @transform_0(%arg0: i32) -> (i32, i32, i32) {
    %c0_i32 = arith.constant 0 : i32
    %c0_i32_0 = arith.constant 0 : i32
    %c0_i32_1 = arith.constant 0 : i32
    return %arg0, %c0_i32, %c0_i32_0 : i32, i32, i32
  }
  func.func @transform_1(%arg0: i32) -> (i32, i32) {
    %c0_i32 = arith.constant 0 : i32
    %c0_i32_0 = arith.constant 0 : i32
    %c0_i32_1 = arith.constant 0 : i32
    return %c0_i32, %c0_i32_0 : i32, i32
  }
  func.func @transform_2(%arg0: i32) -> (i32, i32) {
    %c0_i32 = arith.constant 0 : i32
    %c0_i32_0 = arith.constant 0 : i32
    %c0_i32_1 = arith.constant 0 : i32
    return %c0_i32, %c0_i32_0 : i32, i32
  }
  func.func @transform_3(%arg0: i32) -> (i32, i32, i32) {
    %c0_i32 = arith.constant 0 : i32
    %c0_i32_0 = arith.constant 0 : i32
    %c0_i32_1 = arith.constant 0 : i32
    %c0_i32_2 = arith.constant 0 : i32
    return %c0_i32, %c0_i32_0, %c0_i32_1 : i32, i32, i32
  }
  func.func @transform_4(%arg0: i32) -> (i32, i32, i32) {
    %c0_i32 = arith.constant 0 : i32
    %c0_i32_0 = arith.constant 0 : i32
    %c0_i32_1 = arith.constant 0 : i32
    %c0_i32_2 = arith.constant 0 : i32
    return %c0_i32, %c0_i32_0, %c0_i32_1 : i32, i32, i32
  }
  func.func @transform_5(%arg0: i32) -> (i32, i32) {
    %c0_i32 = arith.constant 0 : i32
    %c0_i32_0 = arith.constant 0 : i32
    %c0_i32_1 = arith.constant 0 : i32
    return %c0_i32, %c0_i32_0 : i32, i32
  }
  func.func @transform_6(%arg0: i32) -> (i32, i32) {
    %c0_i32 = arith.constant 0 : i32
    %c0_i32_0 = arith.constant 0 : i32
    %c0_i32_1 = arith.constant 0 : i32
    return %c0_i32, %c0_i32_0 : i32, i32
  }
  func.func @transform_7(%arg0: i32) -> (i32, i32) {
    %c0_i32 = arith.constant 0 : i32
    %c0_i32_0 = arith.constant 0 : i32
    %c0_i32_1 = arith.constant 0 : i32
    return %c0_i32, %c0_i32_0 : i32, i32
  }
  func.func @transform_8(%arg0: i32) -> (i32, i32) {
    %c0_i32 = arith.constant 0 : i32
    %c0_i32_0 = arith.constant 0 : i32
    %c0_i32_1 = arith.constant 0 : i32
    return %c0_i32, %c0_i32_0 : i32, i32
  }
  func.func @transform_9(%arg0: i32) -> (i32, i32) {
    %c0_i32 = arith.constant 0 : i32
    %c0_i32_0 = arith.constant 0 : i32
    %c0_i32_1 = arith.constant 0 : i32
    return %c0_i32, %c0_i32_0 : i32, i32
  }
  func.func @transform_10(%arg0: i32) -> (i32, i32, i32) {
    %c0_i32 = arith.constant 0 : i32
    %c0_i32_0 = arith.constant 0 : i32
    %c0_i32_1 = arith.constant 0 : i32
    return %arg0, %c0_i32, %c0_i32_0 : i32, i32, i32
  }
}

</mosaic_0001>

<bundles_post_ra>
// kernel: _lambda_.1
= control target key start
LH: loop header
LB: loop body
LE: loop exit
PB: predicated region body
PF: predicated region fallthrough
CT: control target
= control target key end

     0   :  { %s4624_s13 = smov 0   ;;  %s6210_s0 = inlined_call_operand.vmem [shape: bf16[2,64,32], index: 0, kind: input, shape index: {}]   ;;  %s6211_s1 = inlined_call_operand.vmem [shape: bf16[32,64], index: 1, kind: input, shape index: {}]   ;;  %s6212_s2 = inlined_call_operand.vmem [shape: f32[1,64], index: 2, kind: input, shape index: {}]   ;;  %s6213_s3 = inlined_call_operand.vmem [shape: bf16[2,576,64], index: 3, kind: input, shape index: {}]   ;;  %s6214_s4 = inlined_call_operand.vmem [shape: f32[2,1,64], index: 4, kind: input, shape index: {}]   ;;  %s6215_s5 = inlined_call_operand.vmem [shape: bf16[576,13], index: 5, kind: input, shape index: {}]   ;;  %s6216_s6 = inlined_call_operand.vmem [shape: f32[1,13], index: 6, kind: input, shape index: {}]   ;;  %s6217_s7 = inlined_call_operand.vmem [shape: f32[64,4], index: 7, kind: input, shape index: {}]   ;;  %s6218_s8 = inlined_call_operand.vmem [shape: f32[64,4], index: 8, kind: input, shape index: {}]   ;;  %s6219_s9 = inlined_call_operand.vmem [shape: f32[12,128], index: 9, kind: input, shape index: {}]   ;;  %s6220_s10 = inlined_call_operand.vmem [shape: f32[2,64,128], index: 10, kind: output, shape index: {}]  }
   0x1 LB: > { %s3510_s14 = sadd.s32 4294967295, %s4560_s13   ;;  %p3514_p0 = scmp.ge.s32.totalorder %s4560_s13, 1  ;;  %s4560_s13 = sphi %s4624_s13, %s20_s13  }
   0x2   : > { %p312_p1 = scmp.lt.s32.totalorder %s4560_s13, 3 }
   0x4   : > { %p313_p2 = pnand %p3514_p0, %p312_p1 }
   0x6   : > { %316 = sbr.rel (%p313_p2) target bundleno = 1780 (0x6f4), region = 60 }
   0xb   : > { %v4392_v0 = vld [vmem:[%s6211_s1 + $0x8] sm:$0xff]   ;;  %p350_p3 = scmp.lt.s32.totalorder %s3510_s14, 1  ;;  %v4393_v1 = vld [vmem:[%s6211_s1] sm:$0xff]   ;;  %vm629_vm0 = vcmask 261120   ;;  %v4398_v6 = vld [vmem:[%s6213_s3 + $0x78] sm:$0xff]   ;;  %v361_v26 = vlaneseq  ;;  %v6262_v58 = vmov 0 }
   0xc   : > { %4055 = vmatprep.subr.bf16.mxu0 %v4392_v0  ;;  %v4399_v7 = vld [vmem:[%s6213_s3 + $0x38] sm:$0xff]   ;;  %v4400_v8 = vld [vmem:[%s6213_s3 + $0x70] sm:$0xff]   ;;  %3781 = vmatprep.subr.bf16.mxu1 %v4398_v6  ;;  %v4404_v13 = vld [vmem:[%s6213_s3 + $0x68] sm:$0xff]   ;;  %s4562_s17 = smov 64   ;;  %s4568_s12 = smov 8  }
   0xd   : > { %s6409_s14 = smov (!%p350_p3, %s3510_s14), 1  ;;  %4056 = vmatpush3.bf16.msra.mxu0 %v4392_v0  ;;  %v4402_v9 = vld [vmem:[%s6213_s3 + $0xf8] sm:$0xff]   ;;  %v4406_v11 = vld [vmem:[%s6213_s3 + $0xf0] sm:$0xff]   ;;  %3782 = vmatpush3.bf16.msra.mxu1 %v4399_v7  ;;  %v4410_v15 = vld [vmem:[%s6213_s3 + $0xe8] sm:$0xff]   ;;  %v4709_v28 = vshrl.u32 %v361_v26, 7 }
   0xe   : > { %4057 = vmatprep.subr.bf16.mxu0 %v4393_v1  ;;  %s3773_s19 = sshll.u32 %s6409_s14, 5  ;;  %v4403_v10 = vld [vmem:[%s6213_s3 + $0xb8] sm:$0xff]   ;;  %v4401_v12 = vld [vmem:[%s6213_s3 + $0x30] sm:$0xff]   ;;  %3783 = vmatprep.subr.bf16.mxu1 %v4400_v8  ;;  %v4405_v16 = vld [vmem:[%s6213_s3 + $0x28] sm:$0xff]   ;;  %s3774_s25 = sshll.u32 %s6409_s14, 6 }
   0xf   : > { %s354_s22 = scalar_lea.vmem %s6210_s0, %s3773_s19  ;;  %v4407_v14 = vld [vmem:[%s6213_s3 + $0xb0] sm:$0xff]   ;;  %v4408_v17 = vld [vmem:[%s6213_s3 + $0x60] sm:$0xff]   ;;  %v4411_v18 = vld [vmem:[%s6213_s3 + $0xa8] sm:$0xff]   ;;  %v4713_v32 = vadd.s32 24, %v4709_v28  ;;  %v4717_v35 = vadd.s32 16, %v4709_v28  ;;  %v4723_v38 = vadd.s32 8, %v4709_v28  ;;  %s359_s28 = scalar_lea.vmem %s6220_s10, %s3774_s25 }
  0x10   : > { %v4394_v2 = vld [vmem:[%s354_s22] sm:$0xff]   ;;  %v4395_v3 = vld [vmem:[%s354_s22 + $0x8] sm:$0xff]   ;;  %v4396_v4 = vld [vmem:[%s354_s22 + $0x10] sm:$0xff]   ;;  %v4746_v49 = vadd.s32 32, %v4709_v28  ;;  %vm6221_vm1 = vcmp.lt.s32.totalorder %v4709_v28, 1  ;;  %vm6224_vm5 = vcmp.lt.s32.totalorder %v4709_v28, 7 }
  0x11   : > { %4058 = vmatpush3.bf16.msra.mxu0 %v4393_v1  ;;  %4059 = vmatprep.mubr.msk.bf16.mxu0 %vm629_vm0, %v4394_v2  ;;  %v4397_v5 = vld [vmem:[%s354_s22 + $0x18] sm:$0xff]   ;;  %v4414_v19 = vld [vmem:[%s6213_s3 + $0xe0] sm:$0xff]   ;;  %v4416_v24 = vld [vmem:[%s6213_s3 + $0x50] sm:$0xff]   ;;  %v373_v43 = vand.u32 7, %v4713_v32  ;;  %v372_v50 = vand.u32 7, %v4717_v35  ;;  %v371_v54 = vand.u32 7, %v4723_v38 }
  0x12   : > { %3821 = vmatprep.subr.bf16.mxu0 %v4402_v9  ;;  %3784 = vmatpush3.bf16.msra.mxu1 %v4401_v12  ;;  %v4409_v20 = vld [vmem:[%s6213_s3 + $0x20] sm:$0xff]   ;;  %v4412_v21 = vld [vmem:[%s6213_s3 + $0x58] sm:$0xff]   ;;  %v4417_v25 = vld [vmem:[%s6213_s3 + $0x10] sm:$0xff]   ;;  %v374_v0 = vand.u32 7, %v4746_v49  ;;  %v370_v2 = vand.u32 7, %v4709_v28  ;;  %s4565_s19 = smov 9  }
  0x13   : > { %3785 = vmatprep.subr.bf16.mxu1 %v4404_v13  ;;  %v4415_v22 = vld [vmem:[%s6213_s3 + $0xa0] sm:$0xff]   ;;  %v4413_v23 = vld [vmem:[%s6213_s3 + $0x18] sm:$0xff]   ;;  %v4420_v41 = vld [vmem:[%s6213_s3 + $0x48] sm:$0xff]   ;;  %vm4763_vm2 = vcmp.ge.s32.totalorder %v373_v43, 1  ;;  %vm4768_vm3 = vcmp.ge.s32.totalorder %v371_v54, 1  ;;  %vm4782_vm4 = vcmp.ge.s32.totalorder %v372_v50, 1 }
  0x14   : > { %4060 = vmatmul.mubr.msk.bf16.vlgmr.msra.gmra.mxu0 %vm629_vm0, %v4395_v3  ;;  %v4707_v27 = vld [vmem:[%s6212_s2] ss:$0 sm:$0xff]  ;;  %v4418_v39 = vld [vmem:[%s6213_s3 + $0xd8] sm:$0xff]   ;;  %v4421_v44 = vld [vmem:[%s6213_s3 + $0x8] sm:$0xff]   ;;  %v6263_v58 = vsel %vm4763_vm2, 4294967295, %v6262_v58  ;;  %vm4843_vm6 = vcmp.lt.s32.totalorder %v370_v2, 7 }
  0x15   : > { %4063 = vmatprep.mubr.msk.bf16.mxu0 %vm629_vm0, %v4396_v4  ;;  %3822 = vmatpush3.bf16.msra.mxu0 %v4403_v10  ;;  %v4419_v40 = vld [vmem:[%s6213_s3 + $0x98] sm:$0xff]   ;;  %v4422_v51 = vld [vmem:[%s6213_s3 + $0xd0] sm:$0xff]   ;;  %v4424_v3 = vld [vmem:[%s6213_s3 + $0x40] sm:$0xff]   ;;  %vm4847_vm7 = vcmp.ge.s32.totalorder %v370_v2, 1  ;;  %vm4873_vm8 = vcmp.lt.s32.totalorder %v371_v54, 7  ;;  %v6245_v54 = vmov 0.0  }
  0x16   : > { %3823 = vmatprep.subr.bf16.mxu0 %v4406_v11  ;;  %3786 = vmatpush3.bf16.msra.mxu1 %v4405_v16  ;;  %v4423_v52 = vld [vmem:[%s6213_s3 + $0x90] sm:$0xff]   ;;  %v4425_v4 = vld [vmem:[%s6213_s3] sm:$0xff]   ;;  %v4817_v16 = vadd.s32 40, %v4709_v28  ;;  %vm4907_vm9 = vcmp.ge.s32.totalorder %v374_v0, 1  ;;  %vm4917_vm11 = vcmp.lt.s32.totalorder %v372_v50, 7  ;;  %vm4940_vm12 = vcmp.lt.s32.totalorder %v373_v43, 7 }
  0x17   : > { %3787 = vmatprep.subr.bf16.mxu1 %v4408_v17  ;;  %v4426_v17 = vld [vmem:[%s6213_s3 + $0xc8] sm:$0xff]   ;;  %v6282_v50 = vmov 0  ;;  %vm4997_vm15 = vcmp.lt.s32.totalorder %v374_v0, 7  ;;  %s4567_s22 = smov 119  }
  0x18   : > { %v6283_v50 = vsel %vm4940_vm12, 4294967295, %v6282_v50 }
  0x19   : > { %3824 = vmatpush3.bf16.msra.mxu0 %v4407_v14 }
  0x1a   : > { %3825 = vmatprep.subr.bf16.mxu0 %v4410_v15  ;;  %3788 = vmatpush3.bf16.msra.mxu1 %v4409_v20 }
  0x1b   : > { %3789 = vmatprep.subr.bf16.mxu1 %v4412_v21 }
  0x1c   : > { %4064 = vmatmul.mubr.msk.bf16.gmra.mxu0 %vm629_vm0, %v4397_v5 }
  0x1d   : > { %3826 = vmatpush3.bf16.msra.mxu0 %v4411_v18  ;;  %v4427_v18 = vld [vmem:[%s6213_s3 + $0x88] sm:$0xff]  }
  0x1e   : > { %3827 = vmatprep.subr.bf16.mxu0 %v4414_v19  ;;  %3790 = vmatpush3.bf16.msra.mxu1 %v4413_v23  ;;  %v4832_v23 = vld [vmem:[%s6213_s3 + $0x118] sm:$0xff]  }
  0x1f   : > { %3791 = vmatprep.subr.bf16.mxu1 %v4416_v24  ;;  %v4429_v24 = vld [vmem:[%s6213_s3 + $0xc0] sm:$0xff]  }
  0x21   : > { %3828 = vmatpush3.bf16.msra.mxu0 %v4415_v22 }
  0x22   : > { %3792 = vmatpush3.bf16.msra.mxu1 %v4417_v25  ;;  %3829 = vmatprep.subr.bf16.mxu0 %v4418_v39 }
  0x23   : > { %3793 = vmatprep.subr.bf16.mxu1 %v4420_v41 }
  0x25   : > { %3830 = vmatpush3.bf16.msra.mxu0 %v4419_v40  ;;  %v6272_v40 = vmov 0 }
  0x26   : > { %3794 = vmatpush3.bf16.msra.mxu1 %v4421_v44  ;;  %3831 = vmatprep.subr.bf16.mxu0 %v4422_v51  ;;  %v6273_v40 = vsel %vm4873_vm8, 4294967295, %v6272_v40  ;;  %v375_v51 = vand.u32 7, %v4817_v16 }
  0x27   : > { %3795 = vmatprep.subr.bf16.mxu1 %v4424_v3  ;;  %6274 = vst [vmem:[#allocation2_spill] sm:$0xff] %v6273_v40  ;;  %v6275_v3 = vmov 0 }
  0x28   : > { %v6276_v3 = vsel %vm4907_vm9, 4294967295, %v6275_v3  ;;  %vm4911_vm10 = vcmp.ge.s32.totalorder %v375_v51, 1  ;;  %vm4974_vm13 = vcmp.lt.s32.totalorder %v375_v51, 7  ;;  %v6286_v51 = vmov 0 }
  0x29   : > { %3832 = vmatpush3.bf16.msra.mxu0 %v4423_v52 }
  0x2a   : > { %3796 = vmatpush3.bf16.msra.mxu1 %v4425_v4  ;;  %3833 = vmatprep.subr.bf16.mxu0 %v4426_v17  ;;  %v6277_v4 = vmov 0 }
  0x2b   : > { %4067 = vmatprep.subr.bf16.mxu1 %v4832_v23  ;;  %v6278_v4 = vsel %vm4911_vm10, 4294967295, %v6277_v4 }
  0x2d   : > { %3834 = vmatpush3.bf16.msra.mxu0 %v4427_v18 }
  0x2e   : > { %3835 = vmatprep.subr.bf16.mxu0 %v4429_v24 }
  0xd4   : > { %v4061_v29 = vpop.f32.mrf.mxu0 }
  0xd5   : > { %v685_v30 = vadd.f32 %v4061_v29, %v4707_v27 }
  0xd6   : > { %v676_v31 = vpop.f32.mrf.mxu0 }
  0xd7   : > { %v677_v33 = vadd.f32 %v4707_v27, %v676_v31  ;;  %v4719_v36 = vmax.f32 %v685_v30, 0.0  ;;  %v6268_v30 = vmov 0 }
  0xd8   : > { %v4062_v34 = vpop.f32.mrf.mxu0  ;;  %v6269_v30 = vsel %vm4843_vm6, 4294967295, %v6268_v30 }
  0xd9   : > { %v688_v37 = vadd.f32 %v4062_v34, %v4707_v27  ;;  %v4738_v45 = vmax.f32 %v677_v33, 0.0  ;;  %v790_v55 = vrot.slane %v4719_v36, 7  ;;  %v823_v22 = vrot.slane %v4719_v36, 1 }
  0xda   : > { %v679_v42 = vpop.f32.mrf.mxu0 }
  0xdb   : > { %v4740_v46 = vmax.f32 %v688_v37, 0.0  ;;  %v680_v47 = vadd.f32 %v4707_v27, %v679_v42  ;;  %v788_v59 = vrot.slane %v4738_v45, 7  ;;  %v821_v19 = vrot.slane %v4738_v45, 1  ;;  %v4430_v37 = vld [vmem:[%s6213_s3 + $0x80] sm:$0xff]  }
  0xdc   : > { %v4743_v48 = vpop.f32.mrf.mxu0  ;;  %3836 = vmatpush3.bf16.msra.mxu0 %v4430_v37 }
  0xdd   : > { %v4756_v53 = vmax.f32 %v680_v47, 0.0  ;;  %v791_v56 = vrot.slane %v4740_v46, 7  ;;  %v701_v52 = vadd.f32 %v4743_v48, %v4707_v27  ;;  %v369_v48 = vadd.s32 56, %v4709_v28 }
  0xde   : > { %v692_v57 = vpop.f32.mrf.mxu0 }
  0xdf   : > { %v789_v61 = vrot.slane %v4756_v53, 7  ;;  %v4777_v62 = vsel %vm6221_vm1, %v790_v55, %v791_v56  ;;  %v693_v5 = vadd.f32 %v4707_v27, %v692_v57  ;;  %v822_v21 = vrot.slane %v4756_v53, 1 }
  0xe0   : > { %v4066_v63 = vpop.f32.mrf.mxu0  ;;  %v849_v11 = vsel %vm4763_vm2, %v4777_v62, 0.0  ;;  %v4165_v38 = vpack.i.bf16 %v4719_v36, %v4756_v53  ;;  %v377_v43 = vand.u32 7, %v369_v48 }
  0xe1   : > { %v704_v6 = vadd.f32 %v4066_v63, %v4707_v27  ;;  %v4797_v7 = vsel %vm6221_vm1, %v789_v61, %v790_v55  ;;  %v4801_v8 = vsel %vm6221_vm1, %v788_v59, %v789_v61  ;;  %v4837_v25 = vmax.f32 %v693_v5, 0.0 }
  0xe2   : > { %v695_v9 = vpop.f32.mrf.mxu0  ;;  %v848_v10 = vsel %vm4782_vm4, %v4797_v7, 0.0  ;;  %v847_v12 = vsel %vm4768_vm3, %v4801_v8, 0.0  ;;  %v4854_v33 = vsel %vm6224_vm5, %v822_v21, %v823_v22  ;;  %v4860_v34 = vsel %vm6224_vm5, %v821_v19, %v822_v21 }
  0xe3   : > { %v4813_v13 = vmax.f32 %v704_v6, 0.0  ;;  %v696_v14 = vadd.f32 %v4707_v27, %v695_v9  ;;  %v4160_v15 = vpack.i.bf16 %v849_v11, %v848_v10  ;;  %v4150_v20 = vpack.i.bf16 %v4738_v45, %v847_v12 }
  0xe4   : > { %v854_v44 = vsel %vm4843_vm6, %v4860_v34, 0.0  ;;  %v855_v47 = vsel %vm4873_vm8, %v4854_v33, 0.0  ;;  %v792_v57 = vrot.slane %v4837_v25, 7  ;;  %v4896_v61 = vadd.s32 48, %v4709_v28 }
  0xe5   : > { %v795_v26 = vrot.slane %v4813_v13, 7  ;;  %v4840_v29 = vmax.f32 %v696_v14, 0.0  ;;  %4161 = vrot.lane.b32.xlu1 %v4160_v15, %s4562_s17  ;;  %4151 = vrot.lane.b32.xlu0 %v4150_v20, %s4562_s17  ;;  %v4175_v63 = vpack.i.bf16 %v855_v47, %v854_v44  ;;  %v824_v27 = vrot.slane %v4740_v46, 1 }
  0xe6   : > { %v6279_v5 = vmov 0  ;;  %v4922_v9 = vmax.f32 %v701_v52, 0.0  ;;  %v4929_v10 = vsel %vm6221_vm1, %v791_v56, %v792_v57  ;;  %v376_v12 = vand.u32 7, %v4896_v61 }
  0xe7   : > { %v4871_v39 = vsel %vm6221_vm1, %v795_v26, %v788_v59  ;;  %v793_v41 = vrot.slane %v4840_v29, 7  ;;  %v825_v59 = vrot.slane %v4837_v25, 1  ;;  %v6280_v5 = vsel %vm4917_vm11, 4294967295, %v6279_v5 }
  0xe8   : > { %v846_v42 = vsel %vm4847_vm7, %v4871_v39, 0.0  ;;  %6281 = vst [vmem:[#allocation3_spill] sm:$0xff] %v6280_v5  ;;  %v826_v6 = vrot.slane %v4840_v29, 1  ;;  %v828_v14 = vrot.slane %v4813_v13, 1  ;;  %v4180_v15 = vpack.i.bf16 %v4837_v25, %v4740_v46 }
  0xe9   : > { %4166 = vrot.lane.b32.xlu1 %v4165_v38, %s4562_s17  ;;  %v4155_v55 = vpack.i.bf16 %v6245_v54, %v846_v42  ;;  %v4901_v2 = vsel %vm6221_vm1, %v792_v57, %v793_v41  ;;  %v4933_v11 = vsel %vm6224_vm5, %v824_v27, %v825_v59  ;;  %v834_v32 = vsel %vm6224_vm5, %v823_v22, %v824_v27 }
  0xea   : > { %v851_v35 = vsel %vm4911_vm10, %v4901_v2, 0.0  ;;  %v4947_v56 = vsel %vm6224_vm5, %v825_v59, %v826_v6  ;;  %v850_v16 = vsel %vm4907_vm9, %v4929_v10, 0.0  ;;  %v857_v17 = vsel %vm4940_vm12, %v4933_v11, 0.0 }
  0xeb   : > { %4156 = vrot.lane.b32.xlu0 %v4155_v55, %s4562_s17  ;;  %v880_v18 = vsel %vm4917_vm11, %v4933_v11, 0.0  ;;  %v881_v20 = vsel %vm4940_vm12, %v4947_v56, 0.0  ;;  %v4185_v21 = vpack.i.bf16 %v851_v35, %v850_v16  ;;  %v794_v22 = vrot.slane %v4922_v9, 7 }
  0xec   : > { %v827_v24 = vrot.slane %v4922_v9, 1  ;;  %v4970_v37 = vpack.c.bf16 %v881_v20, %v880_v18  ;;  %v6284_v42 = vmov 0  ;;  %vm4991_vm14 = vcmp.ge.s32.totalorder %v376_v12, 1 }
  0xed   : > { %4176 = vrot.lane.b32.xlu1 %v4175_v63, %s4562_s17  ;;  %v6285_v42 = vsel %vm4974_vm13, 4294967295, %v6284_v42  ;;  %v4981_v47 = vsel %vm6221_vm1, %v793_v41, %v794_v22  ;;  %v6287_v51 = vsel %vm4991_vm14, 4294967295, %v6286_v51  ;;  %v6288_v57 = vmov 0 }
  0xee   : > { %v4985_v52 = vsel %vm6224_vm5, %v826_v6, %v827_v24  ;;  %v4989_v55 = vsel %vm6224_vm5, %v827_v24, %v828_v14  ;;  %v6289_v57 = vsel %vm4997_vm15, 4294967295, %v6288_v57  ;;  %vm5002_vm0 = vcmp.ge.s32.totalorder %v377_v43, 1 }
  0xef   : > { %4171 = vrot.lane.b32.xlu0 %v4165_v38, %s4562_s17  ;;  %v856_v38 = vsel %vm4917_vm11, %v834_v32, 0.0  ;;  %v6290_v41 = vmov 0  ;;  %v5010_v59 = vsel %vm6221_vm1, %v794_v22, %v795_v26  ;;  %v878_v49 = vsel %vm4843_vm6, %v4854_v33, 0.0 }
  0xf0   : > { %v4195_v44 = vpack.i.bf16 %v857_v17, %v856_v38  ;;  %v6291_v41 = vsel %vm5002_vm0, 4294967295, %v6290_v41  ;;  %v852_v0 = vsel %vm4991_vm14, %v4981_v47, 0.0  ;;  %v879_v61 = vsel %vm4873_vm8, %v834_v32, 0.0 }
  0xf1   : > { %4181 = vrot.lane.b32.xlu1 %v4180_v15, %s4562_s17  ;;  %v882_v63 = vsel %vm4997_vm15, %v4985_v52, 0.0  ;;  %v883_v26 = vsel %vm4974_vm13, %v4989_v55, 0.0  ;;  %v4200_v27 = vpack.i.bf16 %v4922_v9, %v4840_v29  ;;  %v5029_v48 = vpack.c.bf16 %v879_v61, %v878_v49 }
  0xf2   : > { %v5031_v6 = vpack.c.bf16 %v883_v26, %v882_v63  ;;  %v853_v35 = vsel %vm5002_vm0, %v5010_v59, 0.0  ;;  %v858_v16 = vsel %vm4997_vm15, %v4947_v56, 0.0  ;;  %v859_v17 = vsel %vm4974_vm13, %v4985_v52, 0.0 }
  0xf3   : > { %4186 = vrot.lane.b32.xlu0 %v4185_v21, %s4562_s17  ;;  %vm5043_vm1 = vcmp.lt.s32.totalorder %v377_v43, 7  ;;  %v6292_v18 = vmov 0  ;;  %v5051_v20 = vsel %vm6224_vm5, %v828_v14, %v821_v19  ;;  %v4215_v21 = vpack.i.bf16 %v859_v17, %v858_v16 }
  0xf4   : > { %v6293_v18 = vsel %vm5043_vm1, 4294967295, %v6292_v18  ;;  %vm5054_vm6 = vcmp.lt.s32.totalorder %v376_v12, 7  ;;  %v861_v43 = vsel %vm5043_vm1, %v5051_v20, 0.0  ;;  %vm6234_vm5 = vcmask 523264  }
  0xf5   : > { %4196 = vrot.lane.b32.xlu1 %v4195_v44, %s4562_s17  ;;  %v860_v24 = vsel %vm5054_vm6, %v4989_v55, 0.0  ;;  %v4225_v19 = vpack.i.bf16 %v6245_v54, %v861_v43  ;;  %v841_v61 = vsel %vm4940_vm12, %v834_v32, 0.0  ;;  %vm5078_vm1 = vmneg %vm6234_vm5  ;;  %v807_v32 = vsel %vm4782_vm4, %v4801_v8, 0.0 }
  0xf6   : > { %v4220_v12 = vpack.i.bf16 %v860_v24, %v4813_v13  ;;  %v806_v24 = vsel %vm4768_vm3, %v4871_v39, 0.0  ;;  %vm6231_vm12 = vmmov 1   ;;  %v6298_v39 = vmov 0 }
  0xf7   : > { %4191 = vrot.lane.b32.xlu0 %v4180_v15, %s4562_s17  ;;  %v4205_v15 = vpack.i.bf16 %v853_v35, %v852_v0  ;;  %v840_v0 = vsel %vm4917_vm11, %v4854_v33, 0.0  ;;  %v808_v33 = vsel %vm4763_vm2, %v4797_v7, 0.0  ;;  %vm5101_vm11 = vmpackc.low %vm6231_vm12, %vm5078_vm1  ;;  %vm6300_vm12 = vnez %v6293_v18 }
  0xf8   : > { %v6299_v39 = vsel %vm5101_vm11, 4294967295, %v6298_v39 }
  0xf9   : > { %4201 = vrot.lane.b32.xlu1 %v4200_v27, %s4562_s17 }
  0xfb   : > { %4206 = vrot.lane.b32.xlu0 %v4205_v15, %s4562_s17 }
  0xfd   : > { %4216 = vrot.lane.b32.xlu1 %v4215_v21, %s4562_s17 }
  0xff   : > { %4211 = vrot.lane.b32.xlu0 %v4200_v27, %s4562_s17 }
 0x101   : > { %4226 = vrot.lane.b32.xlu1 %v4225_v19, %s4562_s17 }
 0x103   : > { %4221 = vrot.lane.b32.xlu0 %v4220_v12, %s4562_s17  ;;  %v839_v12 = vsel %vm4873_vm8, %v4860_v34, 0.0 }
 0x157   : > { %v4162_v14 = vpop.permute.xlu1 %4161  ;;  %v4152_v49 = vpop.permute.xlu0 %4151 }
 0x158   : > { %v4164_v38 = vunpack.i.h.bf16 %v4162_v14  ;;  %v4163_v44 = vunpack.i.l.bf16 %v4162_v14  ;;  %v4154_v27 = vunpack.i.h.bf16 %v4152_v49  ;;  %v4153_v35 = vunpack.i.l.bf16 %v4152_v49 }
 0x15a   : > { %v1025_v63 = vsel %vm6234_vm5, %v840_v0, %v4163_v44  ;;  %v1026_v26 = vsel %vm6234_vm5, %v841_v61, %v4164_v38  ;;  %v1016_v0 = vsel %vm6234_vm5, %v806_v24, %v4154_v27  ;;  %v4431_v27 = vld [vmem:[%s6213_s3 + $0x110] sm:$0xff]  }
 0x15b   : > { %v4167_v16 = vpop.permute.xlu1 %4166  ;;  %v1053_v17 = vpack.c.bf16 %v1026_v26, %v1025_v63  ;;  %v1024_v63 = vsel %vm6234_vm5, %v839_v12, %v4153_v35  ;;  %v863_v12 = vsel %vm4768_vm3, %v4797_v7, 0.0  ;;  %v809_v7 = vsel %vm4907_vm9, %v4777_v62, 0.0 }
 0x15c   : > { %v4169_v15 = vunpack.i.h.bf16 %v4167_v16  ;;  %v4168_v21 = vunpack.i.l.bf16 %v4167_v16 }
 0x15d   : > { %v4157_v19 = vpop.permute.xlu0 %4156 }
 0x15e   : > { %v4159_v14 = vunpack.i.h.bf16 %v4157_v19  ;;  %v4158_v38 = vunpack.i.l.bf16 %v4157_v19  ;;  %v1017_v44 = vsel %vm6234_vm5, %v807_v32, %v4168_v21  ;;  %v1018_v49 = vsel %vm6234_vm5, %v808_v33, %v4169_v15 }
 0x15f   : > { %v4177_v61 = vpop.permute.xlu1 %4176  ;;  %v1052_v34 = vpack.c.bf16 %v1018_v49, %v1017_v44 }
 0x160   : > { %v3573_v26 = vpack.c.bf16 %v1016_v0, %v4159_v14  ;;  %v4179_v16 = vunpack.i.h.bf16 %v4177_v61  ;;  %v4178_v19 = vunpack.i.l.bf16 %v4177_v61  ;;  %v3569_v21 = vpack.c.bf16 %v1024_v63, %v4158_v38  ;;  %v4432_v63 = vld [vmem:[%s6213_s3 + $0x108] sm:$0xff]  }
 0x161   : > { %v4172_v32 = vpop.permute.xlu0 %4171  ;;  %v862_v14 = vsel %vm4847_vm7, %v4801_v8, 0.0 }
 0x162   : > { %v1032_v35 = vsel %vm6234_vm5, %v4756_v53, %v4179_v16  ;;  %v1031_v15 = vsel %vm6234_vm5, %v4738_v45, %v4178_v19  ;;  %v4174_v33 = vunpack.i.h.bf16 %v4172_v32  ;;  %v4173_v24 = vunpack.i.l.bf16 %v4172_v32  ;;  %3570 = vmatprep.mubr.msk.bf16.mxu1 %vm5101_vm11, %v3569_v21 }
 0x163   : > { %v4182_v38 = vpop.permute.xlu1 %4181  ;;  %3574 = vmatmul.mubr.msk.bf16.vlgmr.msra.gmra.mxu1 %vm5101_vm11, %v3573_v26  ;;  %v1049_v0 = vpack.c.bf16 %v1032_v35, %v1031_v15  ;;  %v842_v32 = vsel %vm4997_vm15, %v4933_v11, 0.0  ;;  %v843_v35 = vsel %vm4974_vm13, %v4947_v56, 0.0  ;;  %v4433_v11 = vld [vmem:[%s6213_s3 + $0x100] sm:$0xff]   ;;  %vm6301_vm11 = vmmov 1  }
 0x164   : > { %v4184_v53 = vunpack.i.h.bf16 %v4182_v38  ;;  %v4183_v44 = vunpack.i.l.bf16 %v4182_v38  ;;  %4068 = vmatpush3.bf16.msra.mxu1 %v4832_v23  ;;  %1341 = vmatprep.mubr.bf16.mxu1 %v1053_v17  ;;  %v1039_v45 = vsel %vm6234_vm5, %v862_v14, %v4173_v24  ;;  %v1040_v49 = vsel %vm6234_vm5, %v863_v12, %v4174_v33 }
 0x165   : > { %v4187_v61 = vpop.permute.xlu0 %4186  ;;  %v1050_v8 = vpack.c.bf16 %v1040_v49, %v1039_v45  ;;  %4069 = vmatprep.subr.bf16.mxu1 %v4431_v27  ;;  %v810_v23 = vsel %vm4911_vm10, %v4929_v10, 0.0 }
 0x166   : > { %v4189_v17 = vunpack.i.h.bf16 %v4187_v61  ;;  %v4188_v26 = vunpack.i.l.bf16 %v4187_v61  ;;  %v1019_v16 = vsel %vm6234_vm5, %v809_v7, %v4183_v44  ;;  %v1020_v19 = vsel %vm6234_vm5, %v810_v23, %v4184_v53 }
 0x167   : > { %v4197_v21 = vpop.permute.xlu1 %4196  ;;  %1398 = vmatprep.mubr.bf16.mxu0 %v1050_v8  ;;  %v1057_v15 = vpack.c.bf16 %v1020_v19, %v1019_v16 }
 0x168   : > { %v4199_v33 = vunpack.i.h.bf16 %v4197_v21  ;;  %v4198_v24 = vunpack.i.l.bf16 %v4197_v21  ;;  %1399 = vmatmul.mubr.bf16.vlgmr.msra.gmra.mxu0 %v1049_v0  ;;  %4070 = vmatpush3.bf16.msra.mxu1 %v4431_v27  ;;  %v1027_v12 = vsel %vm6234_vm5, %v842_v32, %v4188_v26  ;;  %v1028_v14 = vsel %vm6234_vm5, %v843_v35, %v4189_v17 }
 0x169   : > { %v4192_v38 = vpop.permute.xlu0 %4191  ;;  %v1058_v53 = vpack.c.bf16 %v1028_v14, %v1027_v12  ;;  %4071 = vmatprep.subr.bf16.mxu1 %v4432_v63  ;;  %v864_v27 = vsel %vm4782_vm4, %v4777_v62, 0.0  ;;  %v865_v0 = vsel %vm4763_vm2, %v4929_v10, 0.0  ;;  %v811_v62 = vsel %vm4991_vm14, %v4901_v2, 0.0 }
 0x16a   : > { %v4194_v44 = vunpack.i.h.bf16 %v4192_v38  ;;  %v4193_v45 = vunpack.i.l.bf16 %v4192_v38  ;;  %v1033_v56 = vsel %vm6234_vm5, %v4719_v36, %v4198_v24  ;;  %v1034_v49 = vsel %vm6234_vm5, %v4740_v46, %v4199_v33 }
 0x16b   : > { %v4202_v7 = vpop.permute.xlu1 %4201  ;;  %1342 = vmatmul.mubr.bf16.gmra.mxu1 %v1052_v34  ;;  %v1054_v26 = vpack.c.bf16 %v1034_v49, %v1033_v56  ;;  %v812_v10 = vsel %vm5002_vm0, %v4981_v47, 0.0  ;;  %v845_v35 = vsel %vm6300_vm12, %v4989_v55, 0.0  ;;  %v867_v55 = vsel %vm4911_vm10, %v4981_v47, 0.0  ;;  %vm5194_vm12 = vmpackc.low %vm5078_vm1, %vm6301_vm11 }
 0x16c   : > { %v4204_v61 = vunpack.i.h.bf16 %v4202_v7  ;;  %v4203_v8 = vunpack.i.l.bf16 %v4202_v7  ;;  %1349 = vmatprep.mubr.bf16.mxu1 %v1058_v53  ;;  %v1041_v23 = vsel %vm6234_vm5, %v864_v27, %v4193_v45  ;;  %v1042_v36 = vsel %vm6234_vm5, %v865_v0, %v4194_v44  ;;  %4072 = vmatpush3.bf16.msra.mxu1 %v4432_v63 }
 0x16d   : > { %v4207_v17 = vpop.permute.xlu0 %4206  ;;  %v1055_v46 = vpack.c.bf16 %v1042_v36, %v1041_v23  ;;  %4073 = vmatprep.subr.bf16.mxu1 %v4433_v11  ;;  %v844_v63 = vsel %vm5054_vm6, %v4985_v52, 0.0  ;;  %v866_v52 = vsel %vm4907_vm9, %v4901_v2, 0.0  ;;  %v868_v47 = vsel %vm4991_vm14, %v5010_v59, 0.0 }
 0x16e   : > { %v4209_v34 = vunpack.i.h.bf16 %v4207_v17  ;;  %v4208_v16 = vunpack.i.l.bf16 %v4207_v17  ;;  %v1021_v19 = vsel %vm6234_vm5, %v811_v62, %v4203_v8  ;;  %v1022_v21 = vsel %vm6234_vm5, %v812_v10, %v4204_v61  ;;  %v4437_v10 = vld [vmem:[%s6213_s3 + $0x150] sm:$0xff]  }
 0x16f   : > { %v4217_v32 = vpop.permute.xlu1 %4216  ;;  %1406 = vmatprep.mubr.bf16.mxu0 %v1055_v46  ;;  %v1062_v33 = vpack.c.bf16 %v1022_v21, %v1021_v19  ;;  %v884_v62 = vsel %vm5054_vm6, %v5051_v20, 0.0  ;;  %v4441_v20 = vld [vmem:[%s6213_s3 + $0x1d8] sm:$0xff]   ;;  %v4445_v19 = vld [vmem:[%s6213_s3 + $0x1d0] sm:$0xff]   ;;  %v4448_v21 = vld [vmem:[%s6213_s3 + $0x208] sm:$0xff]   ;;  %vm6304_vm1 = vcmp.lt.s32.totalorder %v4709_v28, 1 }
 0x170   : > { %v4219_v24 = vunpack.i.h.bf16 %v4217_v32  ;;  %v4218_v12 = vunpack.i.l.bf16 %v4217_v32  ;;  %1407 = vmatmul.mubr.bf16.gmra.mxu0 %v1054_v26  ;;  %v1029_v14 = vsel %vm6234_vm5, %v844_v63, %v4208_v16  ;;  %v1030_v38 = vsel %vm6234_vm5, %v845_v35, %v4209_v34  ;;  %4074 = vmatpush3.bf16.msra.mxu1 %v4433_v11  ;;  %v4444_v34 = vld [vmem:[%s6213_s3 + $0x210] sm:$0xff]   ;;  %v4438_v16 = vld [vmem:[%s6213_s3 + $0x188] sm:$0xff]   ;;  %v4442_v63 = vld [vmem:[%s6213_s3 + $0x180] sm:$0xff]  }
 0x171   : > { %v4212_v53 = vpop.permute.xlu0 %4211  ;;  %v1063_v44 = vpack.c.bf16 %v1030_v38, %v1029_v14  ;;  %v4439_v32 = vld [vmem:[%s6213_s3 + $0x148] sm:$0xff]   ;;  %v4447_v14 = vld [vmem:[%s6213_s3 + $0x138] sm:$0xff]   ;;  %v4450_v38 = vld [vmem:[%s6213_s3 + $0x170] sm:$0xff]  }
 0x172   : > { %v4214_v45 = vunpack.i.h.bf16 %v4212_v53  ;;  %v4213_v56 = vunpack.i.l.bf16 %v4212_v53  ;;  %v1035_v49 = vsel %vm6234_vm5, %v4837_v25, %v4218_v12  ;;  %v1036_v27 = vsel %vm6234_vm5, %v4840_v29, %v4219_v24  ;;  %v4449_v35 = vld [vmem:[%s6213_s3 + $0x1c8] sm:$0xff]   ;;  %v4443_v24 = vld [vmem:[%s6213_s3 + $0x140] sm:$0xff]   ;;  %v4446_v12 = vld [vmem:[%s6213_s3 + $0x178] sm:$0xff]  }
 0x173   : > { %1350 = vmatmul.mubr.bf16.gmra.mxu1 %v1057_v15  ;;  %v4227_v11 = vpop.permute.xlu1 %4226  ;;  %v1059_v2 = vpack.c.bf16 %v1036_v27, %v1035_v49  ;;  %v6302_v29 = vmov 0  ;;  %v4451_v53 = vld [vmem:[%s6213_s3 + $0x130] sm:$0xff]   ;;  %vm6305_vm11 = vmmov %vm6304_vm1 }
 0x174   : > { %1357 = vmatprep.mubr.bf16.mxu1 %v1063_v44  ;;  %v1043_v7 = vsel %vm6234_vm5, %v866_v52, %v4213_v56  ;;  %v1044_v15 = vsel %vm6234_vm5, %v867_v55, %v4214_v45  ;;  %v4229_v23 = vunpack.i.h.bf16 %v4227_v11  ;;  %v6303_v29 = vsel %vm5194_vm12, 4294967295, %v6302_v29 }
 0x175   : > { %v4222_v0 = vpop.permute.xlu0 %4221  ;;  %v1060_v61 = vpack.c.bf16 %v1044_v15, %v1043_v7  ;;  %v4228_v17 = vunpack.i.l.bf16 %v4227_v11 }
 0x176   : > { %v4223_v8 = vunpack.i.l.bf16 %v4222_v0  ;;  %v4224_v36 = vunpack.i.h.bf16 %v4222_v0 }
 0x177   : > { %1414 = vmatprep.mubr.bf16.mxu0 %v1060_v61  ;;  %v1038_v26 = vsel %vm6234_vm5, %v4813_v13, %v4228_v17  ;;  %v4434_v13 = vld [vmem:[%s6213_s3 + $0x198] sm:$0xff]  }
 0x178   : > { %v1045_v25 = vsel %vm6234_vm5, %v868_v47, %v4223_v8  ;;  %1415 = vmatmul.mubr.bf16.gmra.mxu0 %v1059_v2  ;;  %v1037_v59 = vsel %vm6234_vm5, %v4922_v9, %v4224_v36  ;;  %v1066_v9 = vpack.c.bf16 %v6245_v54, %v884_v62  ;;  %3869 = vmatprep.subr.bf16.mxu0 %v4434_v13 }
 0x179   : > { %v3577_v46 = vpack.c.bf16 %v4229_v23, %v1045_v25  ;;  %v1064_v43 = vpack.c.bf16 %v1038_v26, %v1037_v59 }
 0x17b   : > { %1358 = vmatmul.mubr.bf16.gmra.mxu1 %v1062_v33  ;;  %3578 = vmatprep.mubr.msk.bf16.mxu0 %vm5194_vm12, %v3577_v46  ;;  %v4452_v33 = vld [vmem:[%s6213_s3 + $0x200] sm:$0xff]   ;;  %vm6314_vm12 = vnez %v6283_v50 }
 0x17c   : > { %4075 = vmatprep.mubr.msk.bf16.mxu1 %vm6234_vm5, %v5029_v48  ;;  %v4435_v48 = vld [vmem:[%s6213_s3 + $0x158] sm:$0xff]  }
 0x17d   : > { %3870 = vmatpush3.bf16.msra.mxu0 %v4435_v48 }
 0x180   : > { %1423 = vmatmul.mubr.bf16.gmra.mxu0 %v1064_v43 }
 0x183   : > { %4076 = vmatmul.mubr.msk.bf16.vlgmr.msra.gmra.mxu1 %vm6234_vm5, %v4970_v37  ;;  %v4436_v37 = vld [vmem:[%s6213_s3 + $0x190] sm:$0xff]  }
 0x184   : > { %4079 = vmatprep.mubr.msk.bf16.mxu1 %vm6234_vm5, %v5031_v6  ;;  %v4440_v6 = vld [vmem:[%s6213_s3 + $0x218] sm:$0xff]   ;;  %3871 = vmatprep.subr.bf16.mxu0 %v4436_v37 }
 0x185   : > { %3909 = vmatprep.subr.bf16.mxu1 %v4440_v6  ;;  %3872 = vmatpush3.bf16.msra.mxu0 %v4437_v10  ;;  %v5275_v6 = vld [vmem:[%s6214_s4] ss:$0 sm:$0xff] }
 0x186   : > { %3910 = vmatpush3.bf16.msra.mxu1 %v4441_v20  ;;  %3873 = vmatprep.subr.bf16.mxu0 %v4438_v16 }
 0x187   : > { %3911 = vmatprep.subr.bf16.mxu1 %v4444_v34 }
 0x189   : > { %3874 = vmatpush3.bf16.msra.mxu0 %v4439_v32 }
 0x18a   : > { %3912 = vmatpush3.bf16.msra.mxu1 %v4445_v19  ;;  %3875 = vmatprep.subr.bf16.mxu0 %v4442_v63 }
 0x18b   : > { %4080 = vmatmul.mubr.msk.bf16.gmra.mxu1 %vm6234_vm5, %v1066_v9  ;;  %3913 = vmatprep.subr.bf16.mxu1 %v4448_v21  ;;  %vm6306_vm5 = vmmov %vm6304_vm1 }
 0x18d   : > { %3876 = vmatpush3.bf16.msra.mxu0 %v4443_v24 }
 0x18e   : > { %3914 = vmatpush3.bf16.msra.mxu1 %v4449_v35  ;;  %3877 = vmatprep.subr.bf16.mxu0 %v4446_v12 }
 0x18f   : > { %3915 = vmatprep.subr.bf16.mxu1 %v4452_v33 }
 0x191   : > { %3878 = vmatpush3.bf16.msra.mxu0 %v4447_v14 }
 0x192   : > { %3879 = vmatprep.subr.bf16.mxu0 %v4450_v38 }
 0x195   : > { %3880 = vmatpush3.bf16.msra.mxu0 %v4451_v53 }
 0x223   : > { %v3797_v44 = vpop.f32.mrf.mxu1 }
 0x225   : > { %v3798_v45 = vpop.f32.mrf.mxu1 }
 0x226   : > { %v3799_v48 = vadd.f32 %v3798_v45, %v3797_v44 }
 0x227   : > { %v3800_v56 = vpop.f32.mrf.mxu1 }
 0x228   : > { %v3837_v52 = vpop.f32.mrf.mxu0  ;;  %v1336_v63 = vadd.f32 %v3799_v48, %v5275_v6 }
 0x229   : > { %v3801_v55 = vpop.f32.mrf.mxu1 }
 0x22a   : > { %v3838_v49 = vpop.f32.mrf.mxu0  ;;  %v3802_v35 = vadd.f32 %v3801_v55, %v3800_v56  ;;  %v4453_v56 = vld [vmem:[%s6213_s3 + $0x1c0] sm:$0xff]   ;;  %v4454_v55 = vld [vmem:[%s6213_s3 + $0x168] sm:$0xff]  }
 0x22b   : > { %v3803_v27 = vpop.f32.mrf.mxu1  ;;  %v3839_v34 = vadd.f32 %v3838_v49, %v3837_v52  ;;  %3916 = vmatpush3.bf16.msra.mxu1 %v4453_v56  ;;  %3881 = vmatprep.subr.bf16.mxu0 %v4454_v55 }
 0x22c   : > { %v3840_v11 = vpop.f32.mrf.mxu0  ;;  %v1339_v49 = vadd.f32 %v3802_v35, %v5275_v6 }
 0x22d   : > { %v3804_v7 = vpop.f32.mrf.mxu1  ;;  %v1401_v45 = vadd.f32 %v3839_v34, %v1336_v63 }
 0x22e   : > { %v3841_v15 = vpop.f32.mrf.mxu0  ;;  %v3805_v9 = vadd.f32 %v3804_v7, %v3803_v27 }
 0x22f   : > { %v3806_v0 = vpop.f32.mrf.mxu1  ;;  %v3842_v38 = vadd.f32 %v3841_v15, %v3840_v11  ;;  %v4455_v11 = vld [vmem:[%s6213_s3 + $0x128] sm:$0xff]  }
 0x230   : > { %v3843_v61 = vpop.f32.mrf.mxu0  ;;  %v1344_v21 = vadd.f32 %v3805_v9, %v5275_v6  ;;  %3882 = vmatpush3.bf16.msra.mxu0 %v4455_v11  ;;  %v5342_v11 = vld [vmem:[%s6213_s3 + $0x238] sm:$0xff]  }
 0x231   : > { %v3807_v8 = vpop.f32.mrf.mxu1 }
 0x232   : > { %v3844_v2 = vpop.f32.mrf.mxu0  ;;  %v3808_v16 = vadd.f32 %v3807_v8, %v3806_v0 }
 0x233   : > { %v3809_v47 = vpop.f32.mrf.mxu1  ;;  %v3845_v20 = vadd.f32 %v3844_v2, %v3843_v61 }
 0x234   : > { %v3846_v23 = vpop.f32.mrf.mxu0  ;;  %v1347_v53 = vadd.f32 %v3808_v16, %v5275_v6 }
 0x235   : > { %v3810_v36 = vpop.f32.mrf.mxu1  ;;  %v1409_v12 = vadd.f32 %v3845_v20, %v1344_v21 }
 0x236   : > { %v3847_v25 = vpop.f32.mrf.mxu0  ;;  %v3811_v27 = vadd.f32 %v3810_v36, %v3809_v47  ;;  %v1404_v36 = vadd.f32 %v3842_v38, %v1339_v49 }
 0x237   : > { %v3812_v17 = vpop.f32.mrf.mxu1  ;;  %v3848_v33 = vadd.f32 %v3847_v25, %v3846_v23  ;;  %v4456_v25 = vld [vmem:[%s6213_s3 + $0x1f8] sm:$0xff]  }
 0x238   : > { %v3849_v46 = vpop.f32.mrf.mxu0  ;;  %v1352_v9 = vadd.f32 %v3811_v27, %v5275_v6  ;;  %3917 = vmatprep.subr.bf16.mxu1 %v4456_v25 }
 0x239   : > { %v3813_v59 = vpop.f32.mrf.mxu1  ;;  %v1412_v61 = vadd.f32 %v3848_v33, %v1347_v53 }
 0x23a   : > { %v3850_v26 = vpop.f32.mrf.mxu0  ;;  %v3814_v48 = vadd.f32 %v3813_v59, %v3812_v17 }
 0x23b   : > { %v3815_v43 = vpop.f32.mrf.mxu1  ;;  %v3851_v15 = vadd.f32 %v3850_v26, %v3849_v46 }
 0x23c   : > { %v3852_v62 = vpop.f32.mrf.mxu0  ;;  %v1355_v33 = vadd.f32 %v3814_v48, %v5275_v6  ;;  %v4464_v48 = vld [vmem:[%s6213_s3 + $0x1a8] sm:$0xff]  }
 0x23d   : > { %v3816_v13 = vpop.f32.mrf.mxu1  ;;  %v1417_v35 = vadd.f32 %v3851_v15, %v1352_v9 }
 0x23e   : > { %v3853_v37 = vpop.f32.mrf.mxu0 }
 0x23f   : > { %v3818_v10 = vpop.f32.mrf.mxu1 }
 0x240   : > { %v3855_v19 = vpop.f32.mrf.mxu0 }
 0x241   : > { %v3819_v32 = vpop.f32.mrf.mxu1 }
 0x242   : > { %v3856_v24 = vpop.f32.mrf.mxu0  ;;  %v3820_v47 = vadd.f32 %v3819_v32, %v3818_v10  ;;  %v4457_v10 = vld [vmem:[%s6213_s3 + $0x1b8] sm:$0xff]   ;;  %v3854_v32 = vadd.f32 %v3853_v37, %v3852_v62 }
 0x243   : > { %v4077_v14 = vpop.f32.mrf.mxu1  ;;  %3918 = vmatpush3.bf16.msra.mxu1 %v4457_v10  ;;  %v3857_v37 = vadd.f32 %v3856_v24, %v3855_v19  ;;  %v4461_v24 = vld [vmem:[%s6213_s3 + $0x1b0] sm:$0xff]  }
 0x244   : > { %v3858_v44 = vpop.f32.mrf.mxu0  ;;  %v1474_v7 = vadd.f32 %v4077_v14, %v1409_v12  ;;  %v1363_v17 = vadd.f32 %v3820_v47, %v5275_v6  ;;  %v3817_v12 = vadd.f32 %v3816_v13, %v3815_v43  ;;  %v4459_v43 = vld [vmem:[%s6213_s3 + $0x120] sm:$0xff]   ;;  %v4460_v13 = vld [vmem:[%s6213_s3 + $0x1f0] sm:$0xff]  }
 0x245   : > { %v1465_v52 = vpop.f32.mrf.mxu1  ;;  %3919 = vmatprep.subr.bf16.mxu1 %v4460_v13 }
 0x246   : > { %v1466_v0 = vadd.f32 %v1465_v52, %v1401_v45  ;;  %v3859_v8 = vpop.f32.mrf.mxu0  ;;  %v5294_v20 = vmax.f32 %v1474_v7, 0.0  ;;  %v4458_v52 = vld [vmem:[%s6213_s3 + $0x160] sm:$0xff]  }
 0x247   : > { %v4078_v2 = vpop.f32.mrf.mxu1  ;;  %v3860_v21 = vadd.f32 %v3859_v8, %v3858_v44  ;;  %v1360_v8 = vadd.f32 %v3817_v12, %v5275_v6  ;;  %3883 = vmatprep.subr.bf16.mxu0 %v4458_v52  ;;  %3920 = vmatpush3.bf16.msra.mxu1 %v4461_v24 }
 0x248   : > { %v1477_v23 = vadd.f32 %v4078_v2, %v1412_v61  ;;  %v5296_v16 = vmax.f32 %v1466_v0, 0.0  ;;  %v1581_v38 = vrot.slane %v5294_v20, 7  ;;  %v1420_v0 = vadd.f32 %v3854_v32, %v1355_v33  ;;  %3884 = vmatpush3.bf16.msra.mxu0 %v4459_v43 }
 0x249   : > { %v1468_v34 = vpop.f32.mrf.mxu1  ;;  %v1428_v27 = vadd.f32 %v3860_v21, %v1363_v17  ;;  %v1425_v25 = vadd.f32 %v3857_v37, %v1360_v8  ;;  %4083 = vmatprep.subr.bf16.mxu0 %v5342_v11  ;;  %v4466_v37 = vld [vmem:[%s6213_s3 + $0x1a0] sm:$0xff]  }
 0x24a   : > { %v5298_v63 = vmax.f32 %v1477_v23, 0.0  ;;  %v1469_v46 = vadd.f32 %v1468_v34, %v1404_v36  ;;  %v1579_v44 = vrot.slane %v5296_v16, 7  ;;  %v4463_v36 = vld [vmem:[%s6213_s3 + $0x1e8] sm:$0xff]  }
 0x24b   : > { %v4081_v26 = vpop.f32.mrf.mxu1  ;;  %3921 = vmatprep.subr.bf16.mxu1 %v4463_v36 }
 0x24c   : > { %v5304_v59 = vmax.f32 %v1469_v46, 0.0  ;;  %v1582_v53 = vrot.slane %v5298_v63, 7  ;;  %v1490_v46 = vadd.f32 %v4081_v26, %v1425_v25  ;;  %3922 = vmatpush3.bf16.msra.mxu1 %v4464_v48  ;;  %v1614_v52 = vrot.slane %v5298_v63, 1 }
 0x24d   : > { %v1481_v14 = vpop.f32.mrf.mxu1 }
 0x24e   : > { %v1482_v45 = vadd.f32 %v1481_v14, %v1417_v35  ;;  %v1580_v62 = vrot.slane %v5304_v59, 7  ;;  %v5337_v55 = vsel %vm6306_vm5, %v1581_v38, %v1582_v53  ;;  %v1612_v32 = vrot.slane %v5304_v59, 1  ;;  %vm6307_vm5 = vmmov %vm6304_vm1 }
 0x24f   : > { %v4082_v7 = vpop.f32.mrf.mxu1  ;;  %v1638_v10 = vsel %vm4763_vm2, %v5337_v55, 0.0  ;;  %v1611_v14 = vrot.slane %v5296_v16, 1  ;;  %v5398_v43 = vmax.f32 %v1490_v46, 0.0  ;;  %v4250_v13 = vpack.i.bf16 %v5294_v20, %v5304_v59 }
 0x250   : > { %v1493_v49 = vadd.f32 %v4082_v7, %v1428_v27  ;;  %v5322_v61 = vsel %vm6304_vm1, %v1579_v44, %v1580_v62  ;;  %v5326_v19 = vsel %vm6305_vm11, %v1580_v62, %v1581_v38  ;;  %v5344_v15 = vmax.f32 %v1482_v45, 0.0  ;;  %v4465_v62 = vld [vmem:[%s6213_s3 + $0x1e0] sm:$0xff]  }
 0x251   : > { %v1484_v2 = vpop.f32.mrf.mxu1  ;;  %v1636_v56 = vsel %vm4768_vm3, %v5322_v61, 0.0  ;;  %v1637_v9 = vsel %vm4782_vm4, %v5326_v19, 0.0  ;;  %v1613_v27 = vrot.slane %v5294_v20, 1  ;;  %vm6308_vm11 = vcmp.lt.s32.totalorder %v4709_v28, 7  ;;  %3923 = vmatprep.subr.bf16.mxu1 %v4465_v62 }
 0x252   : > { %v5346_v47 = vmax.f32 %v1493_v49, 0.0  ;;  %v1485_v6 = vadd.f32 %v1484_v2, %v1420_v0  ;;  %v4230_v23 = vpack.i.bf16 %v5296_v16, %v1636_v56  ;;  %v4240_v17 = vpack.i.bf16 %v1638_v10, %v1637_v9  ;;  %3924 = vmatpush3.bf16.msra.mxu1 %v4466_v37 }
 0x253   : > { %v1583_v33 = vrot.slane %v5344_v15, 7  ;;  %v1615_v38 = vrot.slane %v5344_v15, 1  ;;  %v5395_v7 = vsel %vm6308_vm11, %v1611_v14, %v1612_v32  ;;  %v1585_v9 = vrot.slane %v5398_v43, 7 }
 0x254   : > { %v1586_v34 = vrot.slane %v5346_v47, 7  ;;  %v5360_v21 = vmax.f32 %v1485_v6, 0.0  ;;  %4231 = vrot.lane.b32.xlu0 %v4230_v23, %s4562_s17  ;;  %v1618_v56 = vrot.slane %v5346_v47, 1 }
 0x256   : > { %v5369_v35 = vsel %vm6307_vm5, %v1586_v34, %v1579_v44  ;;  %v1584_v12 = vrot.slane %v5360_v21, 7  ;;  %vm6309_vm5 = vmmov %vm6304_vm1  ;;  %v1616_v2 = vrot.slane %v5360_v21, 1 }
 0x257   : > { %v1635_v26 = vsel %vm4847_vm7, %v5369_v35, 0.0  ;;  %v5405_v49 = vsel %vm6309_vm5, %v1582_v53, %v1583_v33  ;;  %vm6312_vm5 = vnez %v6269_v30 }
 0x258   : > { %4241 = vrot.lane.b32.xlu0 %v4240_v17, %s4562_s17  ;;  %v4235_v45 = vpack.i.bf16 %v6245_v54, %v1635_v26  ;;  %v5382_v44 = vsel %vm6304_vm1, %v1583_v33, %v1584_v12  ;;  %vm6310_vm1 = vmmov %vm6308_vm11  ;;  %v1643_v53 = vsel %vm6312_vm5, %v5395_v7, 0.0  ;;  %v1639_v6 = vsel %vm4907_vm9, %v5405_v49, 0.0 }
 0x259   : > { %v5409_v0 = vsel %vm6310_vm1, %v1612_v32, %v1613_v27  ;;  %v1640_v24 = vsel %vm4911_vm10, %v5382_v44, 0.0  ;;  %vm6311_vm11 = vmmov %vm6310_vm1  ;;  %v5432_v36 = vsel %vm6310_vm1, %v1615_v38, %v1616_v2  ;;  %vm6315_vm1 = vcmp.lt.s32.totalorder %v4709_v28, 1 }
 0x25a   : > { %4236 = vrot.lane.b32.xlu1 %v4235_v45, %s4562_s17  ;;  %v5416_v8 = vsel %vm6311_vm11, %v1614_v52, %v1615_v38  ;;  %v1644_v23 = vsel %vm4873_vm8, %v5409_v0, 0.0  ;;  %v4265_v25 = vpack.i.bf16 %v1640_v24, %v1639_v6  ;;  %vm6313_vm11 = vnez %v6280_v5  ;;  %vm6316_vm10 = vmmov %vm6315_vm1 }
 0x25b   : > { %v1669_v48 = vsel %vm6313_vm11, %v5416_v8, 0.0  ;;  %v1670_v46 = vsel %vm6314_vm12, %v5432_v36, 0.0  ;;  %v4255_v32 = vpack.i.bf16 %v1644_v23, %v1643_v53  ;;  %v5447_v17 = vsel %vm6315_vm1, %v1584_v12, %v1585_v9 }
 0x25c   : > { %4251 = vrot.lane.b32.xlu0 %v4250_v13, %s4562_s17  ;;  %v5442_v10 = vpack.c.bf16 %v1670_v46, %v1669_v48  ;;  %v1617_v33 = vrot.slane %v5398_v43, 1  ;;  %v5452_v26 = vsel %vm6316_vm10, %v1585_v9, %v1586_v34  ;;  %vm6317_vm9 = vcmp.lt.s32.totalorder %v4709_v28, 7 }
 0x25d   : > { %v1623_v38 = vsel %vm6317_vm9, %v1613_v27, %v1614_v52  ;;  %v4270_v45 = vpack.i.bf16 %v5344_v15, %v5298_v63  ;;  %vm6318_vm2 = vmmov %vm6317_vm9  ;;  %v1641_v34 = vsel %vm4991_vm14, %v5447_v17, 0.0  ;;  %v1642_v27 = vsel %vm5002_vm0, %v5452_v26, 0.0 }
 0x25e   : > { %4246 = vrot.lane.b32.xlu1 %v4250_v13, %s4562_s17  ;;  %v5461_v62 = vsel %vm6318_vm2, %v1617_v33, %v1618_v56  ;;  %vm6319_vm1 = vmmov %vm6318_vm2  ;;  %v1667_v37 = vsel %vm6312_vm5, %v5409_v0, 0.0  ;;  %v1668_v52 = vsel %vm4873_vm8, %v1623_v38, 0.0  ;;  %v1646_v13 = vsel %vm6314_vm12, %v5416_v8, 0.0 }
 0x25f   : > { %v5465_v12 = vsel %vm6319_vm1, %v1616_v2, %v1617_v33  ;;  %v5482_v24 = vpack.c.bf16 %v1668_v52, %v1667_v37  ;;  %v1672_v53 = vsel %vm4974_vm13, %v5461_v62, 0.0  ;;  %v4285_v6 = vpack.i.bf16 %v1642_v27, %v1641_v34  ;;  %vm6320_vm2 = vmmov %vm6319_vm1 }
 0x260   : > { %4266 = vrot.lane.b32.xlu0 %v4265_v25, %s4562_s17  ;;  %v1671_v2 = vsel %vm4997_vm15, %v5465_v12, 0.0  ;;  %v1645_v25 = vsel %vm6313_vm11, %v1623_v38, 0.0  ;;  %v4290_v48 = vpack.i.bf16 %v5398_v43, %v5360_v21  ;;  %v1649_v46 = vsel %vm5054_vm6, %v5461_v62, 0.0 }
 0x261   : > { %v5491_v23 = vpack.c.bf16 %v1672_v53, %v1671_v2  ;;  %v4275_v9 = vpack.i.bf16 %v1646_v13, %v1645_v25  ;;  %v1648_v33 = vsel %vm4974_vm13, %v5465_v12, 0.0  ;;  %v5515_v34 = vsel %vm6320_vm2, %v1618_v56, %v1611_v14 }
 0x262   : > { %4256 = vrot.lane.b32.xlu1 %v4255_v32, %s4562_s17  ;;  %v1647_v32 = vsel %vm4997_vm15, %v5432_v36, 0.0  ;;  %vm6321_vm9 = vnez %v6293_v18  ;;  %v1628_v56 = vsel %vm4873_vm8, %v5395_v7, 0.0  ;;  %vm6322_vm10 = vcmask 523264  }
 0x263   : > { %v4295_v27 = vpack.i.bf16 %v1648_v33, %v1647_v32  ;;  %v1650_v37 = vsel %vm6321_vm9, %v5515_v34, 0.0  ;;  %v1630_v32 = vsel %vm6314_vm12, %v1623_v38, 0.0  ;;  %vm6323_vm1 = vmmov %vm6322_vm10  ;;  %v1651_v38 = vsel %vm4847_vm7, %v5322_v61, 0.0 }
 0x264   : > { %4271 = vrot.lane.b32.xlu0 %v4270_v45, %s4562_s17  ;;  %v4305_v52 = vpack.i.bf16 %v6245_v54, %v1650_v37  ;;  %vm6324_vm2 = vmmov %vm6323_vm1 }
 0x265   : > { %vm6325_vm8 = vmmov %vm6323_vm1 }
 0x266   : > { %4261 = vrot.lane.b32.xlu1 %v4270_v45, %s4562_s17  ;;  %v4300_v45 = vpack.i.bf16 %v1649_v46, %v5346_v47  ;;  %v1629_v46 = vsel %vm6313_vm11, %v5409_v0, 0.0 }
 0x268   : > { %4286 = vrot.lane.b32.xlu0 %v4285_v6, %s4562_s17 }
 0x26a   : > { %4276 = vrot.lane.b32.xlu1 %v4275_v9, %s4562_s17 }
 0x26c   : > { %4291 = vrot.lane.b32.xlu0 %v4290_v48, %s4562_s17 }
 0x26e   : > { %4281 = vrot.lane.b32.xlu1 %v4290_v48, %s4562_s17  ;;  %v1596_v48 = vsel %vm4768_vm3, %v5369_v35, 0.0 }
 0x270   : > { %4301 = vrot.lane.b32.xlu0 %v4300_v45, %s4562_s17 }
 0x272   : > { %4296 = vrot.lane.b32.xlu1 %v4295_v27, %s4562_s17 }
 0x276   : > { %4306 = vrot.lane.b32.xlu1 %v4305_v52, %s4562_s17 }
 0x2c6   : > { %v4232_v13 = vpop.permute.xlu0 %4231 }
 0x2c7   : > { %v4234_v2 = vunpack.i.h.bf16 %v4232_v13  ;;  %v4233_v53 = vunpack.i.l.bf16 %v4232_v13 }
 0x2c9   : > { %v1812_v7 = vsel %vm6324_vm2, %v1628_v56, %v4233_v53  ;;  %v1804_v52 = vsel %vm6325_vm8, %v1596_v48, %v4234_v2  ;;  %v4467_v53 = vld [vmem:[%s6213_s3 + $0x230] sm:$0xff]   ;;  %vm6326_vm8 = vnez %v6299_v39  ;;  %vm6328_vm2 = vnez %v6263_v58 }
 0x2ca   : > { %v4242_v6 = vpop.permute.xlu0 %4241 }
 0x2cb   : > { %v4244_v25 = vunpack.i.h.bf16 %v4242_v6  ;;  %v4243_v14 = vunpack.i.l.bf16 %v4242_v6 }
 0x2cc   : > { %v4237_v9 = vpop.permute.xlu1 %4236 }
 0x2cd   : > { %v4239_v33 = vunpack.i.h.bf16 %v4237_v9  ;;  %v4238_v45 = vunpack.i.l.bf16 %v4237_v9  ;;  %v1813_v27 = vsel %vm6322_vm10, %v1629_v46, %v4243_v14  ;;  %v1814_v37 = vsel %vm6323_vm1, %v1630_v32, %v4244_v25  ;;  %vm6327_vm10 = vmmov %vm6323_vm1 }
 0x2ce   : > { %v4252_v13 = vpop.permute.xlu0 %4251  ;;  %v1841_v6 = vpack.c.bf16 %v1814_v37, %v1813_v27  ;;  %v1652_v14 = vsel %vm4768_vm3, %v5326_v19, 0.0  ;;  %v1597_v32 = vsel %vm4782_vm4, %v5322_v61, 0.0  ;;  %v1631_v61 = vsel %vm4997_vm15, %v5416_v8, 0.0  ;;  %vm6332_vm15 = vmmov %vm6323_vm1 }
 0x2cf   : > { %v3695_v35 = vpack.c.bf16 %v1812_v7, %v4238_v45  ;;  %v3699_v54 = vpack.c.bf16 %v1804_v52, %v4239_v33  ;;  %v4254_v40 = vunpack.i.h.bf16 %v4252_v13  ;;  %v4253_v5 = vunpack.i.l.bf16 %v4252_v13 }
 0x2d0   : > { %v4247_v0 = vpop.permute.xlu1 %4246  ;;  %v1598_v33 = vsel %vm6328_vm2, %v5326_v19, 0.0  ;;  %v1632_v19 = vsel %vm4974_vm13, %v5432_v36, 0.0 }
 0x2d1   : > { %v4249_v2 = vunpack.i.h.bf16 %v4247_v0  ;;  %v4248_v25 = vunpack.i.l.bf16 %v4247_v0  ;;  %3696 = vmatprep.mubr.msk.bf16.mxu0 %vm6326_vm8, %v3695_v35  ;;  %v1827_v56 = vsel %vm6327_vm10, %v1651_v38, %v4253_v5  ;;  %v1828_v9 = vsel %vm6323_vm1, %v1652_v14, %v4254_v40  ;;  %vm6329_vm10 = vmmov %vm6323_vm1 }
 0x2d2   : > { %3700 = vmatmul.mubr.msk.bf16.vlgmr.msra.gmra.mxu0 %vm6326_vm8, %v3699_v54  ;;  %v4267_v48 = vpop.permute.xlu0 %4266  ;;  %v1838_v46 = vpack.c.bf16 %v1828_v9, %v1827_v56  ;;  %vm6331_vm8 = vmmov %vm6323_vm1  ;;  %v1653_v56 = vsel %vm4782_vm4, %v5337_v55, 0.0  ;;  %v1654_v9 = vsel %vm6328_vm2, %v5405_v49, 0.0 }
 0x2d3   : > { %4084 = vmatpush3.bf16.msra.mxu0 %v5342_v11  ;;  %v4269_v45 = vunpack.i.h.bf16 %v4267_v48  ;;  %v4268_v27 = vunpack.i.l.bf16 %v4267_v48  ;;  %2129 = vmatprep.mubr.bf16.mxu0 %v1841_v6  ;;  %v1805_v40 = vsel %vm6329_vm10, %v1597_v32, %v4248_v25  ;;  %v1806_v5 = vsel %vm6323_vm1, %v1598_v33, %v4249_v2  ;;  %v4468_v11 = vld [vmem:[%s6213_s3 + $0x228] sm:$0xff]   ;;  %vm6330_vm10 = vmmov %vm6323_vm1 }
 0x2d4   : > { %v4257_v54 = vpop.permute.xlu1 %4256  ;;  %2186 = vmatprep.mubr.bf16.mxu1 %v1838_v46  ;;  %4085 = vmatprep.subr.bf16.mxu0 %v4467_v53  ;;  %v1840_v37 = vpack.c.bf16 %v1806_v5, %v1805_v40 }
 0x2d5   : > { %v4259_v7 = vunpack.i.h.bf16 %v4257_v54  ;;  %v4258_v52 = vunpack.i.l.bf16 %v4257_v54  ;;  %v1815_v13 = vsel %vm6330_vm10, %v1631_v61, %v4268_v27  ;;  %v1816_v6 = vsel %vm6323_vm1, %v1632_v19, %v4269_v45 }
 0x2d6   : > { %v4272_v35 = vpop.permute.xlu0 %4271  ;;  %v1846_v0 = vpack.c.bf16 %v1816_v6, %v1815_v13  ;;  %vm6335_vm10 = vnez %v6276_v3 }
 0x2d7   : > { %v1820_v38 = vsel %vm6331_vm8, %v5304_v59, %v4259_v7  ;;  %v1819_v8 = vsel %vm6332_vm15, %v5296_v16, %v4258_v52  ;;  %v4274_v14 = vunpack.i.h.bf16 %v4272_v35  ;;  %v4273_v36 = vunpack.i.l.bf16 %v4272_v35  ;;  %4086 = vmatpush3.bf16.msra.mxu0 %v4467_v53  ;;  %v4469_v59 = vld [vmem:[%s6213_s3 + $0x220] sm:$0xff]   ;;  %vm6333_vm15 = vmmov %vm6323_vm1 }
 0x2d8   : > { %v1837_v2 = vpack.c.bf16 %v1820_v38, %v1819_v8  ;;  %v4262_v25 = vpop.permute.xlu1 %4261  ;;  %4087 = vmatprep.subr.bf16.mxu0 %v4468_v11  ;;  %vm6334_vm8 = vmmov %vm6323_vm1  ;;  %v1599_v45 = vsel %vm6335_vm10, %v5337_v55, 0.0  ;;  %vm6336_vm1 = vnez %v6278_v4  ;;  %v1633_v7 = vsel %vm5054_vm6, %v5465_v12, 0.0 }
 0x2d9   : > { %v4264_v48 = vunpack.i.h.bf16 %v4262_v25  ;;  %v4263_v16 = vunpack.i.l.bf16 %v4262_v25  ;;  %v1829_v46 = vsel %vm6333_vm15, %v1653_v56, %v4273_v36  ;;  %v1830_v53 = vsel %vm6334_vm8, %v1654_v9, %v4274_v14  ;;  %vm6337_vm13 = vmmov %vm6334_vm8 }
 0x2da   : > { %v4287_v32 = vpop.permute.xlu0 %4286  ;;  %2130 = vmatmul.mubr.bf16.gmra.mxu0 %v1840_v37  ;;  %2187 = vmatmul.mubr.bf16.vlgmr.msra.gmra.mxu1 %v1837_v2  ;;  %v1843_v33 = vpack.c.bf16 %v1830_v53, %v1829_v46  ;;  %v1600_v27 = vsel %vm6336_vm1, %v5405_v49, 0.0  ;;  %vm6338_vm15 = vmmov %vm6334_vm8  ;;  %v1634_v55 = vsel %vm6321_vm9, %v5461_v62, 0.0  ;;  %v1655_v36 = vsel %vm6335_vm10, %v5382_v44, 0.0 }
 0x2db   : > { %v4289_v40 = vunpack.i.h.bf16 %v4287_v32  ;;  %v4288_v5 = vunpack.i.l.bf16 %v4287_v32  ;;  %2137 = vmatprep.mubr.bf16.mxu0 %v1846_v0  ;;  %4088 = vmatpush3.bf16.msra.mxu0 %v4468_v11  ;;  %v1807_v54 = vsel %vm6337_vm13, %v1599_v45, %v4263_v16  ;;  %v1808_v61 = vsel %vm6338_vm15, %v1600_v27, %v4264_v48  ;;  %vm6339_vm12 = vmmov %vm6334_vm8 }
 0x2dc   : > { %v4277_v19 = vpop.permute.xlu1 %4276  ;;  %2194 = vmatprep.mubr.bf16.mxu1 %v1843_v33  ;;  %v1845_v37 = vpack.c.bf16 %v1808_v61, %v1807_v54  ;;  %4089 = vmatprep.subr.bf16.mxu0 %v4469_v59  ;;  %vm6340_vm13 = vmmov %vm6334_vm8  ;;  %v1656_v2 = vsel %vm6336_vm1, %v5447_v17, 0.0  ;;  %v1602_v48 = vsel %vm5002_vm0, %v5447_v17, 0.0  ;;  %v1657_v61 = vsel %vm4991_vm14, %v5452_v26, 0.0 }
 0x2dd   : > { %v4279_v49 = vunpack.i.h.bf16 %v4277_v19  ;;  %v4278_v52 = vunpack.i.l.bf16 %v4277_v19  ;;  %v1817_v11 = vsel %vm6334_vm8, %v1633_v7, %v4288_v5  ;;  %v1818_v13 = vsel %vm6339_vm12, %v1634_v55, %v4289_v40  ;;  %vm6341_vm15 = vmmov %vm6334_vm8 }
 0x2de   : > { %v4292_v6 = vpop.permute.xlu0 %4291  ;;  %v1851_v35 = vpack.c.bf16 %v1818_v13, %v1817_v11  ;;  %vm6342_vm12 = vmmov %vm6334_vm8  ;;  %v4473_v13 = vld [vmem:[%s6215_s5 + $0x30] sm:$0xff]  }
 0x2df   : > { %v4294_v0 = vunpack.i.h.bf16 %v4292_v6  ;;  %v4293_v38 = vunpack.i.l.bf16 %v4292_v6  ;;  %v1821_v8 = vsel %vm6340_vm13, %v5294_v20, %v4278_v52  ;;  %v1822_v12 = vsel %vm6341_vm15, %v5298_v63, %v4279_v49  ;;  %4090 = vmatpush3.bf16.msra.mxu0 %v4469_v59  ;;  %vm6343_vm13 = vmmov %vm6334_vm8  ;;  %v4480_v6 = vld [vmem:[%s6215_s5 + $0xf0] sm:$0xff]  }
 0x2e0   : > { %v4282_v14 = vpop.permute.xlu1 %4281  ;;  %v1842_v62 = vpack.c.bf16 %v1822_v12, %v1821_v8  ;;  %v1601_v59 = vsel %vm4991_vm14, %v5382_v44, 0.0  ;;  %vm6344_vm15 = vmmov %vm6334_vm8  ;;  %v6352_v52 = vmov 0.0   ;;  %v4475_v8 = vld [vmem:[%s6215_s5 + $0x28] sm:$0xff]   ;;  %v4478_v12 = vld [vmem:[%s6215_s5 + $0x60] sm:$0xff]  }
 0x2e1   : > { %v4284_v25 = vunpack.i.h.bf16 %v4282_v14  ;;  %v4283_v56 = vunpack.i.l.bf16 %v4282_v14  ;;  %v1831_v9 = vsel %vm6342_vm12, %v1655_v36, %v4293_v38  ;;  %v1832_v20 = vsel %vm6334_vm8, %v1656_v2, %v4294_v0  ;;  %vm6345_vm12 = vmmov %vm6334_vm8  ;;  %v4481_v0 = vld [vmem:[%s6215_s5 + $0xb0] sm:$0xff]   ;;  %v4484_v38 = vld [vmem:[%s6215_s5 + $0xe8] sm:$0xff]  }
 0x2e2   : > { %2138 = vmatmul.mubr.bf16.gmra.mxu0 %v1845_v37  ;;  %2195 = vmatmul.mubr.bf16.gmra.mxu1 %v1842_v62  ;;  %v1848_v63 = vpack.c.bf16 %v1832_v20, %v1831_v9  ;;  %v4302_v16 = vpop.permute.xlu0 %4301  ;;  %vm6349_vm9 = vmmov %vm6334_vm8  ;;  %v4485_v14 = vld [vmem:[%s6215_s5 + $0xa8] sm:$0xff]   ;;  %v4488_v62 = vld [vmem:[%s6215_s5 + $0xe0] sm:$0xff]  }
 0x2e3   : > { %2145 = vmatprep.mubr.bf16.mxu0 %v1851_v35  ;;  %v1809_v46 = vsel %vm6343_vm13, %v1601_v59, %v4283_v56  ;;  %v1810_v53 = vsel %vm6344_vm15, %v1602_v48, %v4284_v25  ;;  %v4303_v40 = vunpack.i.l.bf16 %v4302_v16  ;;  %vm6346_vm13 = vmmov %vm6334_vm8  ;;  %v4304_v55 = vunpack.i.h.bf16 %v4302_v16  ;;  %v4474_v35 = vld [vmem:[%s6215_s5 + $0x68] sm:$0xff]   ;;  %v4479_v36 = vld [vmem:[%s6215_s5 + $0x20] sm:$0xff]  }
 0x2e4   : > { %v4297_v32 = vpop.permute.xlu1 %4296  ;;  %2202 = vmatprep.mubr.bf16.mxu1 %v1848_v63  ;;  %v1850_v33 = vpack.c.bf16 %v1810_v53, %v1809_v46  ;;  %vm6347_vm15 = vmmov %vm6334_vm8  ;;  %v4482_v2 = vld [vmem:[%s6215_s5 + $0x58] sm:$0xff]   ;;  %v4486_v56 = vld [vmem:[%s6215_s5 + $0x50] sm:$0xff]  }
 0x2e5   : > { %v4299_v45 = vunpack.i.h.bf16 %v4297_v32  ;;  %v4298_v27 = vunpack.i.l.bf16 %v4297_v32  ;;  %v1833_v7 = vsel %vm6346_vm13, %v1657_v61, %v4303_v40  ;;  %vm6350_vm13 = vmmov %vm6334_vm8  ;;  %v4483_v25 = vld [vmem:[%s6215_s5 + $0x18] sm:$0xff]   ;;  %v4487_v9 = vld [vmem:[%s6215_s5 + $0x10] sm:$0xff]  }
 0x2e6   : > { %vm6351_vm0 = vmmov %vm6334_vm8 }
 0x2e7   : > { %v1823_v5 = vsel %vm6345_vm12, %v5344_v15, %v4298_v27  ;;  %v1824_v44 = vsel %vm6334_vm8, %v5360_v21, %v4299_v45  ;;  %vm6348_vm12 = vnez %v6303_v29  ;;  %v1825_v21 = vsel %vm6349_vm9, %v5398_v43, %v4304_v55  ;;  %v4471_v43 = vld [vmem:[%s6215_s5 + $0x38] sm:$0xff]  }
 0x2e8   : > { %v4307_v54 = vpop.permute.xlu1 %4306  ;;  %v1847_v17 = vpack.c.bf16 %v1824_v44, %v1823_v5 }
 0x2e9   : > { %v4309_v19 = vunpack.i.h.bf16 %v4307_v54  ;;  %v4308_v37 = vunpack.i.l.bf16 %v4307_v54 }
 0x2ea   : > { %2146 = vmatmul.mubr.bf16.gmra.mxu0 %v1850_v33  ;;  %2203 = vmatmul.mubr.bf16.gmra.mxu1 %v1847_v17 }
 0x2eb   : > { %v3703_v49 = vpack.c.bf16 %v4309_v19, %v1833_v7  ;;  %4091 = vmatprep.mubr.msk.bf16.mxu0 %vm6347_vm15, %v5482_v24  ;;  %v1826_v15 = vsel %vm6334_vm8, %v5346_v47, %v4308_v37  ;;  %v1673_v24 = vsel %vm5054_vm6, %v5515_v34, 0.0  ;;  %vm6353_vm15 = vmmov %vm6351_vm0  ;;  %v4470_v47 = vld [vmem:[%s6215_s5 + $0x78] sm:$0xff]  }
 0x2ec   : > { %v1852_v26 = vpack.c.bf16 %v1826_v15, %v1825_v21  ;;  %v1854_v11 = vpack.c.bf16 %v6352_v52, %v1673_v24  ;;  %3957 = vmatprep.subr.bf16.mxu1 %v4470_v47  ;;  %v4477_v34 = vld [vmem:[%s6215_s5 + $0xb8] sm:$0xff]  }
 0x2ed   : > { %3704 = vmatprep.mubr.msk.bf16.mxu1 %vm6348_vm12, %v3703_v49  ;;  %3958 = vmatpush3.bf16.msra.mxu1 %v4471_v43  ;;  %v5710_v43 = vld [vmem:[%s6214_s4 + $0x1] ss:$0 sm:$0xff] }
 0x2f2   : > { %2211 = vmatmul.mubr.bf16.gmra.mxu1 %v1852_v26  ;;  %4092 = vmatmul.mubr.msk.bf16.vlgmr.msra.gmra.mxu0 %vm6350_vm13, %v5442_v10  ;;  %v4472_v10 = vld [vmem:[%s6215_s5 + $0x70] sm:$0xff]  }
 0x2f3   : > { %4095 = vmatprep.mubr.msk.bf16.mxu0 %vm6351_vm0, %v5491_v23  ;;  %v4476_v23 = vld [vmem:[%s6215_s5 + $0xf8] sm:$0xff]   ;;  %3959 = vmatprep.subr.bf16.mxu1 %v4472_v10  ;;  %vm6354_vm0 = vcmp.lt.s32.totalorder %v4709_v28, 1 }
 0x2f4   : > { %3997 = vmatprep.subr.bf16.mxu0 %v4476_v23  ;;  %3960 = vmatpush3.bf16.msra.mxu1 %v4473_v13  ;;  %vm6355_vm9 = vmmov %vm6354_vm0 }
 0x2f5   : > { %3998 = vmatpush3.bf16.msra.mxu0 %v4477_v34  ;;  %3961 = vmatprep.subr.bf16.mxu1 %v4474_v35  ;;  %vm6356_vm8 = vmmov %vm6354_vm0 }
 0x2f6   : > { %3999 = vmatprep.subr.bf16.mxu0 %v4480_v6  ;;  %vm6357_vm13 = vmmov %vm6354_vm0 }
 0x2f8   : > { %3962 = vmatpush3.bf16.msra.mxu1 %v4475_v8 }
 0x2f9   : > { %4000 = vmatpush3.bf16.msra.mxu0 %v4481_v0  ;;  %3963 = vmatprep.subr.bf16.mxu1 %v4478_v12 }
 0x2fa   : > { %4096 = vmatmul.mubr.msk.bf16.gmra.mxu0 %vm6353_vm15, %v1854_v11  ;;  %4001 = vmatprep.subr.bf16.mxu0 %v4484_v38  ;;  %vm6358_vm15 = vmmov %vm6354_vm0 }
 0x2fc   : > { %3964 = vmatpush3.bf16.msra.mxu1 %v4479_v36 }
 0x2fd   : > { %4002 = vmatpush3.bf16.msra.mxu0 %v4485_v14  ;;  %3965 = vmatprep.subr.bf16.mxu1 %v4482_v2 }
 0x2fe   : > { %4003 = vmatprep.subr.bf16.mxu0 %v4488_v62 }
 0x300   : > { %3966 = vmatpush3.bf16.msra.mxu1 %v4483_v25 }
 0x301   : > { %3967 = vmatprep.subr.bf16.mxu1 %v4486_v56 }
 0x304   : > { %3968 = vmatpush3.bf16.msra.mxu1 %v4487_v9 }
 0x392   : > { %v3885_v20 = vpop.f32.mrf.mxu0 }
 0x394   : > { %v3886_v63 = vpop.f32.mrf.mxu0 }
 0x395   : > { %v3887_v24 = vadd.f32 %v3886_v63, %v3885_v20 }
 0x396   : > { %v3888_v59 = vpop.f32.mrf.mxu0 }
 0x397   : > { %v2124_v38 = vadd.f32 %v3887_v24, %v5710_v43 }
 0x398   : > { %v3889_v48 = vpop.f32.mrf.mxu0 }
 0x399   : > { %v3890_v8 = vadd.f32 %v3889_v48, %v3888_v59  ;;  %v4489_v59 = vld [vmem:[%s6215_s5 + $0xa0] sm:$0xff]   ;;  %v4490_v48 = vld [vmem:[%s6215_s5 + $0x48] sm:$0xff]  }
 0x39a   : > { %v3891_v16 = vpop.f32.mrf.mxu0  ;;  %v3925_v46 = vpop.f32.mrf.mxu1  ;;  %4004 = vmatpush3.bf16.msra.mxu0 %v4489_v59  ;;  %3969 = vmatprep.subr.bf16.mxu1 %v4490_v48  ;;  %v4499_v59 = vld [vmem:[%s6215_s5 + $0xc8] sm:$0xff]  }
 0x39c   : > { %v3892_v53 = vpop.f32.mrf.mxu0  ;;  %v3926_v32 = vpop.f32.mrf.mxu1 }
 0x39d   : > { %v3893_v26 = vadd.f32 %v3892_v53, %v3891_v16  ;;  %v3927_v34 = vadd.f32 %v3926_v32, %v3925_v46  ;;  %v2127_v16 = vadd.f32 %v3890_v8, %v5710_v43 }
 0x39e   : > { %v3894_v33 = vpop.f32.mrf.mxu0  ;;  %v3928_v45 = vpop.f32.mrf.mxu1 }
 0x39f   : > { %v2132_v35 = vadd.f32 %v3893_v26, %v5710_v43  ;;  %v2189_v56 = vadd.f32 %v3927_v34, %v2124_v38 }
 0x3a0   : > { %v3895_v27 = vpop.f32.mrf.mxu0  ;;  %v3929_v40 = vpop.f32.mrf.mxu1 }
 0x3a1   : > { %v3896_v10 = vadd.f32 %v3895_v27, %v3894_v33  ;;  %v3930_v2 = vadd.f32 %v3929_v40, %v3928_v45  ;;  %v4491_v45 = vld [vmem:[%s6215_s5 + $0x8] sm:$0xff]  }
 0x3a2   : > { %v3897_v5 = vpop.f32.mrf.mxu0  ;;  %v3931_v44 = vpop.f32.mrf.mxu1  ;;  %3970 = vmatpush3.bf16.msra.mxu1 %v4491_v45 }
 0x3a3   : > { %v2135_v62 = vadd.f32 %v3896_v10, %v5710_v43 }
 0x3a4   : > { %v3898_v54 = vpop.f32.mrf.mxu0  ;;  %v3932_v17 = vpop.f32.mrf.mxu1 }
 0x3a5   : > { %v3933_v23 = vadd.f32 %v3932_v17, %v3931_v44  ;;  %v3899_v46 = vadd.f32 %v3898_v54, %v3897_v5  ;;  %v2192_v5 = vadd.f32 %v3930_v2, %v2127_v16 }
 0x3a6   : > { %v3900_v61 = vpop.f32.mrf.mxu0  ;;  %v3934_v19 = vpop.f32.mrf.mxu1 }
 0x3a7   : > { %v2197_v36 = vadd.f32 %v3933_v23, %v2132_v35 }
 0x3a8   : > { %v3901_v37 = vpop.f32.mrf.mxu0  ;;  %v3935_v7 = vpop.f32.mrf.mxu1 }
 0x3a9   : > { %v3936_v0 = vadd.f32 %v3935_v7, %v3934_v19  ;;  %v4492_v19 = vld [vmem:[%s6215_s5 + $0xd8] sm:$0xff]   ;;  %v3902_v7 = vadd.f32 %v3901_v37, %v3900_v61 }
 0x3aa   : > { %v3903_v55 = vpop.f32.mrf.mxu0  ;;  %v3937_v49 = vpop.f32.mrf.mxu1  ;;  %4005 = vmatprep.subr.bf16.mxu0 %v4492_v19  ;;  %v4493_v61 = vld [vmem:[%s6215_s5 + $0x98] sm:$0xff]  }
 0x3ab   : > { %v2200_v63 = vadd.f32 %v3936_v0, %v2135_v62  ;;  %v2143_v8 = vadd.f32 %v3902_v7, %v5710_v43  ;;  %4006 = vmatpush3.bf16.msra.mxu0 %v4493_v61  ;;  %v4500_v7 = vld [vmem:[%s6215_s5 + $0x88] sm:$0xff]  }
 0x3ac   : > { %v3904_v15 = vpop.f32.mrf.mxu0  ;;  %v3938_v21 = vpop.f32.mrf.mxu1 }
 0x3ad   : > { %v3939_v40 = vadd.f32 %v3938_v21, %v3937_v49  ;;  %v3905_v37 = vadd.f32 %v3904_v15, %v3903_v55  ;;  %v4494_v55 = vld [vmem:[%s6215_s5 + $0x40] sm:$0xff]  }
 0x3ae   : > { %v3906_v11 = vpop.f32.mrf.mxu0  ;;  %v3940_v47 = vpop.f32.mrf.mxu1  ;;  %v4495_v15 = vld [vmem:[%s6215_s5] sm:$0xff]   ;;  %3971 = vmatprep.subr.bf16.mxu1 %v4494_v55 }
 0x3af   : > { %v2148_v16 = vadd.f32 %v3905_v37, %v5710_v43  ;;  %3972 = vmatpush3.bf16.msra.mxu1 %v4495_v15 }
 0x3b0   : > { %v3907_v13 = vpop.f32.mrf.mxu0  ;;  %v3941_v6 = vpop.f32.mrf.mxu1 }
 0x3b1   : > { %v3908_v27 = vadd.f32 %v3907_v13, %v3906_v11  ;;  %v2140_v11 = vadd.f32 %v3899_v46, %v5710_v43  ;;  %v3942_v13 = vadd.f32 %v3941_v6, %v3940_v47 }
 0x3b2   : > { %v3943_v12 = vpop.f32.mrf.mxu1  ;;  %v4093_v14 = vpop.f32.mrf.mxu0 }
 0x3b3   : > { %v2262_v20 = vadd.f32 %v4093_v14, %v2197_v36  ;;  %v2151_v34 = vadd.f32 %v3908_v27, %v5710_v43  ;;  %v2205_v0 = vadd.f32 %v3939_v40, %v2140_v11 }
 0x3b4   : > { %v3944_v25 = vpop.f32.mrf.mxu1  ;;  %v2253_v9 = vpop.f32.mrf.mxu0 }
 0x3b5   : > { %v2254_v53 = vadd.f32 %v2253_v9, %v2189_v56  ;;  %v5728_v26 = vmax.f32 %v2262_v20, 0.0  ;;  %v3945_v14 = vadd.f32 %v3944_v25, %v3943_v12  ;;  %v4496_v12 = vld [vmem:[%s6215_s5 + $0xd0] sm:$0xff]   ;;  %v2208_v20 = vadd.f32 %v3942_v13, %v2143_v8 }
 0x3b6   : > { %v3946_v32 = vpop.f32.mrf.mxu1  ;;  %v4094_v33 = vpop.f32.mrf.mxu0  ;;  %4007 = vmatprep.subr.bf16.mxu0 %v4496_v12 }
 0x3b7   : > { %v2265_v44 = vadd.f32 %v4094_v33, %v2200_v63  ;;  %v5731_v10 = vmax.f32 %v2254_v53, 0.0  ;;  %v2367_v36 = vrot.slane %v5728_v26, 7  ;;  %v4497_v63 = vld [vmem:[%s6215_s5 + $0x90] sm:$0xff]   ;;  %v5770_v33 = vld [vmem:[%s6215_s5 + $0x118] sm:$0xff]   ;;  %v2213_v48 = vadd.f32 %v3945_v14, %v2148_v16 }
 0x3b8   : > { %v3947_v17 = vpop.f32.mrf.mxu1  ;;  %v2256_v54 = vpop.f32.mrf.mxu0  ;;  %4008 = vmatpush3.bf16.msra.mxu0 %v4497_v63  ;;  %4099 = vmatprep.subr.bf16.mxu1 %v5770_v33  ;;  %v2399_v14 = vrot.slane %v5728_v26, 1 }
 0x3b9   : > { %v3948_v24 = vadd.f32 %v3947_v17, %v3946_v32  ;;  %v5733_v23 = vmax.f32 %v2265_v44, 0.0  ;;  %v2257_v49 = vadd.f32 %v2256_v54, %v2192_v5  ;;  %v2365_v2 = vrot.slane %v5731_v10, 7  ;;  %4009 = vmatprep.subr.bf16.mxu0 %v4499_v59 }
 0x3ba   : > { %v4097_v21 = vpop.f32.mrf.mxu0 }
 0x3bb   : > { %v5739_v35 = vmax.f32 %v2257_v49, 0.0  ;;  %v2216_v62 = vadd.f32 %v3948_v24, %v2151_v34  ;;  %v2368_v9 = vrot.slane %v5733_v23, 7  ;;  %v2278_v24 = vadd.f32 %v4097_v21, %v2213_v48 }
 0x3bc   : > { %v2269_v38 = vpop.f32.mrf.mxu0  ;;  %4010 = vmatpush3.bf16.msra.mxu0 %v4500_v7 }
 0x3bd   : > { %v2270_v56 = vadd.f32 %v2269_v38, %v2205_v0  ;;  %v2366_v6 = vrot.slane %v5739_v35, 7  ;;  %v5785_v17 = vsel %vm6356_vm8, %v2367_v36, %v2368_v9  ;;  %v2398_v13 = vrot.slane %v5739_v35, 1 }
 0x3be   : > { %v4098_v47 = vpop.f32.mrf.mxu0  ;;  %v2424_v11 = vsel %vm6328_vm2, %v5785_v17, 0.0  ;;  %v2397_v38 = vrot.slane %v5731_v10, 1  ;;  %v4330_v15 = vpack.i.bf16 %v5728_v26, %v5739_v35 }
 0x3bf   : > { %v2281_v25 = vadd.f32 %v4098_v47, %v2216_v62  ;;  %v5761_v53 = vsel %vm6354_vm0, %v2365_v2, %v2366_v6  ;;  %v5765_v32 = vsel %vm6355_vm9, %v2366_v6, %v2367_v36  ;;  %v5780_v45 = vmax.f32 %v2270_v56, 0.0  ;;  %v4501_v62 = vld [vmem:[%s6215_s5 + $0xc0] sm:$0xff]  }
 0x3c0   : > { %v2272_v46 = vpop.f32.mrf.mxu0  ;;  %v2422_v43 = vsel %vm4768_vm3, %v5761_v53, 0.0  ;;  %v2423_v19 = vsel %vm4782_vm4, %v5765_v32, 0.0  ;;  %v4502_v36 = vld [vmem:[%s6215_s5 + $0x80] sm:$0xff]   ;;  %v2400_v56 = vrot.slane %v5733_v23, 1  ;;  %v5827_v47 = vmax.f32 %v2278_v24, 0.0  ;;  %4011 = vmatprep.subr.bf16.mxu0 %v4501_v62 }
 0x3c1   : > { %v5772_v27 = vmax.f32 %v2281_v25, 0.0  ;;  %v2273_v44 = vadd.f32 %v2272_v46, %v2208_v20  ;;  %v4310_v40 = vpack.i.bf16 %v5731_v10, %v2422_v43  ;;  %v4320_v61 = vpack.i.bf16 %v2424_v11, %v2423_v19  ;;  %4012 = vmatpush3.bf16.msra.mxu0 %v4502_v36 }
 0x3c2   : > { %v2369_v37 = vrot.slane %v5780_v45, 7  ;;  %v2401_v0 = vrot.slane %v5780_v45, 1  ;;  %vm6359_vm0 = vcmp.lt.s32.totalorder %v4709_v28, 7  ;;  %v2371_v24 = vrot.slane %v5827_v47, 7  ;;  %v3182_v28 = vld [vmem:[%s6218_s8] sm:$0xff] }
 0x3c3   : > { %v2372_v5 = vrot.slane %v5772_v27, 7  ;;  %v5789_v54 = vmax.f32 %v2273_v44, 0.0  ;;  %4311 = vrot.lane.b32.xlu0 %v4310_v40, %s4562_s17  ;;  %v5832_v6 = vsel %vm6359_vm0, %v2398_v13, %v2399_v14  ;;  %vm6360_vm9 = vmmov %vm6359_vm0  ;;  %v2404_v43 = vrot.slane %v5772_v27, 1 }
 0x3c4   : > { %v5838_v55 = vsel %vm6360_vm9, %v2397_v38, %v2398_v13  ;;  %v5844_v12 = vsel %vm6356_vm8, %v2368_v9, %v2369_v37  ;;  %v6362_v9 = vld [vmem:[#allocation2_spill] sm:$0xff]  ;;  %vm6365_vm9 = vnez %v6283_v50  ;;  %vm6367_vm12 = vmmov %vm6359_vm0  ;;  %v4350_v62 = vpack.i.bf16 %v5780_v45, %v5733_v23  ;;  %v4503_v50 = vld [vmem:[%s6215_s5 + $0x110] sm:$0xff]  }
 0x3c5   : > { %v5803_v49 = vsel %vm6357_vm13, %v2372_v5, %v2365_v2  ;;  %v2370_v34 = vrot.slane %v5789_v54, 7  ;;  %vm6361_vm13 = vmmov %vm6359_vm0  ;;  %v2402_v20 = vrot.slane %v5789_v54, 1  ;;  %v2429_v16 = vsel %vm6312_vm5, %v5838_v55, 0.0 }
 0x3c6   : > { %v2421_v21 = vsel %vm4847_vm7, %v5803_v49, 0.0  ;;  %v5848_v25 = vsel %vm6361_vm13, %v2400_v56, %v2401_v0  ;;  %v2425_v59 = vsel %vm6335_vm10, %v5844_v12, 0.0  ;;  %vm6366_vm13 = vmmov %vm6359_vm0  ;;  %v2453_v36 = vsel %vm6312_vm5, %v5832_v6, 0.0 }
 0x3c7   : > { %v4315_v8 = vpack.i.bf16 %v6352_v52, %v2421_v21  ;;  %4321 = vrot.lane.b32.xlu0 %v4320_v61, %s4562_s17  ;;  %v5824_v2 = vsel %vm6358_vm15, %v2369_v37, %v2370_v34  ;;  %vm6363_vm15 = vnez %v6362_v9  ;;  %v5863_v44 = vsel %vm6359_vm0, %v2401_v0, %v2402_v20 }
 0x3c8   : > { %v2426_v63 = vsel %vm6336_vm1, %v5824_v2, 0.0  ;;  %v2430_v46 = vsel %vm6363_vm15, %v5832_v6, 0.0  ;;  %v2455_v40 = vsel %vm6313_vm11, %v5848_v25, 0.0  ;;  %v2456_v19 = vsel %vm6365_vm9, %v5863_v44, 0.0 }
 0x3c9   : > { %4316 = vrot.lane.b32.xlu1 %v4315_v8, %s4562_s17  ;;  %v4345_v7 = vpack.i.bf16 %v2426_v63, %v2425_v59  ;;  %v5877_v11 = vpack.c.bf16 %v2456_v19, %v2455_v40  ;;  %v4335_v13 = vpack.i.bf16 %v2430_v46, %v2429_v16  ;;  %v2403_v61 = vrot.slane %v5827_v47, 1 }
 0x3ca   : > { %v5883_v21 = vsel %vm6356_vm8, %v2370_v34, %v2371_v24  ;;  %v5887_v37 = vsel %vm6366_vm13, %v2399_v14, %v2400_v56  ;;  %v5902_v34 = vsel %vm6356_vm8, %v2371_v24, %v2372_v5  ;;  %vm6369_vm13 = vnez %v6285_v42  ;;  %v4505_v42 = vld [vmem:[%s6215_s5 + $0x100] sm:$0xff]  }
 0x3cb   : > { %4331 = vrot.lane.b32.xlu0 %v4330_v15, %s4562_s17  ;;  %v5892_v0 = vsel %vm6359_vm0, %v2403_v61, %v2404_v43  ;;  %v5896_v8 = vsel %vm6367_vm12, %v2402_v20, %v2403_v61  ;;  %v2427_v14 = vsel %vm4991_vm14, %v5883_v21, 0.0  ;;  %v2454_v56 = vsel %vm6363_vm15, %v5887_v37, 0.0 }
 0x3cc   : > { %v5917_v5 = vpack.c.bf16 %v2454_v56, %v2453_v36  ;;  %vm6368_vm12 = vnez %v6289_v57  ;;  %v2458_v30 = vsel %vm6369_vm13, %v5892_v0, 0.0  ;;  %vm6370_vm5 = vnez %v6291_v41 }
 0x3cd   : > { %4326 = vrot.lane.b32.xlu1 %v4330_v15, %s4562_s17  ;;  %v2432_v15 = vsel %vm6365_vm9, %v5848_v25, 0.0  ;;  %v2457_v20 = vsel %vm6368_vm12, %v5896_v8, 0.0  ;;  %v2428_v63 = vsel %vm6370_vm5, %v5902_v34, 0.0  ;;  %v2431_v59 = vsel %vm6313_vm11, %v5887_v37, 0.0 }
 0x3ce   : > { %v5929_v16 = vpack.c.bf16 %v2458_v30, %v2457_v20  ;;  %v4365_v46 = vpack.i.bf16 %v2428_v63, %v2427_v14  ;;  %v4355_v40 = vpack.i.bf16 %v2432_v15, %v2431_v59  ;;  %v4370_v19 = vpack.i.bf16 %v5827_v47, %v5789_v54  ;;  %v3185_v15 = vld [vmem:[%s6218_s8 + $0x18] sm:$0xff]  ;;  %v3188_v20 = vld [vmem:[%s6218_s8 + $0x30] sm:$0xff]  ;;  %v3186_v30 = vld [vmem:[%s6218_s8 + $0x20] sm:$0xff] }
 0x3cf   : > { %4346 = vrot.lane.b32.xlu0 %v4345_v7, %s4562_s17  ;;  %v2435_v7 = vsel %vm5054_vm6, %v5892_v0, 0.0  ;;  %v2433_v24 = vsel %vm6368_vm12, %v5863_v44, 0.0  ;;  %v5953_v61 = vsel %vm6359_vm0, %v2404_v43, %v2397_v38  ;;  %vm6371_vm8 = vnez %v6293_v18  ;;  %v3183_v38 = vld [vmem:[%s6218_s8 + $0x8] sm:$0xff]  ;;  %v3184_v43 = vld [vmem:[%s6218_s8 + $0x10] sm:$0xff]  ;;  %v3189_v63 = vld [vmem:[%s6218_s8 + $0x38] sm:$0xff] }
 0x3d0   : > { %v2436_v36 = vsel %vm6371_vm8, %v5953_v61, 0.0  ;;  %vm6372_vm0 = vcmask 523264   ;;  %v2384_v31 = vsel %vm6328_vm2, %v5765_v32, 0.0 }
 0x3d1   : > { %4336 = vrot.lane.b32.xlu1 %v4335_v13, %s4562_s17  ;;  %v2434_v13 = vsel %vm6369_vm13, %v5896_v8, 0.0  ;;  %v4385_v56 = vpack.i.bf16 %v6352_v52, %v2436_v36  ;;  %v2382_v36 = vsel %vm4768_vm3, %v5803_v49, 0.0  ;;  %vm6373_vm5 = vmmov %vm6372_vm0 }
 0x3d2   : > { %v4375_v14 = vpack.i.bf16 %v2434_v13, %v2433_v24  ;;  %vm6375_vm14 = vmmov %vm6372_vm0 }
 0x3d3   : > { %4351 = vrot.lane.b32.xlu0 %v4350_v62, %s4562_s17 }
 0x3d5   : > { %4341 = vrot.lane.b32.xlu1 %v4350_v62, %s4562_s17  ;;  %v4380_v62 = vpack.i.bf16 %v2435_v7, %v5772_v27 }
 0x3d7   : > { %4366 = vrot.lane.b32.xlu0 %v4365_v46, %s4562_s17  ;;  %v3187_v46 = vld [vmem:[%s6218_s8 + $0x28] sm:$0xff] }
 0x3d9   : > { %4356 = vrot.lane.b32.xlu1 %v4355_v40, %s4562_s17 }
 0x3db   : > { %4371 = vrot.lane.b32.xlu0 %v4370_v19, %s4562_s17 }
 0x3dd   : > { %4361 = vrot.lane.b32.xlu1 %v4370_v19, %s4562_s17 }
 0x3df   : > { %4381 = vrot.lane.b32.xlu0 %v4380_v62, %s4562_s17  ;;  %v2414_v62 = vsel %vm6363_vm15, %v5838_v55, 0.0  ;;  %vm6374_vm15 = vmmov %vm6372_vm0 }
 0x3e1   : > { %4376 = vrot.lane.b32.xlu1 %v4375_v14, %s4562_s17 }
 0x3e3   : > { %3198 = vrot.lane.b32.xlu0 %v3182_v28, %s4565_s19 }
 0x3e5   : > { %4386 = vrot.lane.b32.xlu1 %v4385_v56, %s4562_s17 }
 0x3e7   : > { %3202 = vrot.lane.b32.xlu0 %v3184_v43, %s4565_s19  ;;  %v2416_v43 = vsel %vm6365_vm9, %v5887_v37, 0.0  ;;  %vm6378_vm9 = vmmov %vm6372_vm0 }
 0x3e9   : > { %3200 = vrot.lane.b32.xlu1 %v3183_v38, %s4565_s19  ;;  %v2415_v38 = vsel %vm6313_vm11, %v5832_v6, 0.0  ;;  %vm6376_vm11 = vnez %v6299_v39 }
 0x3eb   : > { %3206 = vrot.lane.b32.xlu0 %v3186_v30, %s4565_s19 }
 0x3ed   : > { %3204 = vrot.lane.b32.xlu1 %v3185_v15, %s4565_s19 }
 0x3ef   : > { %3208 = vrot.lane.b32.xlu0 %v3187_v46, %s4565_s19 }
 0x3f1   : > { %3210 = vrot.lane.b32.xlu1 %v3188_v20, %s4565_s19 }
 0x3f5   : > { %3212 = vrot.lane.b32.xlu1 %v3189_v63, %s4565_s19 }
 0x435   : > { %v4312_v59 = vpop.permute.xlu0 %4311 }
 0x436   : > { %v4314_v40 = vunpack.i.h.bf16 %v4312_v59  ;;  %v4313_v19 = vunpack.i.l.bf16 %v4312_v59 }
 0x438   : > { %v2598_v15 = vsel %vm6372_vm0, %v2414_v62, %v4313_v19  ;;  %v2590_v9 = vsel %vm6373_vm5, %v2382_v36, %v4314_v40  ;;  %v2437_v40 = vsel %vm4847_vm7, %v5761_v53, 0.0  ;;  %v2438_v19 = vsel %vm4768_vm3, %v5765_v32, 0.0  ;;  %vm6379_vm3 = vmmov %vm6372_vm0 }
 0x439   : > { %v4322_v7 = vpop.permute.xlu0 %4321  ;;  %v2383_v62 = vsel %vm4782_vm4, %v5761_v53, 0.0  ;;  %vm6380_vm7 = vmmov %vm6372_vm0  ;;  %v4504_v53 = vld [vmem:[%s6215_s5 + $0x108] sm:$0xff]  }
 0x43a   : > { %v4324_v24 = vunpack.i.h.bf16 %v4322_v7  ;;  %v4323_v13 = vunpack.i.l.bf16 %v4322_v7  ;;  %vm6381_vm5 = vmmov %vm6372_vm0 }
 0x43b   : > { %v4317_v14 = vpop.permute.xlu1 %4316 }
 0x43c   : > { %v4319_v56 = vunpack.i.h.bf16 %v4317_v14  ;;  %v4318_v28 = vunpack.i.l.bf16 %v4317_v14  ;;  %v2599_v55 = vsel %vm6374_vm15, %v2415_v38, %v4323_v13  ;;  %v2600_v20 = vsel %vm6375_vm14, %v2416_v43, %v4324_v24  ;;  %vm6377_vm14 = vmmov %vm6372_vm0 }
 0x43d   : > { %v4332_v63 = vpop.permute.xlu0 %4331  ;;  %v2627_v46 = vpack.c.bf16 %v2600_v20, %v2599_v55  ;;  %vm6382_vm15 = vmmov %vm6372_vm0 }
 0x43e   : > { %v3748_v30 = vpack.c.bf16 %v2598_v15, %v4318_v28  ;;  %v3752_v49 = vpack.c.bf16 %v2590_v9, %v4319_v56  ;;  %v4334_v59 = vunpack.i.h.bf16 %v4332_v63  ;;  %v4333_v7 = vunpack.i.l.bf16 %v4332_v63 }
 0x43f   : > { %v4327_v48 = vpop.permute.xlu1 %4326  ;;  %v2418_v9 = vsel %vm6369_vm13, %v5863_v44, 0.0  ;;  %vm6385_vm13 = vmmov %vm6372_vm0 }
 0x440   : > { %v4329_v6 = vunpack.i.h.bf16 %v4327_v48  ;;  %v4328_v37 = vunpack.i.l.bf16 %v4327_v48  ;;  %3749 = vmatprep.mubr.msk.bf16.mxu1 %vm6376_vm11, %v3748_v30  ;;  %v2613_v24 = vsel %vm6377_vm14, %v2437_v40, %v4333_v7  ;;  %v2614_v13 = vsel %vm6378_vm9, %v2438_v19, %v4334_v59  ;;  %vm6388_vm14 = vmmov %vm6372_vm0 }
 0x441   : > { %3753 = vmatmul.mubr.msk.bf16.vlgmr.msra.gmra.mxu1 %vm6376_vm11, %v3752_v49  ;;  %v4347_v14 = vpop.permute.xlu0 %4346  ;;  %v2624_v60 = vpack.c.bf16 %v2614_v13, %v2613_v24  ;;  %vm6383_vm11 = vmmov %vm6372_vm0  ;;  %v2386_v40 = vsel %vm6336_vm1, %v5844_v12, 0.0 }
 0x442   : > { %4100 = vmatpush3.bf16.msra.mxu1 %v5770_v33  ;;  %2915 = vmatprep.mubr.bf16.mxu1 %v2627_v46  ;;  %v2591_v39 = vsel %vm6379_vm3, %v2383_v62, %v4328_v37  ;;  %v2592_v36 = vsel %vm6380_vm7, %v2384_v31, %v4329_v6  ;;  %v4349_v56 = vunpack.i.h.bf16 %v4347_v14  ;;  %v4348_v28 = vunpack.i.l.bf16 %v4347_v14  ;;  %vm6389_vm9 = vmmov %vm6372_vm0 }
 0x443   : > { %v4337_v38 = vpop.permute.xlu1 %4336  ;;  %4101 = vmatprep.subr.bf16.mxu1 %v4503_v50  ;;  %v2626_v43 = vpack.c.bf16 %v2592_v36, %v2591_v39  ;;  %2972 = vmatprep.mubr.bf16.mxu0 %v2624_v60  ;;  %v2417_v33 = vsel %vm6368_vm12, %v5848_v25, 0.0  ;;  %vm6384_vm12 = vmmov %vm6372_vm0  ;;  %v2385_v37 = vsel %vm6335_vm10, %v5785_v17, 0.0 }
 0x444   : > { %v4339_v32 = vunpack.i.h.bf16 %v4337_v38  ;;  %v4338_v15 = vunpack.i.l.bf16 %v4337_v38  ;;  %v2601_v55 = vsel %vm6381_vm5, %v2417_v33, %v4348_v28  ;;  %v2602_v20 = vsel %vm6372_vm0, %v2418_v9, %v4349_v56  ;;  %vm6390_vm3 = vmmov %vm6372_vm0 }
 0x445   : > { %v4352_v63 = vpop.permute.xlu0 %4351  ;;  %v2632_v46 = vpack.c.bf16 %v2602_v20, %v2601_v55  ;;  %vm6391_vm7 = vmmov %vm6372_vm0  ;;  %v2442_v55 = vsel %vm6336_vm1, %v5883_v21, 0.0 }
 0x446   : > { %v2606_v30 = vsel %vm6382_vm15, %v5739_v35, %v4339_v32  ;;  %v2605_v49 = vsel %vm6383_vm11, %v5731_v10, %v4338_v15  ;;  %4102 = vmatpush3.bf16.msra.mxu1 %v4503_v50  ;;  %v4354_v57 = vunpack.i.h.bf16 %v4352_v63  ;;  %v4353_v25 = vunpack.i.l.bf16 %v4352_v63  ;;  %vm6393_vm5 = vmmov %vm6372_vm0 }
 0x447   : > { %v2623_v59 = vpack.c.bf16 %v2606_v30, %v2605_v49  ;;  %v4342_v7 = vpop.permute.xlu1 %4341  ;;  %4103 = vmatprep.subr.bf16.mxu1 %v4504_v53  ;;  %v2439_v35 = vsel %vm4782_vm4, %v5785_v17, 0.0  ;;  %v2440_v10 = vsel %vm6328_vm2, %v5844_v12, 0.0  ;;  %vm6386_vm4 = vmmov %vm6372_vm0  ;;  %v2419_v17 = vsel %vm5054_vm6, %v5896_v8, 0.0 }
 0x448   : > { %v4344_v44 = vunpack.i.h.bf16 %v4342_v7  ;;  %v4343_v48 = vunpack.i.l.bf16 %v4342_v7  ;;  %v2615_v50 = vsel %vm6384_vm12, %v2439_v35, %v4353_v25  ;;  %v2616_v6 = vsel %vm6385_vm13, %v2440_v10, %v4354_v57  ;;  %vm6387_vm2 = vmmov %vm6372_vm0 }
 0x449   : > { %2916 = vmatmul.mubr.bf16.gmra.mxu1 %v2626_v43  ;;  %2973 = vmatmul.mubr.bf16.vlgmr.msra.gmra.mxu0 %v2623_v59  ;;  %v4367_v1 = vpop.permute.xlu0 %4366  ;;  %v2629_v19 = vpack.c.bf16 %v2616_v6, %v2615_v50  ;;  %v2420_v12 = vsel %vm6371_vm8, %v5892_v0, 0.0  ;;  %v2441_v0 = vsel %vm6335_vm10, %v5824_v2, 0.0  ;;  %vm6392_vm8 = vmmov %vm6372_vm0  ;;  %vm6394_vm0 = vnez %v6287_v51 }
 0x44a   : > { %2923 = vmatprep.mubr.bf16.mxu1 %v2632_v46  ;;  %4104 = vmatpush3.bf16.msra.mxu1 %v4504_v53  ;;  %v2593_v58 = vsel %vm6386_vm4, %v2385_v37, %v4343_v48  ;;  %v2594_v24 = vsel %vm6387_vm2, %v2386_v40, %v4344_v44  ;;  %v4369_v13 = vunpack.i.h.bf16 %v4367_v1  ;;  %v4368_v62 = vunpack.i.l.bf16 %v4367_v1  ;;  %vm6396_vm10 = vmmov %vm6387_vm2 }
 0x44b   : > { %v4357_v31 = vpop.permute.xlu1 %4356  ;;  %v2631_v14 = vpack.c.bf16 %v2594_v24, %v2593_v58  ;;  %4105 = vmatprep.subr.bf16.mxu1 %v4505_v42  ;;  %2980 = vmatprep.mubr.bf16.mxu0 %v2629_v19  ;;  %v2387_v20 = vsel %vm6394_vm0, %v5824_v2, 0.0  ;;  %vm6395_vm15 = vnez %v6291_v41  ;;  %vm6397_vm1 = vmmov %vm6387_vm2  ;;  %v2443_v44 = vsel %vm6394_vm0, %v5902_v34, 0.0 }
 0x44c   : > { %v4359_v60 = vunpack.i.h.bf16 %v4357_v31  ;;  %v4358_v39 = vunpack.i.l.bf16 %v4357_v31  ;;  %v2603_v36 = vsel %vm6388_vm14, %v2419_v17, %v4368_v62  ;;  %v2604_v56 = vsel %vm6389_vm9, %v2420_v12, %v4369_v13  ;;  %vm6398_vm11 = vmmov %vm6397_vm1 }
 0x44d   : > { %v4372_v28 = vpop.permute.xlu0 %4371  ;;  %v2637_v53 = vpack.c.bf16 %v2604_v56, %v2603_v36  ;;  %v2388_v30 = vsel %vm6395_vm15, %v5883_v21, 0.0  ;;  %vm6399_vm12 = vmmov %vm6397_vm1  ;;  %vm6402_vm2 = vnez %v6303_v29  ;;  %v2459_v34 = vsel %vm5054_vm6, %v5953_v61, 0.0 }
 0x44e   : > { %v2607_v38 = vsel %vm6390_vm3, %v5728_v26, %v4358_v39  ;;  %v2608_v43 = vsel %vm6391_vm7, %v5733_v23, %v4359_v60  ;;  %4106 = vmatpush3.bf16.msra.mxu1 %v4505_v42  ;;  %v4374_v32 = vunpack.i.h.bf16 %v4372_v28  ;;  %v4373_v15 = vunpack.i.l.bf16 %v4372_v28  ;;  %vm6400_vm13 = vmmov %vm6397_vm1 }
 0x44f   : > { %v4362_v8 = vpop.permute.xlu1 %4361  ;;  %v2628_v33 = vpack.c.bf16 %v2608_v43, %v2607_v38  ;;  %vm6401_vm4 = vmmov %vm6397_vm1  ;;  %v2640_v29 = vpack.c.bf16 %v6352_v52, %v2459_v34  ;;  %vm3338_vm6 = vcmask 1043456   ;;  %vm3313_vm0 = vcmask 97280  }
 0x450   : > { %v4364_v9 = vunpack.i.h.bf16 %v4362_v8  ;;  %v4363_v18 = vunpack.i.l.bf16 %v4362_v8  ;;  %v2617_v26 = vsel %vm6392_vm8, %v2441_v0, %v4373_v15  ;;  %v2618_v23 = vsel %vm6393_vm5, %v2442_v55, %v4374_v32  ;;  %vm6403_vm14 = vmmov %vm6397_vm1  ;;  %v3709_v32 = vld [vmem:[%s6216_s6] ss:$0 sm:$0xff] }
 0x451   : > { %2924 = vmatmul.mubr.bf16.gmra.mxu1 %v2631_v14  ;;  %2981 = vmatmul.mubr.bf16.gmra.mxu0 %v2628_v33  ;;  %v4382_v3 = vpop.permute.xlu0 %4381  ;;  %v2634_v49 = vpack.c.bf16 %v2618_v23, %v2617_v26  ;;  %vm6404_vm9 = vmmov %vm6397_vm1  ;;  %vm3302_vm5 = vcmask 64512  }
 0x452   : > { %2931 = vmatprep.mubr.bf16.mxu1 %v2637_v53  ;;  %v2595_v4 = vsel %vm6396_vm10, %v2387_v20, %v4363_v18  ;;  %v2596_v63 = vsel %vm6397_vm1, %v2388_v30, %v4364_v9  ;;  %v4383_v7 = vunpack.i.l.bf16 %v4382_v3  ;;  %v4384_v50 = vunpack.i.h.bf16 %v4382_v3  ;;  %vm6405_vm3 = vmmov %vm6397_vm1 }
 0x453   : > { %v4377_v46 = vpop.permute.xlu1 %4376  ;;  %v2636_v59 = vpack.c.bf16 %v2596_v63, %v2595_v4  ;;  %2988 = vmatprep.mubr.bf16.mxu0 %v2634_v49  ;;  %vm6406_vm7 = vmmov %vm6397_vm1 }
 0x454   : > { %v4379_v57 = vunpack.i.h.bf16 %v4377_v46  ;;  %v4378_v25 = vunpack.i.l.bf16 %v4377_v46  ;;  %v2619_v10 = vsel %vm6400_vm13, %v2443_v44, %v4383_v7  ;;  %v2611_v51 = vsel %vm6404_vm9, %v5827_v47, %v4384_v50  ;;  %vm6407_vm8 = vmmov %vm6397_vm1 }
 0x456   : > { %v2609_v2 = vsel %vm6398_vm11, %v5780_v45, %v4378_v25  ;;  %v2610_v41 = vsel %vm6399_vm12, %v5789_v54, %v4379_v57 }
 0x457   : > { %v4387_v21 = vpop.permute.xlu1 %4386  ;;  %v2633_v42 = vpack.c.bf16 %v2610_v41, %v2609_v2 }
 0x458   : > { %v4389_v48 = vunpack.i.h.bf16 %v4387_v21  ;;  %v4388_v35 = vunpack.i.l.bf16 %v4387_v21 }
 0x459   : > { %2932 = vmatmul.mubr.bf16.gmra.mxu1 %v2636_v59  ;;  %2989 = vmatmul.mubr.bf16.gmra.mxu0 %v2633_v42 }
 0x45a   : > { %v3756_v6 = vpack.c.bf16 %v4389_v48, %v2619_v10  ;;  %4107 = vmatprep.mubr.msk.bf16.mxu1 %vm6401_vm4, %v5917_v5  ;;  %v2612_v45 = vsel %vm6403_vm14, %v5772_v27, %v4388_v35  ;;  %v4566_v27 = vmov 8  }
 0x45b   : > { %v2638_v54 = vpack.c.bf16 %v2612_v45, %v2611_v51  ;;  %4391 = vset.pattern.permute.xlu0 %v4566_v27  ;;  %4390 = vset.pattern.permute.xlu1 %v4566_v27 }
 0x45c   : > { %3757 = vmatprep.mubr.msk.bf16.mxu0 %vm6402_vm2, %v3756_v6 }
 0x461   : > { %2997 = vmatmul.mubr.bf16.gmra.mxu0 %v2638_v54  ;;  %4108 = vmatmul.mubr.msk.bf16.vlgmr.msra.gmra.mxu1 %vm6405_vm3, %v5877_v11 }
 0x462   : > { %4111 = vmatprep.mubr.msk.bf16.mxu1 %vm6406_vm7, %v5929_v16 }
 0x469   : > { %4112 = vmatmul.mubr.msk.bf16.gmra.mxu1 %vm6407_vm8, %v2640_v29 }
 0x501   : > { %v3973_v47 = vpop.f32.mrf.mxu1 }
 0x503   : > { %v3974_v5 = vpop.f32.mrf.mxu1 }
 0x504   : > { %v3975_v43 = vadd.f32 %v3974_v5, %v3973_v47 }
 0x505   : > { %v3976_v37 = vpop.f32.mrf.mxu1 }
 0x506   : > { %v2910_v30 = vadd.f32 %v3975_v43, %v3709_v32 }
 0x507   : > { %v3977_v40 = vpop.f32.mrf.mxu1 }
 0x508   : > { %v3978_v15 = vadd.f32 %v3977_v40, %v3976_v37 }
 0x509   : > { %v3979_v1 = vpop.f32.mrf.mxu1  ;;  %v4013_v11 = vpop.f32.mrf.mxu0 }
 0x50a   : > { %v2913_v49 = vadd.f32 %v3978_v15, %v3709_v32 }
 0x50b   : > { %v3980_v19 = vpop.f32.mrf.mxu1  ;;  %v4014_v58 = vpop.f32.mrf.mxu0 }
 0x50c   : > { %v3981_v56 = vadd.f32 %v3980_v19, %v3979_v1  ;;  %v4015_v18 = vadd.f32 %v4014_v58, %v4013_v11 }
 0x50d   : > { %v3982_v16 = vpop.f32.mrf.mxu1  ;;  %v4016_v24 = vpop.f32.mrf.mxu0 }
 0x50e   : > { %v2918_v9 = vadd.f32 %v3981_v56, %v3709_v32  ;;  %v2975_v7 = vadd.f32 %v4015_v18, %v2910_v30 }
 0x50f   : > { %v3983_v13 = vpop.f32.mrf.mxu1  ;;  %v4017_v22 = vpop.f32.mrf.mxu0 }
 0x510   : > { %v3984_v0 = vadd.f32 %v3983_v13, %v3982_v16  ;;  %v4018_v55 = vadd.f32 %v4017_v22, %v4016_v24 }
 0x511   : > { %v3985_v61 = vpop.f32.mrf.mxu1  ;;  %v4019_v62 = vpop.f32.mrf.mxu0 }
 0x512   : > { %v2921_v2 = vadd.f32 %v3984_v0, %v3709_v32  ;;  %v2978_v44 = vadd.f32 %v4018_v55, %v2913_v49 }
 0x513   : > { %v3986_v52 = vpop.f32.mrf.mxu1  ;;  %v4020_v31 = vpop.f32.mrf.mxu0 }
 0x514   : > { %v4021_v53 = vadd.f32 %v4020_v31, %v4019_v62  ;;  %v3987_v26 = vadd.f32 %v3986_v52, %v3985_v61 }
 0x515   : > { %v3988_v14 = vpop.f32.mrf.mxu1  ;;  %v4022_v60 = vpop.f32.mrf.mxu0 }
 0x516   : > { %v2983_v3 = vadd.f32 %v4021_v53, %v2918_v9  ;;  %v2926_v41 = vadd.f32 %v3987_v26, %v3709_v32  ;;  %v3199_v26 = vpop.permute.xlu0 %3198 }
 0x517   : > { %v3989_v39 = vpop.f32.mrf.mxu1  ;;  %v4023_v17 = vpop.f32.mrf.mxu0 }
 0x518   : > { %v3990_v4 = vadd.f32 %v3989_v39, %v3988_v14  ;;  %v4024_v63 = vadd.f32 %v4023_v17, %v4022_v60 }
 0x519   : > { %v3991_v12 = vpop.f32.mrf.mxu1  ;;  %v4025_v36 = vpop.f32.mrf.mxu0 }
 0x51a   : > { %v2929_v6 = vadd.f32 %v3990_v4, %v3709_v32  ;;  %v2986_v34 = vadd.f32 %v4024_v63, %v2921_v2 }
 0x51b   : > { %v3992_v28 = vpop.f32.mrf.mxu1  ;;  %v4026_v38 = vpop.f32.mrf.mxu0 }
 0x51c   : > { %v3993_v46 = vadd.f32 %v3992_v28, %v3991_v12  ;;  %v4027_v27 = vadd.f32 %v4026_v38, %v4025_v36 }
 0x51d   : > { %v3994_v8 = vpop.f32.mrf.mxu1  ;;  %v4028_v33 = vpop.f32.mrf.mxu0 }
 0x51e   : > { %v2934_v45 = vadd.f32 %v3993_v46, %v3709_v32  ;;  %v2991_v17 = vadd.f32 %v4027_v27, %v2926_v41 }
 0x51f   : > { %v3995_v23 = vpop.f32.mrf.mxu1  ;;  %v4029_v20 = vpop.f32.mrf.mxu0 }
 0x520   : > { %v3996_v51 = vadd.f32 %v3995_v23, %v3994_v8  ;;  %v4030_v40 = vadd.f32 %v4029_v20, %v4028_v33  ;;  %v3201_v20 = vpop.permute.xlu1 %3200 }
 0x521   : > { %v4031_v59 = vpop.f32.mrf.mxu0  ;;  %v4109_v57 = vpop.f32.mrf.mxu1 }
 0x522   : > { %v3048_v25 = vadd.f32 %v4109_v57, %v2983_v3  ;;  %v2937_v22 = vadd.f32 %v3996_v51, %v3709_v32  ;;  %v2994_v8 = vadd.f32 %v4030_v40, %v2929_v6 }
 0x523   : > { %v4032_v21 = vpop.f32.mrf.mxu0  ;;  %v3039_v42 = vpop.f32.mrf.mxu1 }
 0x524   : > { %v3072_v48 = vsub.f32 0.0, %v3048_v25  ;;  %v3170_v35 = vmul.f32 1.442695, %v3048_v25  ;;  %v4033_v10 = vadd.f32 %v4032_v21, %v4031_v59  ;;  %v3040_v50 = vadd.f32 %v3039_v42, %v2975_v7  ;;  %v3203_v25 = vpop.permute.xlu0 %3202  ;;  %v3205_v7 = vpop.permute.xlu1 %3204 }
 0x525   : > { %v4034_v54 = vpop.f32.mrf.mxu0  ;;  %v4110_v29 = vpop.f32.mrf.mxu1 }
 0x526   : > { %v3082_v47 = vmul.f32 1.442695, %v3072_v48  ;;  %v3070_v5 = vsub.f32 0.0, %v3040_v50  ;;  %v3166_v37 = vmul.f32 1.442695, %v3040_v50  ;;  %4506 = vpow2.f32 %v3170_v35 }
 0x527   : > { %v3051_v1 = vadd.f32 %v4110_v29, %v2986_v34  ;;  %v4035_v11 = vpop.f32.mrf.mxu0  ;;  %v3042_v19 = vpop.f32.mrf.mxu1  ;;  %v2999_v58 = vadd.f32 %v4033_v10, %v2934_v45 }
 0x528   : > { %4508 = vpow2.f32 %v3082_v47  ;;  %v3078_v16 = vmul.f32 1.442695, %v3070_v5  ;;  %v4036_v24 = vadd.f32 %v4035_v11, %v4034_v54  ;;  %v3043_v13 = vadd.f32 %v3042_v19, %v2978_v44  ;;  %v3207_v50 = vpop.permute.xlu0 %3206  ;;  %v3211_v34 = vpop.permute.xlu1 %3210 }
 0x529   : > { %4510 = vpow2.f32 %v3166_v37  ;;  %v3073_v61 = vsub.f32 0.0, %v3051_v1  ;;  %v3172_v62 = vmul.f32 1.442695, %v3051_v1  ;;  %v4113_v52 = vpop.f32.mrf.mxu1 }
 0x52a   : > { %4512 = vpow2.f32 %v3078_v16  ;;  %v3071_v31 = vsub.f32 0.0, %v3043_v13  ;;  %v3168_v14 = vmul.f32 1.442695, %v3043_v13  ;;  %v3064_v60 = vadd.f32 %v4113_v52, %v2999_v58 }
 0x52b   : > { %v3084_v39 = vmul.f32 1.442695, %v3073_v61  ;;  %4514 = vpow2.f32 %v3172_v62  ;;  %v3055_v12 = vpop.f32.mrf.mxu1  ;;  %v3002_v36 = vadd.f32 %v4036_v24, %v2937_v22 }
 0x52c   : > { %v3080_v56 = vmul.f32 1.442695, %v3071_v31  ;;  %4516 = vpow2.f32 %v3168_v14  ;;  %v3076_v28 = vsub.f32 0.0, %v3064_v60  ;;  %v3178_v38 = vmul.f32 1.442695, %v3064_v60  ;;  %v3209_v11 = vpop.permute.xlu0 %3208  ;;  %v3213_v22 = vpop.permute.xlu1 %3212 }
 0x52d   : > { %4518 = vpow2.f32 %v3084_v39  ;;  %v3056_v43 = vadd.f32 %v3055_v12, %v2991_v17  ;;  %v4114_v53 = vpop.f32.mrf.mxu1 }
 0x52e   : > { %4520 = vpow2.f32 %v3080_v56  ;;  %v3090_v32 = vmul.f32 1.442695, %v3076_v28  ;;  %v3067_v15 = vadd.f32 %v4114_v53, %v3002_v36  ;;  %v3312_v28 = vld [vmem:[%s6219_s9 + $0x8] sm:$0xf] }
 0x52f   : > { %4522 = vpow2.f32 %v3178_v38  ;;  %v3074_v33 = vsub.f32 0.0, %v3056_v43  ;;  %v3174_v9 = vmul.f32 1.442695, %v3056_v43  ;;  %v3058_v18 = vpop.f32.mrf.mxu1  ;;  %v3311_v38 = vld [vmem:[%s6219_s9] sm:$0xff]  ;;  %4115 = vmatprep.subr.msk.mxu0 %vm3338_vm6, %v3312_v28  ;;  %4131 = vmatprep.subr.msk.mxu1 %vm3338_vm6, %v3312_v28 }
 0x530   : > { %4524 = vpow2.f32 %v3090_v32  ;;  %v3077_v0 = vsub.f32 0.0, %v3067_v15  ;;  %v3180_v55 = vmul.f32 1.442695, %v3067_v15  ;;  %v3059_v23 = vadd.f32 %v3058_v18, %v2994_v8  ;;  %4116 = vmatpush3.msk.msra.mxu0 %vm3338_vm6, %v3312_v28  ;;  %4133 = vmatpush3.msk.msra.mxu1 %vm3338_vm6, %v3312_v28  ;;  %v3158_v32 = vld [vmem:[%s6217_s7] sm:$0xff]  ;;  %v3161_v8 = vld [vmem:[%s6217_s7 + $0x18] sm:$0xff]  ;;  %v3160_v18 = vld [vmem:[%s6217_s7 + $0x10] sm:$0xff] }
 0x531   : > { %v3086_v30 = vmul.f32 1.442695, %v3074_v33  ;;  %4526 = vpow2.f32 %v3174_v9  ;;  %4117 = vmatprep.subr.mxu0 %v3311_v38  ;;  %4132 = vmatprep.subr.mxu1 %v3311_v38 }
 0x532   : > { %v3092_v3 = vmul.f32 1.442695, %v3077_v0  ;;  %4528 = vpow2.f32 %v3180_v55  ;;  %v3075_v49 = vsub.f32 0.0, %v3059_v23  ;;  %v3176_v4 = vmul.f32 1.442695, %v3059_v23  ;;  %4118 = vmatpush3.msra.mxu0 %v3311_v38  ;;  %4134 = vmatpush3.msra.mxu1 %v3311_v38 }
 0x533   : > { %4530 = vpow2.f32 %v3086_v30  ;;  %v4507_v63 = vpop.eup %4506  ;;  %v3162_v30 = vld [vmem:[%s6217_s7 + $0x20] sm:$0xff] }
 0x534   : > { %4532 = vpow2.f32 %v3092_v3  ;;  %v3088_v46 = vmul.f32 1.442695, %v3075_v49  ;;  %v3224_v51 = vmul.f32 %v4507_v63, %v3203_v25 }
 0x535   : > { %v4509_v59 = vpop.eup %4508  ;;  %4534 = vpow2.f32 %v3176_v4  ;;  %v3164_v4 = vld [vmem:[%s6217_s7 + $0x30] sm:$0xff] }
 0x536   : > { %v4511_v57 = vpop.eup %4510  ;;  %4536 = vpow2.f32 %v3088_v46  ;;  %v3096_v48 = vadd.f32 1.0, %v4509_v59  ;;  %v3163_v59 = vld [vmem:[%s6217_s7 + $0x28] sm:$0xff] }
 0x537   : > { %v4513_v2 = vpop.eup %4512  ;;  %v3222_v41 = vmul.f32 %v4511_v57, %v3199_v26  ;;  %v3159_v26 = vld [vmem:[%s6217_s7 + $0x8] sm:$0xff] }
 0x538   : > { %v4515_v21 = vpop.eup %4514  ;;  %v3094_v42 = vadd.f32 1.0, %v4513_v2 }
 0x539   : > { %v4517_v44 = vpop.eup %4516  ;;  %v3225_v35 = vmul.f32 %v4515_v21, %v3205_v7  ;;  %3238 = vrot.lane.b32.xlu0 %v3222_v41, %s4567_s22  ;;  %v3165_v7 = vld [vmem:[%s6217_s7 + $0x38] sm:$0xff] }
 0x53a   : > { %v4519_v10 = vpop.eup %4518  ;;  %4538 = vrcp.f32 %v3094_v42  ;;  %v3223_v47 = vmul.f32 %v4517_v44, %v3201_v20 }
 0x53b   : > { %v4521_v6 = vpop.eup %4520  ;;  %v3097_v45 = vadd.f32 1.0, %v4519_v10  ;;  %3244 = vrot.lane.b32.xlu1 %v3225_v35, %s4567_s22  ;;  %4540 = vrcp.f32 %v3096_v48 }
 0x53c   : > { %v4523_v54 = vpop.eup %4522  ;;  %v3095_v27 = vadd.f32 1.0, %v4521_v6 }
 0x53d   : > { %v4525_v29 = vpop.eup %4524  ;;  %3242 = vrot.lane.b32.xlu0 %v3224_v51, %s4567_s22  ;;  %4542 = vrcp.f32 %v3097_v45  ;;  %v3228_v24 = vmul.f32 %v4523_v54, %v3211_v34 }
 0x53e   : > { %v4527_v5 = vpop.eup %4526  ;;  %4544 = vrcp.f32 %v3095_v27  ;;  %v3100_v58 = vadd.f32 1.0, %v4525_v29 }
 0x53f   : > { %v4529_v37 = vpop.eup %4528  ;;  %v3226_v40 = vmul.f32 %v4527_v5, %v3207_v50  ;;  %3240 = vrot.lane.b32.xlu1 %v3223_v47, %s4567_s22 }
 0x540   : > { %v4531_v1 = vpop.eup %4530  ;;  %v3229_v14 = vmul.f32 %v4529_v37, %v3213_v22 }
 0x541   : > { %v4533_v19 = vpop.eup %4532  ;;  %v3098_v16 = vadd.f32 1.0, %v4531_v1  ;;  %3246 = vrot.lane.b32.xlu0 %v3226_v40, %s4567_s22 }
 0x542   : > { %v4535_v13 = vpop.eup %4534  ;;  %v3101_v62 = vadd.f32 1.0, %v4533_v19 }
 0x543   : > { %v4537_v61 = vpop.eup %4536  ;;  %4546 = vrcp.f32 %v3098_v16  ;;  %v3227_v52 = vmul.f32 %v4535_v13, %v3209_v11  ;;  %3250 = vrot.lane.b32.xlu1 %v3228_v24, %s4567_s22 }
 0x544   : > { %4548 = vrcp.f32 %v3100_v58  ;;  %v3099_v31 = vadd.f32 1.0, %v4537_v61 }
 0x545   : > { %3248 = vrot.lane.b32.xlu0 %v3227_v52, %s4567_s22  ;;  %4550 = vrcp.f32 %v3101_v62 }
 0x546   : > { %4552 = vrcp.f32 %v3099_v31 }
 0x547   : > { %v6124_v60 = vpop.eup %4538  ;;  %3252 = vrot.lane.b32.xlu1 %v3229_v14, %s4567_s22 }
 0x548   : > { %v6128_v39 = vpop.eup %4540 }
 0x549   : > { %3112 = vperm.xlu0 %4391, %v6124_v60  }
 0x54a   : > { %v6131_v17 = vpop.eup %4542 }
 0x54b   : > { %3122 = vperm.xlu1 %4390, %v6128_v39   ;;  %v6134_v12 = vpop.eup %4544 }
 0x54d   : > { %3127 = vperm.xlu0 %4391, %v6131_v17  }
 0x54f   : > { %3117 = vperm.xlu1 %4390, %v6134_v12  }
 0x550   : > { %v6137_v36 = vpop.eup %4546 }
 0x551   : > { %3132 = vperm.xlu0 %4391, %v6137_v36   ;;  %v6140_v56 = vpop.eup %4548 }
 0x552   : > { %v6149_v43 = vpop.eup %4550 }
 0x553   : > { %3142 = vperm.xlu1 %4390, %v6140_v56   ;;  %v6152_v53 = vpop.eup %4552 }
 0x555   : > { %3147 = vperm.xlu0 %4391, %v6149_v43  }
 0x557   : > { %3137 = vperm.xlu1 %4390, %v6152_v53  }
 0x5ab   : > { %v3239_v15 = vpop.permute.xlu0 %3238 }
 0x5ac   : > { %v3262_v33 = vadd.f32 %v3239_v15, %v3158_v32 }
 0x5ad   : > { %v3245_v9 = vpop.permute.xlu1 %3244 }
 0x5ae   : > { %v3265_v0 = vadd.f32 %v3245_v9, %v3161_v8  ;;  %3278 = vrot.lane.b32.xlu1 %v3262_v33, %s4568_s12 }
 0x5af   : > { %v3243_v55 = vpop.permute.xlu0 %3242 }
 0x5b0   : > { %v3264_v23 = vadd.f32 %v3243_v55, %v3160_v18  ;;  %3284 = vrot.lane.b32.xlu0 %v3265_v0, %s4568_s12 }
 0x5b1   : > { %v3241_v20 = vpop.permute.xlu1 %3240 }
 0x5b2   : > { %v3263_v3 = vadd.f32 %v3241_v20, %v3159_v26  ;;  %3282 = vrot.lane.b32.xlu1 %v3264_v23, %s4568_s12 }
 0x5b3   : > { %v3247_v49 = vpop.permute.xlu0 %3246 }
 0x5b4   : > { %v3266_v63 = vadd.f32 %v3247_v49, %v3162_v30  ;;  %3280 = vrot.lane.b32.xlu0 %v3263_v3, %s4568_s12 }
 0x5b5   : > { %v3251_v46 = vpop.permute.xlu1 %3250 }
 0x5b6   : > { %v3268_v57 = vadd.f32 %v3251_v46, %v3164_v4  ;;  %3286 = vrot.lane.b32.xlu1 %v3266_v63, %s4568_s12 }
 0x5b7   : > { %v3249_v25 = vpop.permute.xlu0 %3248 }
 0x5b8   : > { %v3267_v2 = vadd.f32 %v3249_v25, %v3163_v59  ;;  %3290 = vrot.lane.b32.xlu0 %v3268_v57, %s4568_s12 }
 0x5b9   : > { %v3253_v41 = vpop.permute.xlu1 %3252 }
 0x5ba   : > { %v3269_v21 = vadd.f32 %v3253_v41, %v3165_v7  ;;  %3288 = vrot.lane.b32.xlu1 %v3267_v2, %s4568_s12 }
 0x5bc   : > { %3292 = vrot.lane.b32.xlu0 %v3269_v21, %s4568_s12 }
 0x5c4   : > { %v3113_v44 = vpop.permute.xlu0 %3112 }
 0x5c5   : > { %v3150_v51 = vmul.f32 %v6124_v60, %v3113_v44 }
 0x5c6   : > { %v3123_v42 = vpop.permute.xlu1 %3122 }
 0x5c7   : > { %v3152_v5 = vmul.f32 %v6128_v39, %v3123_v42 }
 0x5c8   : > { %v3128_v35 = vpop.permute.xlu0 %3127 }
 0x5c9   : > { %v3153_v19 = vmul.f32 %v6131_v17, %v3128_v35 }
 0x5ca   : > { %v3118_v48 = vpop.permute.xlu1 %3117 }
 0x5cb   : > { %v3151_v47 = vmul.f32 %v6134_v12, %v3118_v48 }
 0x5cc   : > { %v3133_v50 = vpop.permute.xlu0 %3132 }
 0x5cd   : > { %v3154_v16 = vmul.f32 %v6137_v36, %v3133_v50 }
 0x5ce   : > { %v3143_v10 = vpop.permute.xlu1 %3142 }
 0x5cf   : > { %v3156_v58 = vmul.f32 %v6140_v56, %v3143_v10 }
 0x5d0   : > { %v3148_v45 = vpop.permute.xlu0 %3147 }
 0x5d1   : > { %v3157_v52 = vmul.f32 %v6149_v43, %v3148_v45 }
 0x5d2   : > { %v3138_v6 = vpop.permute.xlu1 %3137 }
 0x5d3   : > { %v3155_v31 = vmul.f32 %v6152_v53, %v3138_v6 }
 0x620   : > { %v3279_v54 = vpop.permute.xlu1 %3278 }
 0x621   : > { %v3303_v34 = vsel %vm3302_vm5, %v3150_v51, %v3279_v54 }
 0x622   : > { %v3285_v29 = vpop.permute.xlu0 %3284  ;;  %4119 = vmatprep.mubr.msk.f32.mxu0 %vm3313_vm0, %v3303_v34 }
 0x623   : > { %v3306_v13 = vsel %vm3302_vm5, %v3153_v19, %v3285_v29 }
 0x624   : > { %v3283_v27 = vpop.permute.xlu1 %3282 }
 0x625   : > { %v3305_v1 = vsel %vm3302_vm5, %v3152_v5, %v3283_v27 }
 0x626   : > { %v3281_v37 = vpop.permute.xlu0 %3280 }
 0x627   : > { %v3304_v40 = vsel %vm3302_vm5, %v3151_v47, %v3281_v37 }
 0x628   : > { %4120 = vmatmul.mubr.msk.f32.vlgmr.msra.gmra.mxu0 %vm3313_vm0, %v3304_v40  ;;  %v3287_v11 = vpop.permute.xlu1 %3286 }
 0x629   : > { %4122 = vmatprep.mubr.msk.f32.mxu0 %vm3313_vm0, %v3305_v1  ;;  %v3307_v61 = vsel %vm3302_vm5, %v3154_v16, %v3287_v11 }
 0x62a   : > { %v3291_v24 = vpop.permute.xlu0 %3290 }
 0x62b   : > { %v3309_v22 = vsel %vm3302_vm5, %v3156_v58, %v3291_v24 }
 0x62c   : > { %4123 = vmatmul.mubr.msk.f32.gmra.mxu0 %vm3313_vm0, %v3306_v13  ;;  %4128 = vmatprep.mubr.msk.f32.mxu1 %vm3313_vm0, %v3309_v22  ;;  %v3289_v62 = vpop.permute.xlu1 %3288 }
 0x62d   : > { %4125 = vmatprep.mubr.msk.f32.mxu0 %vm3313_vm0, %v3307_v61  ;;  %v3308_v60 = vsel %vm3302_vm5, %v3155_v31, %v3289_v62 }
 0x62e   : > { %v3293_v14 = vpop.permute.xlu0 %3292 }
 0x62f   : > { %v3310_v39 = vsel %vm3302_vm5, %v3157_v52, %v3293_v14 }
 0x630   : > { %4126 = vmatmul.mubr.msk.f32.gmra.mxu0 %vm3313_vm0, %v3308_v60  ;;  %4129 = vmatmul.mubr.msk.f32.vlgmr.msra.gmra.mxu1 %vm3313_vm0, %v3310_v39 }
 0x6e8   : > { %v4121_v17 = vpop.f32.mrf.mxu0 }
 0x6e9   : > { %3448 = vst [vmem:[%s359_s28 + $0x8] sm:$0xff] %v4121_v17 }
 0x6ea   : > { %v3408_v12 = vpop.f32.mrf.mxu0 }
 0x6eb   : > { %3447 = vst [vmem:[%s359_s28] sm:$0xff] %v3408_v12 }
 0x6ec   : > { %v4124_v36 = vpop.f32.mrf.mxu0 }
 0x6ed   : > { %3450 = vst [vmem:[%s359_s28 + $0x18] sm:$0xff] %v4124_v36 }
 0x6ee   : > { %v3418_v56 = vpop.f32.mrf.mxu0 }
 0x6ef   : > { %3449 = vst [vmem:[%s359_s28 + $0x10] sm:$0xff] %v3418_v56 }
 0x6f0   : > { %v4127_v28 = vpop.f32.mrf.mxu0  ;;  %v4130_v38 = vpop.f32.mrf.mxu1 }
 0x6f1   : > { %3452 = vst [vmem:[%s359_s28 + $0x28] sm:$0xff] %v4127_v28  ;;  %3454 = vst [vmem:[%s359_s28 + $0x38] sm:$0xff] %v4130_v38 }
 0x6f2   : > { %v3428_v43 = vpop.f32.mrf.mxu0  ;;  %v3438_v53 = vpop.f32.mrf.mxu1 }
 0x6f3   : > { %3451 = vst [vmem:[%s359_s28 + $0x20] sm:$0xff] %v3428_v43  ;;  %3453 = vst [vmem:[%s359_s28 + $0x30] sm:$0xff] %v3438_v53 }
 0x6f4 PF: > { %s20_s13 = sadd.s32 1, %s4560_s13  }
 0x6f5   : > { %p17_p4 = scmp.ge.s32.totalorder %s20_s13, 4  }
 0x6f7   :  { %19 = sbr.rel (!%p17_p4) target bundleno = 1 (0x1), region = 92 }

</bundles_post_ra>
